<compile_context>
chip_gen: v6e
topology: v6e:2x2x1
jax: 0.10.0
libtpu: 0.0.40
codegen_flags: <defaults>
</compile_context>

<pallas_src>
import functools

import jax
import jax.numpy as jnp
from jax import lax
from jax.experimental import pallas as pl
from jax.experimental.pallas import tpu as pltpu


# Interior of the feature-map scratch starts at this (sublane-aligned) column
# so interior stores are 8-aligned; halo reads use shifted loads.
_W_OFF = 8


def _fused_kernel(xph_ref, wdn_ref, bdn_ref, dw_ref, pw_ref, wup_ref, bup_ref,
                  o_ref, feat_ref, *, scale):
    # xph_ref: (Bblk, 2, 2, Ho+1, Wo+1, C) bf16  phase-split padded input
    # wdn_ref: (9*C, C) bf16   down-conv taps, rows ordered (k = kh*3+kw, ci)
    # bdn_ref: (1, C)   f32
    # dw_ref : (2, 9, C) f32   depthwise taps, block1/block2
    # pw_ref : (2, C, C) bf16  pointwise weights (ci, co)
    # wup_ref: (4*C, 4*C) bf16 transpose-conv block weight,
    #                          rows = [x11,x10,x01,x00], cols = [ee,eo,oe,oo]
    # bup_ref: (1, 4*C) f32    up bias tiled over the 4 phases
    # o_ref  : (Bblk, Ho*Wo, 4*C) f32   lane-dense phase output
    # feat_ref: (Bblk, Ho+2, Wp, C) f32 VMEM scratch, zero-bordered feature map
    Bblk = xph_ref.shape[0]
    Hp1, Wp1, C = xph_ref.shape[3], xph_ref.shape[4], xph_ref.shape[5]
    Ho, Wo = Hp1 - 1, Wp1 - 1
    N = Ho * Wo
    M = Bblk * N
    W0 = _W_OFF
    Wp = feat_ref.shape[2]
    f32, bf16 = jnp.float32, jnp.bfloat16

    # ---- zero only the scratch border cells that are read as zeros ----------
    zrow = jnp.zeros((Bblk, 1, Wp, C), f32)
    feat_ref[:, 0:1, :, :] = zrow
    feat_ref[:, Ho + 1:Ho + 2, :, :] = zrow
    zcol = jnp.zeros((Bblk, Ho + 2, 1, C), f32)
    feat_ref[:, :, W0 - 1:W0, :] = zcol
    feat_ref[:, :, W0 + Wo:W0 + Wo + 1, :] = zcol

    # ---------------- stage 1: Conv2d(C, C, 3, stride=2, pad=1) + bias -------
    # tap (kh, kw) at output (m, n) reads padded pixel (2m+kh, 2n+kw)
    # = phase[kh%2, kw%2][m + kh//2, n + kw//2].  All 9 taps are concatenated
    # along channels -> ONE MXU matmul with K = 9*C.
    taps = []
    for kh in range(3):
        pr, ar = kh % 2, kh // 2
        for kw in range(3):
            pc, ac = kw % 2, kw // 2
            taps.append(
                xph_ref[:, pr, pc, ar:ar + Ho, ac:ac + Wo, :].reshape(M, C))
    xcat = jnp.concatenate(taps, axis=-1)                      # (M, 9C) bf16
    y1 = jnp.dot(xcat, wdn_ref[...],
                 preferred_element_type=f32) + bdn_ref[...]    # (M, C) f32
    feat_ref[:, 1:1 + Ho, W0:W0 + Wo, :] = y1.reshape(Bblk, Ho, Wo, C)

    # ---------------- stage 2: two DepthwiseDenoisingBlocks ------------------
    for bi in range(2):
        dacc = None
        for kh in range(3):
            # one row band per kh; the 3 column shifts are value slices
            band = feat_ref[:, kh:kh + Ho, W0 - 1:W0 + Wo + 1, :]
            for kw in range(3):
                k = kh * 3 + kw
                term = band[:, :, kw:kw + Wo, :] * dw_ref[bi, k:k + 1, :]
                dacc = term if dacc is None else dacc + term   # VPU MAC, f32
        y = jnp.dot(dacc.reshape(M, C).astype(bf16), pw_ref[bi],
                    preferred_element_type=f32)                # pointwise (MXU)
        y = y * (1.0 / (1.0 + jnp.exp(-y)))                    # exact SiLU
        # residual: re-read the interior right before the add (no live range
        # held across the depthwise loop / pointwise matmul).
        feat_ref[:, 1:1 + Ho, W0:W0 + Wo, :] = (
            feat_ref[:, 1:1 + Ho, W0:W0 + Wo, :]
            + scale * y.reshape(Bblk, Ho, Wo, C))

    # -------- stage 3: ConvTranspose2d(3, s=2, p=1, out_pad=1) + bias --------
    # phase (r, s) at output (2m+r, 2n+s):
    #   ee = x00@W11
    #   eo = x01@W10 + x00@W12
    #   oe = x10@W01 + x00@W21
    #   oo = x11@W00 + x10@W02 + x01@W20 + x00@W22
    # -> one block matmul with xcat4 = [x11, x10, x01, x00] and the host-built
    #    zero-padded (4C, 4C) weight.  Out-of-range m+1 / n+1 hit the zero
    #    border of feat_ref.
    x00 = feat_ref[:, 1:1 + Ho, W0:W0 + Wo, :].reshape(M, C).astype(bf16)
    x01 = feat_ref[:, 1:1 + Ho, W0 + 1:W0 + 1 + Wo, :].reshape(M, C).astype(bf16)
    x10 = feat_ref[:, 2:2 + Ho, W0:W0 + Wo, :].reshape(M, C).astype(bf16)
    x11 = feat_ref[:, 2:2 + Ho, W0 + 1:W0 + 1 + Wo, :].reshape(M, C).astype(bf16)
    xcat4 = jnp.concatenate([x11, x10, x01, x00], axis=-1)     # (M, 4C) bf16
    y_up = jnp.dot(xcat4, wup_ref[...],
                   preferred_element_type=f32) + bup_ref[...]  # (M, 4C) f32
    o_ref[...] = y_up.reshape(Bblk, N, 4 * C)                  # lane-dense store


def _pick_batch_block(B, N, target_m=256):
    """Largest divisor of B with Bblk*N <= target_m (MXU row fill vs VMEM)."""
    best = 1
    for cand in range(1, B + 1):
        if B % cand == 0 and cand * N <= target_m:
            best = cand
    return best


def denoising_net_forward(x_nchw, params, scale=0.1):
    B, C, H, W = x_nchw.shape
    assert H % 2 == 0 and W % 2 == 0, "spatial dims must be even"
    Ho, Wo = H // 2, W // 2
    N = Ho * Wo
    Bblk = _pick_batch_block(B, N)

    # ---- glue: NCHW -> NHWC bf16, pad by 1, split into 2x2 input phases -----
    x = jnp.transpose(x_nchw, (0, 2, 3, 1)).astype(jnp.bfloat16)
    xp = jnp.pad(x, ((0, 0), (1, 1), (1, 1), (0, 0)))
    xph = xp.reshape(B, Ho + 1, 2, Wo + 1, 2, C).transpose(0, 2, 4, 1, 3, 5)

    # ---- weights -------------------------------------------------------------
    # down conv: (9*C, C), rows ordered (k = kh*3 + kw, ci)
    wdn = jnp.transpose(params["down_w"], (2, 3, 1, 0)).reshape(9 * C, C)
    wdn = wdn.astype(jnp.bfloat16)
    bdn = params["down_b"].reshape(1, C).astype(jnp.float32)
    # depthwise taps (2, 9, C) and pointwise (2, C, C)
    dw = jnp.stack([
        jnp.transpose(params["b1_dw"][:, 0], (1, 2, 0)).reshape(9, C),
        jnp.transpose(params["b2_dw"][:, 0], (1, 2, 0)).reshape(9, C),
    ]).astype(jnp.float32)
    pw = jnp.stack([params["b1_pw"][:, :, 0, 0].T,
                    params["b2_pw"][:, :, 0, 0].T]).astype(jnp.bfloat16)
    # transpose-conv block weight (4C, 4C): rows [x11,x10,x01,x00], cols [ee,eo,oe,oo]
    up_w = params["up_w"].astype(jnp.float32)          # (Cin, Cout, 3, 3)
    Z = jnp.zeros((C, C), jnp.float32)

    def Wt(kh, kw):
        return up_w[:, :, kh, kw]                      # (Cin, Cout)

    wup_blk = jnp.concatenate([
        jnp.concatenate([Z,        Z,        Z,        Wt(0, 0)], axis=1),  # x11
        jnp.concatenate([Z,        Z,        Wt(0, 1), Wt(0, 2)], axis=1),  # x10
        jnp.concatenate([Z,        Wt(1, 0), Z,        Wt(2, 0)], axis=1),  # x01
        jnp.concatenate([Wt(1, 1), Wt(1, 2), Wt(2, 1), Wt(2, 2)], axis=1),  # x00
    ], axis=0).astype(jnp.bfloat16)                    # (4C, 4C)
    bup = jnp.tile(params["up_b"].astype(jnp.float32), 4).reshape(1, 4 * C)

    kernel = functools.partial(_fused_kernel, scale=scale)
    Wp_scr = _W_OFF + Wo + 8
    phases = pl.pallas_call(
        kernel,
        out_shape=jax.ShapeDtypeStruct((B, N, 4 * C), jnp.float32),
        grid_spec=pltpu.PrefetchScalarGridSpec(
            num_scalar_prefetch=0,
            grid=(B // Bblk,),
            in_specs=[
                pl.BlockSpec((Bblk, 2, 2, Ho + 1, Wo + 1, C),
                             lambda b: (b, 0, 0, 0, 0, 0)),
                pl.BlockSpec((9 * C, C), lambda b: (0, 0)),
                pl.BlockSpec((1, C), lambda b: (0, 0)),
                pl.BlockSpec((2, 9, C), lambda b: (0, 0, 0)),
                pl.BlockSpec((2, C, C), lambda b: (0, 0, 0)),
                pl.BlockSpec((4 * C, 4 * C), lambda b: (0, 0)),
                pl.BlockSpec((1, 4 * C), lambda b: (0, 0)),
            ],
            out_specs=pl.BlockSpec((Bblk, N, 4 * C), lambda b: (b, 0, 0)),
            scratch_shapes=[pltpu.VMEM((Bblk, Ho + 2, Wp_scr, C), jnp.float32)],
        ),
        compiler_params=pltpu.CompilerParams(
            dimension_semantics=("parallel",),
            vmem_limit_bytes=32 * 1024 * 1024,
        ),
    )(xph, wdn, bdn, dw, pw, wup_blk, bup)

    # ---- glue: interleave the 4 sub-pixel phases, back to NCHW (one pass) ---
    # phases[b, m*Wo+n, (2r+s)*C + c] = out[b, c, 2m+r, 2n+s]
    ph = phases.reshape(B, Ho, Wo, 2, 2, C)
    out = ph.transpose(0, 5, 1, 3, 2, 4).reshape(B, C, H, W)
    return out


# ----------------------------------------------------------------------------
# Pure-JAX (XLA conv) reference of the exact PyTorch forward, for validation.
# ----------------------------------------------------------------------------
def reference_forward(x, params, scale=0.1):
    dn = ("NCHW", "OIHW", "NCHW")
    C = x.shape[1]
    y = lax.conv_general_dilated(x, params["down_w"], (2, 2), [(1, 1), (1, 1)],
                                 dimension_numbers=dn)
    y = y + params["down_b"][None, :, None, None]

    def block(v, dwt, pwt):
        d = lax.conv_general_dilated(v, dwt, (1, 1), [(1, 1), (1, 1)],
                                     dimension_numbers=dn, feature_group_count=C)
        p = lax.conv_general_dilated(d, pwt, (1, 1), [(0, 0), (0, 0)],
                                     dimension_numbers=dn)
        a = p * jax.nn.sigmoid(p)
        return v + scale * a

    y = block(y, params["b1_dw"], params["b1_pw"])
    y = block(y, params["b2_dw"], params["b2_pw"])

    w_conv = jnp.transpose(params["up_w"], (1, 0, 2, 3))[:, :, ::-1, ::-1]
    y = lax.conv_general_dilated(y, w_conv, (1, 1), [(1, 2), (1, 2)],
                                 lhs_dilation=(2, 2), dimension_numbers=dn)
    y = y + params["up_b"][None, :, None, None]
    return y


# ----------------------------------------------------------------------------
# Deterministic synthetic parameters (PyTorch-convention shapes).
# ----------------------------------------------------------------------------
def init_params(key, C):
    ks = jax.random.split(key, 8)
    s = 0.05
    return {
        "down_w": jax.random.normal(ks[0], (C, C, 3, 3), jnp.float32) * s,
        "down_b": jax.random.normal(ks[1], (C,), jnp.float32) * s,
        "b1_dw": jax.random.normal(ks[2], (C, 1, 3, 3), jnp.float32) * s,
        "b1_pw": jax.random.normal(ks[3], (C, C, 1, 1), jnp.float32) * s,
        "b2_dw": jax.random.normal(ks[4], (C, 1, 3, 3), jnp.float32) * s,
        "b2_pw": jax.random.normal(ks[5], (C, C, 1, 1), jnp.float32) * s,
        "up_w": jax.random.normal(ks[6], (C, C, 3, 3), jnp.float32) * s,  # (Cin, Cout, kH, kW)
        "up_b": jax.random.normal(ks[7], (C,), jnp.float32) * s,
    }


if __name__ == "__main__":
    B, C, H, W = 2, 64, 16, 16
    key = jax.random.PRNGKey(0)
    kx, kp = jax.random.split(key)
    x = jax.random.normal(kx, (B, C, H, W), jnp.float32)
    params = init_params(kp, C)

    fwd = jax.jit(functools.partial(denoising_net_forward, scale=0.1))
    out = jax.block_until_ready(fwd(x, params))
    assert out.shape == (B, C, H, W), out.shape

    ref = jax.block_until_ready(reference_forward(x, params, scale=0.1))
    # bf16 MXU operands vs f32 XLA conv reference -> loose tolerance
    max_err = float(jnp.max(jnp.abs(out - ref)))
    assert jnp.allclose(out, ref, rtol=5e-2, atol=5e-2), max_err

    print("KERNEL_OK")
</pallas_src>

<mosaic_0001>
module attributes {stable_mosaic.version = 11 : i64} {
  func.func @_fused_kernel(%arg0: i32, %arg1: memref<2x2x2x9x9x64xbf16, #tpu.memory_space<vmem>>, %arg2: memref<576x64xbf16, #tpu.memory_space<vmem>>, %arg3: memref<1x64xf32, #tpu.memory_space<vmem>>, %arg4: memref<2x9x64xf32, #tpu.memory_space<vmem>>, %arg5: memref<2x64x64xbf16, #tpu.memory_space<vmem>>, %arg6: memref<256x256xbf16, #tpu.memory_space<vmem>>, %arg7: memref<1x256xf32, #tpu.memory_space<vmem>>, %arg8: memref<2x64x256xf32, #tpu.memory_space<vmem>>, %arg9: memref<2x10x24x64xf32, #tpu.memory_space<vmem>>) attributes {dimension_semantics = [#tpu.dimension_semantics<parallel>], iteration_bounds = array<i64: 1>, scalar_prefetch = 0 : i64, scratch_operands = 1 : i64, tpu.core_type = #tpu.core_type<tc>, window_params = [{transform_indices = @transform_0, window_bounds = array<i64: 2, 2, 2, 9, 9, 64>}, {pipeline_mode = #tpu.pipeline_mode<synchronous>, transform_indices = @transform_1, window_bounds = array<i64: 576, 64>}, {pipeline_mode = #tpu.pipeline_mode<synchronous>, transform_indices = @transform_2, window_bounds = array<i64: 1, 64>}, {pipeline_mode = #tpu.pipeline_mode<synchronous>, transform_indices = @transform_3, window_bounds = array<i64: 2, 9, 64>}, {pipeline_mode = #tpu.pipeline_mode<synchronous>, transform_indices = @transform_4, window_bounds = array<i64: 2, 64, 64>}, {pipeline_mode = #tpu.pipeline_mode<synchronous>, transform_indices = @transform_5, window_bounds = array<i64: 256, 256>}, {pipeline_mode = #tpu.pipeline_mode<synchronous>, transform_indices = @transform_6, window_bounds = array<i64: 1, 256>}, {transform_indices = @transform_7, window_bounds = array<i64: 2, 64, 256>}]} {
    %cst = arith.constant 0.000000e+00 : f32
    %0 = vector.broadcast %cst : f32 to vector<2x1x24x64xf32>
    %c0 = arith.constant 0 : index
    %c0_0 = arith.constant 0 : index
    %c0_1 = arith.constant 0 : index
    %c0_2 = arith.constant 0 : index
    %1 = vector.load %arg9[%c0, %c0_0, %c0_1, %c0_2] : memref<2x10x24x64xf32, #tpu.memory_space<vmem>>, vector<2x1x24x64xf32>
    tpu.vector_store %arg9[%c0, %c0_0, %c0_1, %c0_2], %0 {strides = array<i32>} : memref<2x10x24x64xf32, #tpu.memory_space<vmem>>, vector<2x1x24x64xf32>,
    %c0_3 = arith.constant 0 : index
    %c9 = arith.constant 9 : index
    %c0_4 = arith.constant 0 : index
    %c0_5 = arith.constant 0 : index
    %2 = vector.load %arg9[%c0_3, %c9, %c0_4, %c0_5] : memref<2x10x24x64xf32, #tpu.memory_space<vmem>>, vector<2x1x24x64xf32>
    tpu.vector_store %arg9[%c0_3, %c9, %c0_4, %c0_5], %0 {strides = array<i32>} : memref<2x10x24x64xf32, #tpu.memory_space<vmem>>, vector<2x1x24x64xf32>,
    %cst_6 = arith.constant 0.000000e+00 : f32
    %3 = vector.broadcast %cst_6 : f32 to vector<2x10x1x64xf32>
    %c0_7 = arith.constant 0 : index
    %c0_8 = arith.constant 0 : index
    %c7 = arith.constant 7 : index
    %c0_9 = arith.constant 0 : index
    %4 = vector.load %arg9[%c0_7, %c0_8, %c7, %c0_9] : memref<2x10x24x64xf32, #tpu.memory_space<vmem>>, vector<2x10x1x64xf32>
    tpu.vector_store %arg9[%c0_7, %c0_8, %c7, %c0_9], %3 {strides = array<i32>} : memref<2x10x24x64xf32, #tpu.memory_space<vmem>>, vector<2x10x1x64xf32>,
    %c0_10 = arith.constant 0 : index
    %c0_11 = arith.constant 0 : index
    %c16 = arith.constant 16 : index
    %c0_12 = arith.constant 0 : index
    %5 = vector.load %arg9[%c0_10, %c0_11, %c16, %c0_12] : memref<2x10x24x64xf32, #tpu.memory_space<vmem>>, vector<2x10x1x64xf32>
    tpu.vector_store %arg9[%c0_10, %c0_11, %c16, %c0_12], %3 {strides = array<i32>} : memref<2x10x24x64xf32, #tpu.memory_space<vmem>>, vector<2x10x1x64xf32>,
    %c0_13 = arith.constant 0 : index
    %c0_14 = arith.constant 0 : index
    %c0_15 = arith.constant 0 : index
    %c0_16 = arith.constant 0 : index
    %c0_17 = arith.constant 0 : index
    %c0_18 = arith.constant 0 : index
    %6 = vector.load %arg1[%c0_13, %c0_14, %c0_15, %c0_16, %c0_17, %c0_18] : memref<2x2x2x9x9x64xbf16, #tpu.memory_space<vmem>>, vector<2x1x1x8x8x64xbf16>
    %7 = vector.shape_cast %6 : vector<2x1x1x8x8x64xbf16> to vector<2x8x8x64xbf16>
    %8 = vector.shape_cast %7 : vector<2x8x8x64xbf16> to vector<128x64xbf16>
    %c0_19 = arith.constant 0 : index
    %c0_20 = arith.constant 0 : index
    %c1 = arith.constant 1 : index
    %c0_21 = arith.constant 0 : index
    %c0_22 = arith.constant 0 : index
    %c0_23 = arith.constant 0 : index
    %9 = vector.load %arg1[%c0_19, %c0_20, %c1, %c0_21, %c0_22, %c0_23] : memref<2x2x2x9x9x64xbf16, #tpu.memory_space<vmem>>, vector<2x1x1x8x8x64xbf16>
    %10 = vector.shape_cast %9 : vector<2x1x1x8x8x64xbf16> to vector<2x8x8x64xbf16>
    %11 = vector.shape_cast %10 : vector<2x8x8x64xbf16> to vector<128x64xbf16>
    %c0_24 = arith.constant 0 : index
    %c0_25 = arith.constant 0 : index
    %c0_26 = arith.constant 0 : index
    %c0_27 = arith.constant 0 : index
    %c1_28 = arith.constant 1 : index
    %c0_29 = arith.constant 0 : index
    %12 = vector.load %arg1[%c0_24, %c0_25, %c0_26, %c0_27, %c1_28, %c0_29] : memref<2x2x2x9x9x64xbf16, #tpu.memory_space<vmem>>, vector<2x1x1x8x8x64xbf16>
    %13 = vector.shape_cast %12 : vector<2x1x1x8x8x64xbf16> to vector<2x8x8x64xbf16>
    %14 = vector.shape_cast %13 : vector<2x8x8x64xbf16> to vector<128x64xbf16>
    %c0_30 = arith.constant 0 : index
    %c1_31 = arith.constant 1 : index
    %c0_32 = arith.constant 0 : index
    %c0_33 = arith.constant 0 : index
    %c0_34 = arith.constant 0 : index
    %c0_35 = arith.constant 0 : index
    %15 = vector.load %arg1[%c0_30, %c1_31, %c0_32, %c0_33, %c0_34, %c0_35] : memref<2x2x2x9x9x64xbf16, #tpu.memory_space<vmem>>, vector<2x1x1x8x8x64xbf16>
    %16 = vector.shape_cast %15 : vector<2x1x1x8x8x64xbf16> to vector<2x8x8x64xbf16>
    %17 = vector.shape_cast %16 : vector<2x8x8x64xbf16> to vector<128x64xbf16>
    %c0_36 = arith.constant 0 : index
    %c1_37 = arith.constant 1 : index
    %c1_38 = arith.constant 1 : index
    %c0_39 = arith.constant 0 : index
    %c0_40 = arith.constant 0 : index
    %c0_41 = arith.constant 0 : index
    %18 = vector.load %arg1[%c0_36, %c1_37, %c1_38, %c0_39, %c0_40, %c0_41] : memref<2x2x2x9x9x64xbf16, #tpu.memory_space<vmem>>, vector<2x1x1x8x8x64xbf16>
    %19 = vector.shape_cast %18 : vector<2x1x1x8x8x64xbf16> to vector<2x8x8x64xbf16>
    %20 = vector.shape_cast %19 : vector<2x8x8x64xbf16> to vector<128x64xbf16>
    %c0_42 = arith.constant 0 : index
    %c1_43 = arith.constant 1 : index
    %c0_44 = arith.constant 0 : index
    %c0_45 = arith.constant 0 : index
    %c1_46 = arith.constant 1 : index
    %c0_47 = arith.constant 0 : index
    %21 = vector.load %arg1[%c0_42, %c1_43, %c0_44, %c0_45, %c1_46, %c0_47] : memref<2x2x2x9x9x64xbf16, #tpu.memory_space<vmem>>, vector<2x1x1x8x8x64xbf16>
    %22 = vector.shape_cast %21 : vector<2x1x1x8x8x64xbf16> to vector<2x8x8x64xbf16>
    %23 = vector.shape_cast %22 : vector<2x8x8x64xbf16> to vector<128x64xbf16>
    %c0_48 = arith.constant 0 : index
    %c0_49 = arith.constant 0 : index
    %c0_50 = arith.constant 0 : index
    %c1_51 = arith.constant 1 : index
    %c0_52 = arith.constant 0 : index
    %c0_53 = arith.constant 0 : index
    %24 = vector.load %arg1[%c0_48, %c0_49, %c0_50, %c1_51, %c0_52, %c0_53] : memref<2x2x2x9x9x64xbf16, #tpu.memory_space<vmem>>, vector<2x1x1x8x8x64xbf16>
    %25 = vector.shape_cast %24 : vector<2x1x1x8x8x64xbf16> to vector<2x8x8x64xbf16>
    %26 = vector.shape_cast %25 : vector<2x8x8x64xbf16> to vector<128x64xbf16>
    %c0_54 = arith.constant 0 : index
    %c0_55 = arith.constant 0 : index
    %c1_56 = arith.constant 1 : index
    %c1_57 = arith.constant 1 : index
    %c0_58 = arith.constant 0 : index
    %c0_59 = arith.constant 0 : index
    %27 = vector.load %arg1[%c0_54, %c0_55, %c1_56, %c1_57, %c0_58, %c0_59] : memref<2x2x2x9x9x64xbf16, #tpu.memory_space<vmem>>, vector<2x1x1x8x8x64xbf16>
    %28 = vector.shape_cast %27 : vector<2x1x1x8x8x64xbf16> to vector<2x8x8x64xbf16>
    %29 = vector.shape_cast %28 : vector<2x8x8x64xbf16> to vector<128x64xbf16>
    %c0_60 = arith.constant 0 : index
    %c0_61 = arith.constant 0 : index
    %c0_62 = arith.constant 0 : index
    %c1_63 = arith.constant 1 : index
    %c1_64 = arith.constant 1 : index
    %c0_65 = arith.constant 0 : index
    %30 = vector.load %arg1[%c0_60, %c0_61, %c0_62, %c1_63, %c1_64, %c0_65] : memref<2x2x2x9x9x64xbf16, #tpu.memory_space<vmem>>, vector<2x1x1x8x8x64xbf16>
    %31 = vector.shape_cast %30 : vector<2x1x1x8x8x64xbf16> to vector<2x8x8x64xbf16>
    %32 = vector.shape_cast %31 : vector<2x8x8x64xbf16> to vector<128x64xbf16>
    %33 = tpu.concatenate %8, %11, %14, %17, %20, %23, %26, %29, %32 in 1 : vector<128x64xbf16>, vector<128x64xbf16>, vector<128x64xbf16>, vector<128x64xbf16>, vector<128x64xbf16>, vector<128x64xbf16>, vector<128x64xbf16>, vector<128x64xbf16>, vector<128x64xbf16> -> vector<128x576xbf16>
    %c0_66 = arith.constant 0 : index
    %c0_67 = arith.constant 0 : index
    %34 = vector.load %arg2[%c0_66, %c0_67] : memref<576x64xbf16, #tpu.memory_space<vmem>>, vector<576x64xbf16>
    %cst_68 = arith.constant dense<0.000000e+00> : vector<128x64xf32>
    %35 = tpu.matmul %33, %34, %cst_68 {dimension_numbers = #tpu.dot_dimension_numbers<[1], [0], [0], [1], [0, 0, 1, 1], [], []>} : vector<128x576xbf16>, vector<576x64xbf16>, vector<128x64xf32> -> vector<128x64xf32>
    %c0_69 = arith.constant 0 : index
    %c0_70 = arith.constant 0 : index
    %36 = vector.load %arg3[%c0_69, %c0_70] : memref<1x64xf32, #tpu.memory_space<vmem>>, vector<1x64xf32>
    %37 = vector.broadcast %36 : vector<1x64xf32> to vector<128x64xf32>
    %38 = arith.addf %35, %37 : vector<128x64xf32>
    %39 = vector.shape_cast %38 : vector<128x64xf32> to vector<2x8x8x64xf32>
    %c0_71 = arith.constant 0 : index
    %c1_72 = arith.constant 1 : index
    %c8 = arith.constant 8 : index
    %c0_73 = arith.constant 0 : index
    %40 = vector.load %arg9[%c0_71, %c1_72, %c8, %c0_73] : memref<2x10x24x64xf32, #tpu.memory_space<vmem>>, vector<2x8x8x64xf32>
    tpu.vector_store %arg9[%c0_71, %c1_72, %c8, %c0_73], %39 {strides = array<i32>} : memref<2x10x24x64xf32, #tpu.memory_space<vmem>>, vector<2x8x8x64xf32>,
    %c0_74 = arith.constant 0 : index
    %c0_75 = arith.constant 0 : index
    %c7_76 = arith.constant 7 : index
    %c0_77 = arith.constant 0 : index
    %41 = vector.load %arg9[%c0_74, %c0_75, %c7_76, %c0_77] : memref<2x10x24x64xf32, #tpu.memory_space<vmem>>, vector<2x8x10x64xf32>
    %42 = vector.extract_strided_slice %41 {offsets = [0, 0, 0, 0], sizes = [2, 8, 8, 64], strides = [1, 1, 1, 1]} : vector<2x8x10x64xf32> to vector<2x8x8x64xf32>
    %c0_78 = arith.constant 0 : index
    %c0_79 = arith.constant 0 : index
    %c0_80 = arith.constant 0 : index
    %43 = vector.load %arg4[%c0_78, %c0_79, %c0_80] : memref<2x9x64xf32, #tpu.memory_space<vmem>>, vector<1x1x64xf32>
    %44 = vector.shape_cast %43 : vector<1x1x64xf32> to vector<1x64xf32>
    %45 = vector.shape_cast %44 : vector<1x64xf32> to vector<1x1x1x64xf32>
    %46 = vector.broadcast %45 : vector<1x1x1x64xf32> to vector<2x8x8x64xf32>
    %47 = arith.mulf %42, %46 : vector<2x8x8x64xf32>
    %48 = vector.extract_strided_slice %41 {offsets = [0, 0, 1, 0], sizes = [2, 8, 8, 64], strides = [1, 1, 1, 1]} : vector<2x8x10x64xf32> to vector<2x8x8x64xf32>
    %c0_81 = arith.constant 0 : index
    %c1_82 = arith.constant 1 : index
    %c0_83 = arith.constant 0 : index
    %49 = vector.load %arg4[%c0_81, %c1_82, %c0_83] : memref<2x9x64xf32, #tpu.memory_space<vmem>>, vector<1x1x64xf32>
    %50 = vector.shape_cast %49 : vector<1x1x64xf32> to vector<1x64xf32>
    %51 = vector.shape_cast %50 : vector<1x64xf32> to vector<1x1x1x64xf32>
    %52 = vector.broadcast %51 : vector<1x1x1x64xf32> to vector<2x8x8x64xf32>
    %53 = arith.mulf %48, %52 : vector<2x8x8x64xf32>
    %54 = arith.addf %47, %53 : vector<2x8x8x64xf32>
    %55 = vector.extract_strided_slice %41 {offsets = [0, 0, 2, 0], sizes = [2, 8, 8, 64], strides = [1, 1, 1, 1]} : vector<2x8x10x64xf32> to vector<2x8x8x64xf32>
    %c0_84 = arith.constant 0 : index
    %c2 = arith.constant 2 : index
    %c0_85 = arith.constant 0 : index
    %56 = vector.load %arg4[%c0_84, %c2, %c0_85] : memref<2x9x64xf32, #tpu.memory_space<vmem>>, vector<1x1x64xf32>
    %57 = vector.shape_cast %56 : vector<1x1x64xf32> to vector<1x64xf32>
    %58 = vector.shape_cast %57 : vector<1x64xf32> to vector<1x1x1x64xf32>
    %59 = vector.broadcast %58 : vector<1x1x1x64xf32> to vector<2x8x8x64xf32>
    %60 = arith.mulf %55, %59 : vector<2x8x8x64xf32>
    %61 = arith.addf %54, %60 : vector<2x8x8x64xf32>
    %c0_86 = arith.constant 0 : index
    %c1_87 = arith.constant 1 : index
    %c7_88 = arith.constant 7 : index
    %c0_89 = arith.constant 0 : index
    %62 = vector.load %arg9[%c0_86, %c1_87, %c7_88, %c0_89] : memref<2x10x24x64xf32, #tpu.memory_space<vmem>>, vector<2x8x10x64xf32>
    %63 = vector.extract_strided_slice %62 {offsets = [0, 0, 0, 0], sizes = [2, 8, 8, 64], strides = [1, 1, 1, 1]} : vector<2x8x10x64xf32> to vector<2x8x8x64xf32>
    %c0_90 = arith.constant 0 : index
    %c3 = arith.constant 3 : index
    %c0_91 = arith.constant 0 : index
    %64 = vector.load %arg4[%c0_90, %c3, %c0_91] : memref<2x9x64xf32, #tpu.memory_space<vmem>>, vector<1x1x64xf32>
    %65 = vector.shape_cast %64 : vector<1x1x64xf32> to vector<1x64xf32>
    %66 = vector.shape_cast %65 : vector<1x64xf32> to vector<1x1x1x64xf32>
    %67 = vector.broadcast %66 : vector<1x1x1x64xf32> to vector<2x8x8x64xf32>
    %68 = arith.mulf %63, %67 : vector<2x8x8x64xf32>
    %69 = arith.addf %61, %68 : vector<2x8x8x64xf32>
    %70 = vector.extract_strided_slice %62 {offsets = [0, 0, 1, 0], sizes = [2, 8, 8, 64], strides = [1, 1, 1, 1]} : vector<2x8x10x64xf32> to vector<2x8x8x64xf32>
    %c0_92 = arith.constant 0 : index
    %c4 = arith.constant 4 : index
    %c0_93 = arith.constant 0 : index
    %71 = vector.load %arg4[%c0_92, %c4, %c0_93] : memref<2x9x64xf32, #tpu.memory_space<vmem>>, vector<1x1x64xf32>
    %72 = vector.shape_cast %71 : vector<1x1x64xf32> to vector<1x64xf32>
    %73 = vector.shape_cast %72 : vector<1x64xf32> to vector<1x1x1x64xf32>
    %74 = vector.broadcast %73 : vector<1x1x1x64xf32> to vector<2x8x8x64xf32>
    %75 = arith.mulf %70, %74 : vector<2x8x8x64xf32>
    %76 = arith.addf %69, %75 : vector<2x8x8x64xf32>
    %77 = vector.extract_strided_slice %62 {offsets = [0, 0, 2, 0], sizes = [2, 8, 8, 64], strides = [1, 1, 1, 1]} : vector<2x8x10x64xf32> to vector<2x8x8x64xf32>
    %c0_94 = arith.constant 0 : index
    %c5 = arith.constant 5 : index
    %c0_95 = arith.constant 0 : index
    %78 = vector.load %arg4[%c0_94, %c5, %c0_95] : memref<2x9x64xf32, #tpu.memory_space<vmem>>, vector<1x1x64xf32>
    %79 = vector.shape_cast %78 : vector<1x1x64xf32> to vector<1x64xf32>
    %80 = vector.shape_cast %79 : vector<1x64xf32> to vector<1x1x1x64xf32>
    %81 = vector.broadcast %80 : vector<1x1x1x64xf32> to vector<2x8x8x64xf32>
    %82 = arith.mulf %77, %81 : vector<2x8x8x64xf32>
    %83 = arith.addf %76, %82 : vector<2x8x8x64xf32>
    %c0_96 = arith.constant 0 : index
    %c2_97 = arith.constant 2 : index
    %c7_98 = arith.constant 7 : index
    %c0_99 = arith.constant 0 : index
    %84 = vector.load %arg9[%c0_96, %c2_97, %c7_98, %c0_99] : memref<2x10x24x64xf32, #tpu.memory_space<vmem>>, vector<2x8x10x64xf32>
    %85 = vector.extract_strided_slice %84 {offsets = [0, 0, 0, 0], sizes = [2, 8, 8, 64], strides = [1, 1, 1, 1]} : vector<2x8x10x64xf32> to vector<2x8x8x64xf32>
    %c0_100 = arith.constant 0 : index
    %c6 = arith.constant 6 : index
    %c0_101 = arith.constant 0 : index
    %86 = vector.load %arg4[%c0_100, %c6, %c0_101] : memref<2x9x64xf32, #tpu.memory_space<vmem>>, vector<1x1x64xf32>
    %87 = vector.shape_cast %86 : vector<1x1x64xf32> to vector<1x64xf32>
    %88 = vector.shape_cast %87 : vector<1x64xf32> to vector<1x1x1x64xf32>
    %89 = vector.broadcast %88 : vector<1x1x1x64xf32> to vector<2x8x8x64xf32>
    %90 = arith.mulf %85, %89 : vector<2x8x8x64xf32>
    %91 = arith.addf %83, %90 : vector<2x8x8x64xf32>
    %92 = vector.extract_strided_slice %84 {offsets = [0, 0, 1, 0], sizes = [2, 8, 8, 64], strides = [1, 1, 1, 1]} : vector<2x8x10x64xf32> to vector<2x8x8x64xf32>
    %c0_102 = arith.constant 0 : index
    %c7_103 = arith.constant 7 : index
    %c0_104 = arith.constant 0 : index
    %93 = vector.load %arg4[%c0_102, %c7_103, %c0_104] : memref<2x9x64xf32, #tpu.memory_space<vmem>>, vector<1x1x64xf32>
    %94 = vector.shape_cast %93 : vector<1x1x64xf32> to vector<1x64xf32>
    %95 = vector.shape_cast %94 : vector<1x64xf32> to vector<1x1x1x64xf32>
    %96 = vector.broadcast %95 : vector<1x1x1x64xf32> to vector<2x8x8x64xf32>
    %97 = arith.mulf %92, %96 : vector<2x8x8x64xf32>
    %98 = arith.addf %91, %97 : vector<2x8x8x64xf32>
    %99 = vector.extract_strided_slice %84 {offsets = [0, 0, 2, 0], sizes = [2, 8, 8, 64], strides = [1, 1, 1, 1]} : vector<2x8x10x64xf32> to vector<2x8x8x64xf32>
    %c0_105 = arith.constant 0 : index
    %c8_106 = arith.constant 8 : index
    %c0_107 = arith.constant 0 : index
    %100 = vector.load %arg4[%c0_105, %c8_106, %c0_107] : memref<2x9x64xf32, #tpu.memory_space<vmem>>, vector<1x1x64xf32>
    %101 = vector.shape_cast %100 : vector<1x1x64xf32> to vector<1x64xf32>
    %102 = vector.shape_cast %101 : vector<1x64xf32> to vector<1x1x1x64xf32>
    %103 = vector.broadcast %102 : vector<1x1x1x64xf32> to vector<2x8x8x64xf32>
    %104 = arith.mulf %99, %103 : vector<2x8x8x64xf32>
    %105 = arith.addf %98, %104 : vector<2x8x8x64xf32>
    %106 = vector.shape_cast %105 : vector<2x8x8x64xf32> to vector<128x64xf32>
    %107 = arith.truncf %106 : vector<128x64xf32> to vector<128x64xbf16>
    %c0_108 = arith.constant 0 : index
    %c0_109 = arith.constant 0 : index
    %c0_110 = arith.constant 0 : index
    %108 = vector.load %arg5[%c0_108, %c0_109, %c0_110] : memref<2x64x64xbf16, #tpu.memory_space<vmem>>, vector<1x64x64xbf16>
    %109 = vector.shape_cast %108 : vector<1x64x64xbf16> to vector<64x64xbf16>
    %cst_111 = arith.constant dense<0.000000e+00> : vector<128x64xf32>
    %110 = tpu.matmul %107, %109, %cst_111 {dimension_numbers = #tpu.dot_dimension_numbers<[1], [0], [0], [1], [0, 0, 1, 1], [], []>} : vector<128x64xbf16>, vector<64x64xbf16>, vector<128x64xf32> -> vector<128x64xf32>
    %cst_112 = arith.constant 0.000000e+00 : f32
    %111 = vector.broadcast %cst_112 : f32 to vector<128x64xf32>
    %112 = arith.subf %111, %110 : vector<128x64xf32>
    %113 = math.exp %112 : vector<128x64xf32>
    %cst_113 = arith.constant 1.000000e+00 : f32
    %114 = vector.broadcast %cst_113 : f32 to vector<128x64xf32>
    %115 = arith.addf %114, %113 : vector<128x64xf32>
    %cst_114 = arith.constant 1.000000e+00 : f32
    %116 = vector.broadcast %cst_114 : f32 to vector<128x64xf32>
    %117 = arith.divf %116, %115 : vector<128x64xf32>
    %118 = arith.mulf %110, %117 : vector<128x64xf32>
    %c0_115 = arith.constant 0 : index
    %c1_116 = arith.constant 1 : index
    %c8_117 = arith.constant 8 : index
    %c0_118 = arith.constant 0 : index
    %119 = vector.load %arg9[%c0_115, %c1_116, %c8_117, %c0_118] : memref<2x10x24x64xf32, #tpu.memory_space<vmem>>, vector<2x8x8x64xf32>
    %120 = vector.shape_cast %118 : vector<128x64xf32> to vector<2x8x8x64xf32>
    %cst_119 = arith.constant 1.000000e-01 : f32
    %121 = vector.broadcast %cst_119 : f32 to vector<2x8x8x64xf32>
    %122 = arith.mulf %121, %120 : vector<2x8x8x64xf32>
    %123 = arith.addf %119, %122 : vector<2x8x8x64xf32>
    %c0_120 = arith.constant 0 : index
    %c1_121 = arith.constant 1 : index
    %c8_122 = arith.constant 8 : index
    %c0_123 = arith.constant 0 : index
    %124 = vector.load %arg9[%c0_120, %c1_121, %c8_122, %c0_123] : memref<2x10x24x64xf32, #tpu.memory_space<vmem>>, vector<2x8x8x64xf32>
    tpu.vector_store %arg9[%c0_120, %c1_121, %c8_122, %c0_123], %123 {strides = array<i32>} : memref<2x10x24x64xf32, #tpu.memory_space<vmem>>, vector<2x8x8x64xf32>,
    %c0_124 = arith.constant 0 : index
    %c0_125 = arith.constant 0 : index
    %c7_126 = arith.constant 7 : index
    %c0_127 = arith.constant 0 : index
    %125 = vector.load %arg9[%c0_124, %c0_125, %c7_126, %c0_127] : memref<2x10x24x64xf32, #tpu.memory_space<vmem>>, vector<2x8x10x64xf32>
    %126 = vector.extract_strided_slice %125 {offsets = [0, 0, 0, 0], sizes = [2, 8, 8, 64], strides = [1, 1, 1, 1]} : vector<2x8x10x64xf32> to vector<2x8x8x64xf32>
    %c1_128 = arith.constant 1 : index
    %c0_129 = arith.constant 0 : index
    %c0_130 = arith.constant 0 : index
    %127 = vector.load %arg4[%c1_128, %c0_129, %c0_130] : memref<2x9x64xf32, #tpu.memory_space<vmem>>, vector<1x1x64xf32>
    %128 = vector.shape_cast %127 : vector<1x1x64xf32> to vector<1x64xf32>
    %129 = vector.shape_cast %128 : vector<1x64xf32> to vector<1x1x1x64xf32>
    %130 = vector.broadcast %129 : vector<1x1x1x64xf32> to vector<2x8x8x64xf32>
    %131 = arith.mulf %126, %130 : vector<2x8x8x64xf32>
    %132 = vector.extract_strided_slice %125 {offsets = [0, 0, 1, 0], sizes = [2, 8, 8, 64], strides = [1, 1, 1, 1]} : vector<2x8x10x64xf32> to vector<2x8x8x64xf32>
    %c1_131 = arith.constant 1 : index
    %c1_132 = arith.constant 1 : index
    %c0_133 = arith.constant 0 : index
    %133 = vector.load %arg4[%c1_131, %c1_132, %c0_133] : memref<2x9x64xf32, #tpu.memory_space<vmem>>, vector<1x1x64xf32>
    %134 = vector.shape_cast %133 : vector<1x1x64xf32> to vector<1x64xf32>
    %135 = vector.shape_cast %134 : vector<1x64xf32> to vector<1x1x1x64xf32>
    %136 = vector.broadcast %135 : vector<1x1x1x64xf32> to vector<2x8x8x64xf32>
    %137 = arith.mulf %132, %136 : vector<2x8x8x64xf32>
    %138 = arith.addf %131, %137 : vector<2x8x8x64xf32>
    %139 = vector.extract_strided_slice %125 {offsets = [0, 0, 2, 0], sizes = [2, 8, 8, 64], strides = [1, 1, 1, 1]} : vector<2x8x10x64xf32> to vector<2x8x8x64xf32>
    %c1_134 = arith.constant 1 : index
    %c2_135 = arith.constant 2 : index
    %c0_136 = arith.constant 0 : index
    %140 = vector.load %arg4[%c1_134, %c2_135, %c0_136] : memref<2x9x64xf32, #tpu.memory_space<vmem>>, vector<1x1x64xf32>
    %141 = vector.shape_cast %140 : vector<1x1x64xf32> to vector<1x64xf32>
    %142 = vector.shape_cast %141 : vector<1x64xf32> to vector<1x1x1x64xf32>
    %143 = vector.broadcast %142 : vector<1x1x1x64xf32> to vector<2x8x8x64xf32>
    %144 = arith.mulf %139, %143 : vector<2x8x8x64xf32>
    %145 = arith.addf %138, %144 : vector<2x8x8x64xf32>
    %c0_137 = arith.constant 0 : index
    %c1_138 = arith.constant 1 : index
    %c7_139 = arith.constant 7 : index
    %c0_140 = arith.constant 0 : index
    %146 = vector.load %arg9[%c0_137, %c1_138, %c7_139, %c0_140] : memref<2x10x24x64xf32, #tpu.memory_space<vmem>>, vector<2x8x10x64xf32>
    %147 = vector.extract_strided_slice %146 {offsets = [0, 0, 0, 0], sizes = [2, 8, 8, 64], strides = [1, 1, 1, 1]} : vector<2x8x10x64xf32> to vector<2x8x8x64xf32>
    %c1_141 = arith.constant 1 : index
    %c3_142 = arith.constant 3 : index
    %c0_143 = arith.constant 0 : index
    %148 = vector.load %arg4[%c1_141, %c3_142, %c0_143] : memref<2x9x64xf32, #tpu.memory_space<vmem>>, vector<1x1x64xf32>
    %149 = vector.shape_cast %148 : vector<1x1x64xf32> to vector<1x64xf32>
    %150 = vector.shape_cast %149 : vector<1x64xf32> to vector<1x1x1x64xf32>
    %151 = vector.broadcast %150 : vector<1x1x1x64xf32> to vector<2x8x8x64xf32>
    %152 = arith.mulf %147, %151 : vector<2x8x8x64xf32>
    %153 = arith.addf %145, %152 : vector<2x8x8x64xf32>
    %154 = vector.extract_strided_slice %146 {offsets = [0, 0, 1, 0], sizes = [2, 8, 8, 64], strides = [1, 1, 1, 1]} : vector<2x8x10x64xf32> to vector<2x8x8x64xf32>
    %c1_144 = arith.constant 1 : index
    %c4_145 = arith.constant 4 : index
    %c0_146 = arith.constant 0 : index
    %155 = vector.load %arg4[%c1_144, %c4_145, %c0_146] : memref<2x9x64xf32, #tpu.memory_space<vmem>>, vector<1x1x64xf32>
    %156 = vector.shape_cast %155 : vector<1x1x64xf32> to vector<1x64xf32>
    %157 = vector.shape_cast %156 : vector<1x64xf32> to vector<1x1x1x64xf32>
    %158 = vector.broadcast %157 : vector<1x1x1x64xf32> to vector<2x8x8x64xf32>
    %159 = arith.mulf %154, %158 : vector<2x8x8x64xf32>
    %160 = arith.addf %153, %159 : vector<2x8x8x64xf32>
    %161 = vector.extract_strided_slice %146 {offsets = [0, 0, 2, 0], sizes = [2, 8, 8, 64], strides = [1, 1, 1, 1]} : vector<2x8x10x64xf32> to vector<2x8x8x64xf32>
    %c1_147 = arith.constant 1 : index
    %c5_148 = arith.constant 5 : index
    %c0_149 = arith.constant 0 : index
    %162 = vector.load %arg4[%c1_147, %c5_148, %c0_149] : memref<2x9x64xf32, #tpu.memory_space<vmem>>, vector<1x1x64xf32>
    %163 = vector.shape_cast %162 : vector<1x1x64xf32> to vector<1x64xf32>
    %164 = vector.shape_cast %163 : vector<1x64xf32> to vector<1x1x1x64xf32>
    %165 = vector.broadcast %164 : vector<1x1x1x64xf32> to vector<2x8x8x64xf32>
    %166 = arith.mulf %161, %165 : vector<2x8x8x64xf32>
    %167 = arith.addf %160, %166 : vector<2x8x8x64xf32>
    %c0_150 = arith.constant 0 : index
    %c2_151 = arith.constant 2 : index
    %c7_152 = arith.constant 7 : index
    %c0_153 = arith.constant 0 : index
    %168 = vector.load %arg9[%c0_150, %c2_151, %c7_152, %c0_153] : memref<2x10x24x64xf32, #tpu.memory_space<vmem>>, vector<2x8x10x64xf32>
    %169 = vector.extract_strided_slice %168 {offsets = [0, 0, 0, 0], sizes = [2, 8, 8, 64], strides = [1, 1, 1, 1]} : vector<2x8x10x64xf32> to vector<2x8x8x64xf32>
    %c1_154 = arith.constant 1 : index
    %c6_155 = arith.constant 6 : index
    %c0_156 = arith.constant 0 : index
    %170 = vector.load %arg4[%c1_154, %c6_155, %c0_156] : memref<2x9x64xf32, #tpu.memory_space<vmem>>, vector<1x1x64xf32>
    %171 = vector.shape_cast %170 : vector<1x1x64xf32> to vector<1x64xf32>
    %172 = vector.shape_cast %171 : vector<1x64xf32> to vector<1x1x1x64xf32>
    %173 = vector.broadcast %172 : vector<1x1x1x64xf32> to vector<2x8x8x64xf32>
    %174 = arith.mulf %169, %173 : vector<2x8x8x64xf32>
    %175 = arith.addf %167, %174 : vector<2x8x8x64xf32>
    %176 = vector.extract_strided_slice %168 {offsets = [0, 0, 1, 0], sizes = [2, 8, 8, 64], strides = [1, 1, 1, 1]} : vector<2x8x10x64xf32> to vector<2x8x8x64xf32>
    %c1_157 = arith.constant 1 : index
    %c7_158 = arith.constant 7 : index
    %c0_159 = arith.constant 0 : index
    %177 = vector.load %arg4[%c1_157, %c7_158, %c0_159] : memref<2x9x64xf32, #tpu.memory_space<vmem>>, vector<1x1x64xf32>
    %178 = vector.shape_cast %177 : vector<1x1x64xf32> to vector<1x64xf32>
    %179 = vector.shape_cast %178 : vector<1x64xf32> to vector<1x1x1x64xf32>
    %180 = vector.broadcast %179 : vector<1x1x1x64xf32> to vector<2x8x8x64xf32>
    %181 = arith.mulf %176, %180 : vector<2x8x8x64xf32>
    %182 = arith.addf %175, %181 : vector<2x8x8x64xf32>
    %183 = vector.extract_strided_slice %168 {offsets = [0, 0, 2, 0], sizes = [2, 8, 8, 64], strides = [1, 1, 1, 1]} : vector<2x8x10x64xf32> to vector<2x8x8x64xf32>
    %c1_160 = arith.constant 1 : index
    %c8_161 = arith.constant 8 : index
    %c0_162 = arith.constant 0 : index
    %184 = vector.load %arg4[%c1_160, %c8_161, %c0_162] : memref<2x9x64xf32, #tpu.memory_space<vmem>>, vector<1x1x64xf32>
    %185 = vector.shape_cast %184 : vector<1x1x64xf32> to vector<1x64xf32>
    %186 = vector.shape_cast %185 : vector<1x64xf32> to vector<1x1x1x64xf32>
    %187 = vector.broadcast %186 : vector<1x1x1x64xf32> to vector<2x8x8x64xf32>
    %188 = arith.mulf %183, %187 : vector<2x8x8x64xf32>
    %189 = arith.addf %182, %188 : vector<2x8x8x64xf32>
    %190 = vector.shape_cast %189 : vector<2x8x8x64xf32> to vector<128x64xf32>
    %191 = arith.truncf %190 : vector<128x64xf32> to vector<128x64xbf16>
    %c1_163 = arith.constant 1 : index
    %c0_164 = arith.constant 0 : index
    %c0_165 = arith.constant 0 : index
    %192 = vector.load %arg5[%c1_163, %c0_164, %c0_165] : memref<2x64x64xbf16, #tpu.memory_space<vmem>>, vector<1x64x64xbf16>
    %193 = vector.shape_cast %192 : vector<1x64x64xbf16> to vector<64x64xbf16>
    %cst_166 = arith.constant dense<0.000000e+00> : vector<128x64xf32>
    %194 = tpu.matmul %191, %193, %cst_166 {dimension_numbers = #tpu.dot_dimension_numbers<[1], [0], [0], [1], [0, 0, 1, 1], [], []>} : vector<128x64xbf16>, vector<64x64xbf16>, vector<128x64xf32> -> vector<128x64xf32>
    %cst_167 = arith.constant 0.000000e+00 : f32
    %195 = vector.broadcast %cst_167 : f32 to vector<128x64xf32>
    %196 = arith.subf %195, %194 : vector<128x64xf32>
    %197 = math.exp %196 : vector<128x64xf32>
    %cst_168 = arith.constant 1.000000e+00 : f32
    %198 = vector.broadcast %cst_168 : f32 to vector<128x64xf32>
    %199 = arith.addf %198, %197 : vector<128x64xf32>
    %cst_169 = arith.constant 1.000000e+00 : f32
    %200 = vector.broadcast %cst_169 : f32 to vector<128x64xf32>
    %201 = arith.divf %200, %199 : vector<128x64xf32>
    %202 = arith.mulf %194, %201 : vector<128x64xf32>
    %c0_170 = arith.constant 0 : index
    %c1_171 = arith.constant 1 : index
    %c8_172 = arith.constant 8 : index
    %c0_173 = arith.constant 0 : index
    %203 = vector.load %arg9[%c0_170, %c1_171, %c8_172, %c0_173] : memref<2x10x24x64xf32, #tpu.memory_space<vmem>>, vector<2x8x8x64xf32>
    %204 = vector.shape_cast %202 : vector<128x64xf32> to vector<2x8x8x64xf32>
    %cst_174 = arith.constant 1.000000e-01 : f32
    %205 = vector.broadcast %cst_174 : f32 to vector<2x8x8x64xf32>
    %206 = arith.mulf %205, %204 : vector<2x8x8x64xf32>
    %207 = arith.addf %203, %206 : vector<2x8x8x64xf32>
    %c0_175 = arith.constant 0 : index
    %c1_176 = arith.constant 1 : index
    %c8_177 = arith.constant 8 : index
    %c0_178 = arith.constant 0 : index
    %208 = vector.load %arg9[%c0_175, %c1_176, %c8_177, %c0_178] : memref<2x10x24x64xf32, #tpu.memory_space<vmem>>, vector<2x8x8x64xf32>
    tpu.vector_store %arg9[%c0_175, %c1_176, %c8_177, %c0_178], %207 {strides = array<i32>} : memref<2x10x24x64xf32, #tpu.memory_space<vmem>>, vector<2x8x8x64xf32>,
    %c0_179 = arith.constant 0 : index
    %c1_180 = arith.constant 1 : index
    %c8_181 = arith.constant 8 : index
    %c0_182 = arith.constant 0 : index
    %209 = vector.load %arg9[%c0_179, %c1_180, %c8_181, %c0_182] : memref<2x10x24x64xf32, #tpu.memory_space<vmem>>, vector<2x8x8x64xf32>
    %210 = vector.shape_cast %209 : vector<2x8x8x64xf32> to vector<128x64xf32>
    %211 = arith.truncf %210 : vector<128x64xf32> to vector<128x64xbf16>
    %c0_183 = arith.constant 0 : index
    %c1_184 = arith.constant 1 : index
    %c9_185 = arith.constant 9 : index
    %c0_186 = arith.constant 0 : index
    %212 = vector.load %arg9[%c0_183, %c1_184, %c9_185, %c0_186] : memref<2x10x24x64xf32, #tpu.memory_space<vmem>>, vector<2x8x8x64xf32>
    %213 = vector.shape_cast %212 : vector<2x8x8x64xf32> to vector<128x64xf32>
    %214 = arith.truncf %213 : vector<128x64xf32> to vector<128x64xbf16>
    %c0_187 = arith.constant 0 : index
    %c2_188 = arith.constant 2 : index
    %c8_189 = arith.constant 8 : index
    %c0_190 = arith.constant 0 : index
    %215 = vector.load %arg9[%c0_187, %c2_188, %c8_189, %c0_190] : memref<2x10x24x64xf32, #tpu.memory_space<vmem>>, vector<2x8x8x64xf32>
    %216 = vector.shape_cast %215 : vector<2x8x8x64xf32> to vector<128x64xf32>
    %217 = arith.truncf %216 : vector<128x64xf32> to vector<128x64xbf16>
    %c0_191 = arith.constant 0 : index
    %c2_192 = arith.constant 2 : index
    %c9_193 = arith.constant 9 : index
    %c0_194 = arith.constant 0 : index
    %218 = vector.load %arg9[%c0_191, %c2_192, %c9_193, %c0_194] : memref<2x10x24x64xf32, #tpu.memory_space<vmem>>, vector<2x8x8x64xf32>
    %219 = vector.shape_cast %218 : vector<2x8x8x64xf32> to vector<128x64xf32>
    %220 = arith.truncf %219 : vector<128x64xf32> to vector<128x64xbf16>
    %221 = tpu.concatenate %220, %217, %214, %211 in 1 : vector<128x64xbf16>, vector<128x64xbf16>, vector<128x64xbf16>, vector<128x64xbf16> -> vector<128x256xbf16>
    %c0_195 = arith.constant 0 : index
    %c0_196 = arith.constant 0 : index
    %222 = vector.load %arg6[%c0_195, %c0_196] : memref<256x256xbf16, #tpu.memory_space<vmem>>, vector<256x256xbf16>
    %cst_197 = arith.constant dense<0.000000e+00> : vector<128x256xf32>
    %223 = tpu.matmul %221, %222, %cst_197 {dimension_numbers = #tpu.dot_dimension_numbers<[1], [0], [0], [1], [0, 0, 1, 1], [], []>} : vector<128x256xbf16>, vector<256x256xbf16>, vector<128x256xf32> -> vector<128x256xf32>
    %c0_198 = arith.constant 0 : index
    %c0_199 = arith.constant 0 : index
    %224 = vector.load %arg7[%c0_198, %c0_199] : memref<1x256xf32, #tpu.memory_space<vmem>>, vector<1x256xf32>
    %225 = vector.broadcast %224 : vector<1x256xf32> to vector<128x256xf32>
    %226 = arith.addf %223, %225 : vector<128x256xf32>
    %227 = vector.shape_cast %226 : vector<128x256xf32> to vector<2x64x256xf32>
    %c0_200 = arith.constant 0 : index
    %c0_201 = arith.constant 0 : index
    %c0_202 = arith.constant 0 : index
    %228 = vector.load %arg8[%c0_200, %c0_201, %c0_202] : memref<2x64x256xf32, #tpu.memory_space<vmem>>, vector<2x64x256xf32>
    tpu.vector_store %arg8[%c0_200, %c0_201, %c0_202], %227 {strides = array<i32>} : memref<2x64x256xf32, #tpu.memory_space<vmem>>, vector<2x64x256xf32>,
    return
  }
  func.func @transform_0(%arg0: i32) -> (i32, i32, i32, i32, i32, i32) {
    %c0_i32 = arith.constant 0 : i32
    %c0_i32_0 = arith.constant 0 : i32
    %c0_i32_1 = arith.constant 0 : i32
    %c0_i32_2 = arith.constant 0 : i32
    %c0_i32_3 = arith.constant 0 : i32
    %c0_i32_4 = arith.constant 0 : i32
    return %arg0, %c0_i32, %c0_i32_0, %c0_i32_1, %c0_i32_2, %c0_i32_3 : i32, i32, i32, i32, i32, i32
  }
  func.func @transform_1(%arg0: i32) -> (i32, i32) {
    %c0_i32 = arith.constant 0 : i32
    %c0_i32_0 = arith.constant 0 : i32
    %c0_i32_1 = arith.constant 0 : i32
    return %c0_i32, %c0_i32_0 : i32, i32
  }
  func.func @transform_2(%arg0: i32) -> (i32, i32) {
    %c0_i32 = arith.constant 0 : i32
    %c0_i32_0 = arith.constant 0 : i32
    %c0_i32_1 = arith.constant 0 : i32
    return %c0_i32, %c0_i32_0 : i32, i32
  }
  func.func @transform_3(%arg0: i32) -> (i32, i32, i32) {
    %c0_i32 = arith.constant 0 : i32
    %c0_i32_0 = arith.constant 0 : i32
    %c0_i32_1 = arith.constant 0 : i32
    %c0_i32_2 = arith.constant 0 : i32
    return %c0_i32, %c0_i32_0, %c0_i32_1 : i32, i32, i32
  }
  func.func @transform_4(%arg0: i32) -> (i32, i32, i32) {
    %c0_i32 = arith.constant 0 : i32
    %c0_i32_0 = arith.constant 0 : i32
    %c0_i32_1 = arith.constant 0 : i32
    %c0_i32_2 = arith.constant 0 : i32
    return %c0_i32, %c0_i32_0, %c0_i32_1 : i32, i32, i32
  }
  func.func @transform_5(%arg0: i32) -> (i32, i32) {
    %c0_i32 = arith.constant 0 : i32
    %c0_i32_0 = arith.constant 0 : i32
    %c0_i32_1 = arith.constant 0 : i32
    return %c0_i32, %c0_i32_0 : i32, i32
  }
  func.func @transform_6(%arg0: i32) -> (i32, i32) {
    %c0_i32 = arith.constant 0 : i32
    %c0_i32_0 = arith.constant 0 : i32
    %c0_i32_1 = arith.constant 0 : i32
    return %c0_i32, %c0_i32_0 : i32, i32
  }
  func.func @transform_7(%arg0: i32) -> (i32, i32, i32) {
    %c0_i32 = arith.constant 0 : i32
    %c0_i32_0 = arith.constant 0 : i32
    %c0_i32_1 = arith.constant 0 : i32
    return %arg0, %c0_i32, %c0_i32_0 : i32, i32, i32
  }
}

</mosaic_0001>

<bundles_post_ra>
// kernel: tile.8
= control target key start
LH: loop header
LB: loop body
LE: loop exit
PB: predicated region body
PF: predicated region fallthrough
CT: control target
= control target key end

     0   :  { %s22_s0 = inlined_call_operand.vmem [shape: f32[64], index: 0, kind: input, shape index: {}]   ;;  %s23_s1 = inlined_call_operand.vmem [shape: f32[4,64], index: 1, kind: output, shape index: {}]  }
   0x1   :  { %v4_v0 = vld [vmem:[%s22_s0] ss:$0 sm:$0xff] }
   0x2   :  { %5 = vst [vmem:[%s23_s1] sm:$0xf] %v4_v0 }

// kernel: tile.9
= control target key start
LH: loop header
LB: loop body
LE: loop exit
PB: predicated region body
PF: predicated region fallthrough
CT: control target
= control target key end

     0   :  { %s7_s8 = smov 3  ;;  %vm9_vm0 = vcmask 523264   ;;  %s34_s9 = smov 64   ;;  %vm16_vm1 = vcmask 1048064   ;;  %s54_s0 = inlined_call_operand.vmem [shape: f32[4,64], index: 0, kind: input, shape index: {}]   ;;  %s55_s1 = inlined_call_operand.vmem [shape: f32[1,256], index: 1, kind: output, shape index: {}]  }
   0x1   :  { %v5_v0 = vld [vmem:[%s54_s0] sm:$0xf]  ;;  %s12_s0 = smov 3 }
   0x2   :  { %6 = vst [vmem:[#allocation1] sm:$0xf] %v5_v0 }
   0x9   :  { %v13_v1 = vld [vmem:[#allocation1 + $0x1] ss:$2 sm:%s12_s0]   ;;  %v8_v2 = vld [vmem:[#allocation1] ss:$2 sm:%s7_s8]  }
   0xa   :  { %14 = vrot.lane.b32.xlu0 %v13_v1, %s34_s9  ;;  %10 = vst.msk [vmem:[#allocation0] ss:$8 sm:$0x3] %vm9_vm0, %v8_v2  }
  0x7c   :  { %v15_v3 = vpop.permute.xlu0 %14  }
  0x7d   :  { %17 = vst.msk [vmem:[#allocation0] ss:$8 sm:$0x3] %vm16_vm1, %v15_v3  }
  0x84   :  { %v22_v4 = vld [vmem:[#allocation0] sm:$0x1]  ;;  %v27_v5 = vld [vmem:[#allocation0 + $0x8] sm:$0x1] }
  0x85   :  { %25 = vst [vmem:[%s55_s1] sm:$0x1] %v22_v4  ;;  %32 = vst [vmem:[%s55_s1 + $0x1] sm:$0x1] %v27_v5 }

// kernel: denoising_net_forward.1
= control target key start
LH: loop header
LB: loop body
LE: loop exit
PB: predicated region body
PF: predicated region fallthrough
CT: control target
= control target key end

     0   :  { %s6307_s13 = smov 64   ;;  %vm131_vm0 = vsmask.f32 3328  ;;  %vm132_vm1 = vsmask.f32 7440  ;;  %vm27_vm3 = vcmask 523264   ;;  %s9236_s0 = inlined_call_operand.vmem [shape: bf16[2,2,2,9,9,64], index: 0, kind: input, shape index: {}]   ;;  %s9237_s1 = inlined_call_operand.vmem [shape: bf16[576,64], index: 1, kind: input, shape index: {}]   ;;  %s9238_s4 = inlined_call_operand.vmem [shape: bf16[2,64,64], index: 4, kind: input, shape index: {}]   ;;  %s9239_s3 = inlined_call_operand.vmem [shape: f32[2,9,64], index: 3, kind: input, shape index: {}]   ;;  %s9240_s2 = inlined_call_operand.vmem [shape: f32[1,64], index: 2, kind: input, shape index: {}]   ;;  %s9241_s5 = inlined_call_operand.vmem [shape: bf16[256,256], index: 5, kind: input, shape index: {}]   ;;  %s9242_s6 = inlined_call_operand.vmem [shape: f32[1,256], index: 6, kind: input, shape index: {}]   ;;  %s9243_s7 = inlined_call_operand.vmem [shape: f32[2,64,256], index: 7, kind: output, shape index: {}]  }
   0x1   :  { %v5463_v0 = vld [vmem:[%s9236_s0 + $0x90] sm:$0xf]  ;;  %v5464_v1 = vld [vmem:[%s9236_s0 + $0x98] sm:$0xf]  ;;  %v5465_v2 = vld [vmem:[%s9236_s0 + $0xa0] sm:$0xf] }
   0x2   :  { %v423_v3 = vshrl.u32 %v5464_v1, 16  ;;  %v426_v4 = vshll.u32 %v5464_v1, 16  ;;  %v5583_v5 = vcombine.low %v5463_v0, %v5464_v1  ;;  %v409_v6 = vshrl.u32 %v5463_v0, 16  ;;  %v5466_v7 = vld [vmem:[%s9236_s0 + $0xa8] sm:$0xf]  ;;  %v6045_v8 = vld [vmem:[%s9237_s1 + $0x78] sm:$0xff]   ;;  %vm6522_vm2 = vmor %vm131_vm0, %vm132_vm1 }
   0x3   :  { %v412_v9 = vshll.u32 %v5463_v0, 16  ;;  %v451_v10 = vshrl.u32 %v5466_v7, 16  ;;  %v454_v11 = vshll.u32 %v5466_v7, 16  ;;  %v5584_v12 = vcombine.low %v5465_v2, %v5466_v7  ;;  %v6046_v13 = vld [vmem:[%s9237_s1 + $0x38] sm:$0xff]   ;;  %5767 = vmatprep.subr.bf16.mxu0 %v6045_v8  ;;  %v6023_v22 = vld [vmem:[%s9236_s0 + $0x48] ss:$8 sps:$4 sm:$0xff]  }
   0x4   :  { %v425_v14 = vrot.slane %v423_v3, 4  ;;  %v428_v15 = vrot.slane %v426_v4, 5  ;;  %1066 = vrot.lane.b32.xlu0 %v5583_v5, %s6307_s13  ;;  %v411_v16 = vrot.slane %v409_v6, 4  ;;  %v437_v17 = vshrl.u32 %v5465_v2, 16  ;;  %5768 = vmatpush3.bf16.msra.mxu0 %v6046_v13  ;;  %v6047_v25 = vld [vmem:[%s9237_s1 + $0x70] sm:$0xff]   ;;  %v6049_v34 = vld [vmem:[%s9237_s1 + $0x68] sm:$0xff]  }
   0x5   :  { %v414_v18 = vrot.slane %v412_v9, 5  ;;  %v453_v19 = vrot.slane %v451_v10, 4  ;;  %v456_v20 = vrot.slane %v454_v11, 5  ;;  %1068 = vrot.lane.b32.xlu1 %v5584_v12, %s6307_s13  ;;  %v440_v21 = vshll.u32 %v5465_v2, 16  ;;  %v6024_v28 = vld [vmem:[%s9236_s0 + $0x58] ss:$8 sps:$4 sm:$0xff]   ;;  %5769 = vmatprep.subr.bf16.mxu0 %v6047_v25 }
   0x6   :  { %v429_v23 = vor.u32 %v428_v15, %v425_v14  ;;  %v439_v24 = vrot.slane %v437_v17, 4  ;;  %v5467_v29 = vld [vmem:[%s9236_s0 + $0xb0] sm:$0xf]  ;;  %v5468_v32 = vld [vmem:[%s9236_s0 + $0xb8] sm:$0xf]  ;;  %v6050_v35 = vld [vmem:[%s9237_s1 + $0x28] sm:$0xff]  }
   0x7   :  { %v415_v26 = vor.u32 %v414_v18, %v411_v16  ;;  %v442_v27 = vrot.slane %v440_v21, 5  ;;  %v6048_v30 = vld [vmem:[%s9237_s1 + $0x30] sm:$0xff]   ;;  %v457_v31 = vor.u32 %v456_v20, %v453_v19  ;;  %v465_v33 = vshrl.u32 %v5467_v29, 16  ;;  %v6051_v40 = vld [vmem:[%s9237_s1 + $0x60] sm:$0xff]   ;;  %v5470_v48 = vld [vmem:[%s9236_s0 + $0xc8] sm:$0xf] }
   0x8   :  { %986 = vrot.lane.b32.xlu0 %v6023_v22, %s6307_s13  ;;  %5770 = vmatpush3.bf16.msra.mxu0 %v6048_v30  ;;  %v6395_v36 = vrot.slane %v429_v23, 4  ;;  %v468_v38 = vshll.u32 %v5467_v29, 16  ;;  %v5585_v39 = vcombine.low %v5467_v29, %v5468_v32  ;;  %v479_v42 = vshrl.u32 %v5468_v32, 16  ;;  %v6026_v44 = vld [vmem:[%s9236_s0 + $0x68] ss:$8 sps:$4 sm:$0xff]   ;;  %v6052_v53 = vld [vmem:[%s9237_s1 + $0x20] sm:$0xff]  }
   0x9   :  { %988 = vrot.lane.b32.xlu1 %v6024_v28, %s6307_s13  ;;  %v6397_v37 = vrot.slane %v415_v26, 4  ;;  %5771 = vmatprep.subr.bf16.mxu0 %v6049_v34  ;;  %v443_v41 = vor.u32 %v442_v27, %v439_v24  ;;  %v482_v43 = vshll.u32 %v5468_v32, 16  ;;  %v5469_v45 = vld [vmem:[%s9236_s0 + $0xc0] sm:$0xf]  ;;  %v6408_v46 = vrot.slane %v457_v31, 4 }
   0xa   :  { %v6410_v47 = vrot.slane %v465_v33, 4  ;;  %v493_v49 = vshrl.u32 %v5469_v45, 16  ;;  %v496_v50 = vshll.u32 %v5469_v45, 16  ;;  %v507_v51 = vshrl.u32 %v5470_v48, 16  ;;  %v6028_v56 = vld [vmem:[%s9236_s0 + $0x78] ss:$8 sps:$4 sm:$0xff]  }
   0xb   :  { %v5586_v52 = vcombine.low %v5469_v45, %v5470_v48  ;;  %v6420_v54 = vrot.slane %v468_v38, 5  ;;  %v510_v55 = vshll.u32 %v5470_v48, 16  ;;  %v5471_v57 = vld [vmem:[%s9236_s0 + $0x1b0] sm:$0xf]  ;;  %v6428_v58 = vrot.slane %v443_v41, 4 }
   0xc   :  { %1070 = vrot.lane.b32.xlu0 %v5585_v39, %s6307_s13  ;;  %5772 = vmatpush3.bf16.msra.mxu0 %v6050_v35  ;;  %v6430_v59 = vrot.slane %v479_v42, 4  ;;  %v6432_v60 = vrot.slane %v482_v43, 5  ;;  %v5472_v61 = vld [vmem:[%s9236_s0 + $0x1b8] sm:$0xf]  ;;  %v521_v62 = vshrl.u32 %v5471_v57, 16  ;;  %v6437_v63 = vrot.slane %v493_v49, 4 }
   0xd   :  { %990 = vrot.lane.b32.xlu1 %v6026_v44, %s6307_s13  ;;  %5773 = vmatprep.subr.bf16.mxu0 %v6051_v40  ;;  %v524_v0 = vshll.u32 %v5471_v57, 16  ;;  %v5587_v1 = vcombine.low %v5471_v57, %v5472_v61  ;;  %v6440_v2 = vrot.slane %v496_v50, 5  ;;  %v6442_v3 = vrot.slane %v507_v51, 4  ;;  %v6030_v4 = vld [vmem:[%s9236_s0 + $0x168] ss:$8 sps:$4 sm:$0xff]   ;;  %v6105_v51 = vld [vmem:[%s9238_s4 + $0x18] sm:$0xff]  }
   0xe   :  { %v5473_v5 = vld [vmem:[%s9236_s0 + $0x1c0] sm:$0xf]  ;;  %v6451_v6 = vrot.slane %v510_v55, 5  ;;  %v6453_v7 = vrot.slane %v521_v62, 4  ;;  %v535_v8 = vshrl.u32 %v5472_v61, 16  ;;  %v538_v9 = vshll.u32 %v5472_v61, 16 }
   0xf   :  { %v5474_v10 = vld [vmem:[%s9236_s0 + $0x1c8] sm:$0xf]  ;;  %v549_v11 = vshrl.u32 %v5473_v5, 16  ;;  %v552_v12 = vshll.u32 %v5473_v5, 16  ;;  %v6458_v13 = vrot.slane %v524_v0, 5  ;;  %v471_v57 = vor.u32 %v6420_v54, %v6410_v47 }
  0x10   :  { %1072 = vrot.lane.b32.xlu0 %v5586_v52, %s6307_s13  ;;  %5774 = vmatpush3.bf16.msra.mxu0 %v6052_v53  ;;  %v563_v14 = vshrl.u32 %v5474_v10, 16  ;;  %v566_v15 = vshll.u32 %v5474_v10, 16  ;;  %v5588_v16 = vcombine.low %v5473_v5, %v5474_v10  ;;  %v5475_v17 = vld [vmem:[%s9236_s0 + $0x1d0] sm:$0xf]  ;;  %v6032_v18 = vld [vmem:[%s9236_s0 + $0x178] ss:$8 sps:$4 sm:$0xff]   ;;  %v485_v61 = vor.u32 %v6432_v60, %v6430_v59 }
  0x11   :  { %992 = vrot.lane.b32.xlu1 %v6028_v56, %s6307_s13  ;;  %v5476_v19 = vld [vmem:[%s9236_s0 + $0x1d8] sm:$0xf]  ;;  %v577_v20 = vshrl.u32 %v5475_v17, 16  ;;  %v580_v21 = vshll.u32 %v5475_v17, 16  ;;  %v6471_v24 = vrot.slane %v535_v8, 4  ;;  %v6473_v25 = vrot.slane %v538_v9, 5 }
  0x12   :  { %v591_v22 = vshrl.u32 %v5476_v19, 16  ;;  %v594_v23 = vshll.u32 %v5476_v19, 16  ;;  %v6475_v26 = vrot.slane %v549_v11, 4  ;;  %v6477_v27 = vrot.slane %v552_v12, 5  ;;  %v5477_v28 = vld [vmem:[%s9236_s0 + $0x1e0] sm:$0xf] }
  0x13   :  { %v6482_v29 = vrot.slane %v563_v14, 4  ;;  %v6484_v30 = vrot.slane %v566_v15, 5  ;;  %v5589_v31 = vcombine.low %v5475_v17, %v5476_v19  ;;  %v6034_v32 = vld [vmem:[%s9236_s0 + $0x188] ss:$8 sps:$4 sm:$0xff]   ;;  %v605_v33 = vshrl.u32 %v5477_v28, 16  ;;  %v6053_v14 = vld [vmem:[%s9237_s1 + $0x58] sm:$0xff]  }
  0x14   :  { %1074 = vrot.lane.b32.xlu0 %v5587_v1, %s6307_s13  ;;  %v6494_v34 = vld [vmem:[%s9236_s0 + $0x1e8] sm:$0xf]  ;;  %v6496_v35 = vrot.slane %v577_v20, 4  ;;  %v6498_v38 = vrot.slane %v580_v21, 5  ;;  %v6500_v39 = vrot.slane %v591_v22, 4  ;;  %v6502_v40 = vrot.slane %v594_v23, 5  ;;  %5775 = vmatprep.subr.bf16.mxu0 %v6053_v14 }
  0x15   :  { %994 = vrot.lane.b32.xlu1 %v6030_v4, %s6307_s13  ;;  %v6504_v41 = vrot.slane %v605_v33, 4  ;;  %v608_v42 = vshll.u32 %v5477_v28, 16  ;;  %v619_v43 = vshrl.u32 %v6494_v34, 16  ;;  %v622_v44 = vshll.u32 %v6494_v34, 16  ;;  %v5495_v48 = vld [vmem:[%s9236_s0 + $0x94] sm:$0x1] }
  0x16   :  { %v5590_v45 = vcombine.low %v5477_v28, %v6494_v34  ;;  %v5496_v49 = vld [vmem:[%s9236_s0 + $0x9c] sm:$0x1]  ;;  %v6036_v50 = vld [vmem:[%s9236_s0 + $0x198] ss:$8 sps:$4 sm:$0xff]   ;;  %v418_v52 = vshll.u32 %v5495_v48, 16  ;;  %v499_v54 = vor.u32 %v6440_v2, %v6437_v63  ;;  %v513_v59 = vor.u32 %v6451_v6, %v6442_v3  ;;  %v6055_v48 = vld [vmem:[%s9237_s1 + $0x50] sm:$0xff]  }
  0x17   :  { %v432_v53 = vshll.u32 %v5496_v49, 16  ;;  %v5497_v55 = vld [vmem:[%s9236_s0 + $0xa4] sm:$0x1]  ;;  %v5498_v56 = vld [vmem:[%s9236_s0 + $0xac] sm:$0x1]  ;;  %v527_v60 = vor.u32 %v6458_v13, %v6453_v7  ;;  %v541_v9 = vor.u32 %v6473_v25, %v6471_v24  ;;  %v6561_v12 = vrot.slane %v608_v42, 5 }
  0x18   :  { %1076 = vrot.lane.b32.xlu0 %v5588_v16, %s6307_s13  ;;  %v420_v62 = vrot.slane %v418_v52, 5  ;;  %v446_v1 = vshll.u32 %v5497_v55, 16  ;;  %v460_v4 = vshll.u32 %v5498_v56, 16  ;;  %v6037_v5 = vld [vmem:[%s9236_s0 + $0x50] ss:$8 sps:$4 sm:$0xff]   ;;  %v472_v7 = vrot.slane %v471_v57, 4 }
  0x19   :  { %996 = vrot.lane.b32.xlu1 %v6032_v18, %s6307_s13  ;;  %v434_v0 = vrot.slane %v432_v53, 5  ;;  %v5499_v8 = vld [vmem:[%s9236_s0 + $0xb4] sm:$0x1]  ;;  %v5500_v47 = vld [vmem:[%s9236_s0 + $0xbc] sm:$0x1]  ;;  %v486_v15 = vrot.slane %v485_v61, 4  ;;  %v555_v21 = vor.u32 %v6477_v27, %v6475_v26  ;;  %v569_v33 = vor.u32 %v6484_v30, %v6482_v29 }
  0x1a   :  { %v421_v10 = vsel %vm6522_vm2, %v6397_v37, %v420_v62  ;;  %v448_v63 = vrot.slane %v446_v1, 5  ;;  %v462_v2 = vrot.slane %v460_v4, 5  ;;  %v6038_v6 = vld [vmem:[%s9236_s0 + $0x60] ss:$8 sps:$4 sm:$0xff]   ;;  %v474_v13 = vshll.u32 %v5499_v8, 16  ;;  %v6056_v62 = vld [vmem:[%s9237_s1 + $0x10] sm:$0xff]  }
  0x1b   :  { %v435_v11 = vsel %vm6522_vm2, %v6395_v36, %v434_v0  ;;  %v488_v16 = vshll.u32 %v5500_v47, 16  ;;  %v5501_v17 = vld [vmem:[%s9236_s0 + $0xc4] sm:$0x1]  ;;  %v5502_v18 = vld [vmem:[%s9236_s0 + $0xcc] sm:$0x1]  ;;  %v6581_v19 = vrot.slane %v619_v43, 4  ;;  %v583_v29 = vor.u32 %v6498_v38, %v6496_v35 }
  0x1c   :  { %1078 = vrot.lane.b32.xlu0 %v5589_v31, %s6307_s13  ;;  %v5599_v3 = vcombine.low %v421_v10, %v435_v11  ;;  %v449_v37 = vsel %vm6522_vm2, %v6428_v58, %v448_v63  ;;  %v463_v36 = vsel %vm6522_vm2, %v6408_v46, %v462_v2  ;;  %v476_v20 = vrot.slane %v474_v13, 5  ;;  %v6054_v46 = vld [vmem:[%s9237_s1 + $0x18] sm:$0xff]   ;;  %v5503_v26 = vld [vmem:[%s9236_s0 + $0x1b4] sm:$0x1]  ;;  %v5505_v57 = vld [vmem:[%s9236_s0 + $0x1c4] sm:$0x1] }
  0x1d   :  { %998 = vrot.lane.b32.xlu1 %v6034_v32, %s6307_s13  ;;  %v502_v58 = vshll.u32 %v5501_v17, 16  ;;  %v5600_v22 = vcombine.low %v449_v37, %v463_v36  ;;  %v490_v23 = vrot.slane %v488_v16, 5  ;;  %v500_v24 = vrot.slane %v499_v54, 4  ;;  %v5504_v27 = vld [vmem:[%s9236_s0 + $0x1bc] sm:$0x1]  ;;  %5776 = vmatpush3.bf16.msra.mxu0 %v6054_v46  ;;  %v6058_v63 = vld [vmem:[%s9237_s1 + $0x8] sm:$0xff]  }
  0x1e   :  { %v516_v25 = vshll.u32 %v5502_v18, 16  ;;  %v477_v28 = vsel %vm6522_vm2, %v472_v7, %v476_v20  ;;  %v514_v32 = vrot.slane %v513_v59, 4  ;;  %v624_v34 = vrot.slane %v622_v44, 5  ;;  %v6039_v49 = vld [vmem:[%s9236_s0 + $0x70] ss:$8 sps:$4 sm:$0xff]   ;;  %5777 = vmatprep.subr.bf16.mxu0 %v6055_v48  ;;  %v6059_v16 = vld [vmem:[%s9237_s1 + $0x40] sm:$0xff]  }
  0x1f   :  { %v504_v31 = vrot.slane %v502_v58, 5  ;;  %v491_v42 = vsel %vm6522_vm2, %v486_v15, %v490_v23  ;;  %v544_v52 = vshll.u32 %v5504_v27, 16  ;;  %v597_v30 = vor.u32 %v6502_v40, %v6500_v39  ;;  %v5506_v61 = vld [vmem:[%s9236_s0 + $0x1cc] sm:$0x1]  ;;  %v6040_v0 = vld [vmem:[%s9236_s0 + $0x80] ss:$8 sps:$4 sm:$0xff]  }
  0x20   :  { %1080 = vrot.lane.b32.xlu0 %v5590_v45, %s6307_s13  ;;  %v518_v43 = vrot.slane %v516_v25, 5  ;;  %v530_v45 = vshll.u32 %v5503_v26, 16  ;;  %v5601_v44 = vcombine.low %v477_v28, %v491_v42  ;;  %v542_v56 = vrot.slane %v541_v9, 4  ;;  %v5507_v1 = vld [vmem:[%s9236_s0 + $0x1d4] sm:$0x1]  ;;  %v6060_v20 = vld [vmem:[%s9237_s1] sm:$0xff]  }
  0x21   :  { %1000 = vrot.lane.b32.xlu1 %v6036_v50, %s6307_s13  ;;  %v528_v50 = vrot.slane %v527_v60, 4  ;;  %v505_v53 = vsel %vm6522_vm2, %v500_v24, %v504_v31  ;;  %v546_v38 = vrot.slane %v544_v52, 5  ;;  %v558_v39 = vshll.u32 %v5505_v57, 16  ;;  %v5508_v54 = vld [vmem:[%s9236_s0 + $0x1dc] sm:$0x1]  ;;  %5778 = vmatpush3.bf16.msra.mxu0 %v6056_v62  ;;  %v6057_v60 = vld [vmem:[%s9237_s1 + $0x48] sm:$0xff]  }
  0x22   :  { %v532_v55 = vrot.slane %v530_v45, 5  ;;  %v519_v35 = vsel %vm6522_vm2, %v514_v32, %v518_v43  ;;  %v572_v40 = vshll.u32 %v5506_v61, 16  ;;  %v611_v4 = vor.u32 %v6561_v12, %v6504_v41  ;;  %v6041_v2 = vld [vmem:[%s9236_s0 + $0x170] ss:$8 sps:$4 sm:$0xff]   ;;  %v5509_v13 = vld [vmem:[%s9236_s0 + $0x1e4] sm:$0x1]  ;;  %5779 = vmatprep.subr.bf16.mxu0 %v6057_v60 }
  0x23   :  { %v560_v8 = vrot.slane %v558_v39, 5  ;;  %v570_v47 = vrot.slane %v569_v33, 4  ;;  %v625_v59 = vor.u32 %v624_v34, %v6581_v19  ;;  %v5602_v9 = vcombine.low %v505_v53, %v519_v35  ;;  %v5510_v36 = vld [vmem:[%s9236_s0 + $0x1ec] sm:$0x1]  ;;  %v6043_v28 = vld [vmem:[%s9236_s0 + $0x190] ss:$8 sps:$4 sm:$0xff]  }
  0x24   :  { %1242 = vrot.lane.b32.xlu0 %v6037_v5, %s6307_s13  ;;  %v556_v5 = vrot.slane %v555_v21, 4  ;;  %v574_v41 = vrot.slane %v572_v40, 5  ;;  %v586_v10 = vshll.u32 %v5507_v1, 16  ;;  %v600_v11 = vshll.u32 %v5508_v54, 16  ;;  %v6042_v21 = vld [vmem:[%s9236_s0 + $0x180] ss:$8 sps:$4 sm:$0xff]  }
  0x25   :  { %1146 = vrot.lane.b32.xlu1 %v5599_v3, %s6307_s13  ;;  %v533_v12 = vsel %vm6522_vm2, %v528_v50, %v532_v55  ;;  %v547_v3 = vsel %vm6522_vm2, %v542_v56, %v546_v38  ;;  %v598_v7 = vrot.slane %v597_v30, 4  ;;  %v612_v15 = vrot.slane %v611_v4, 4  ;;  %5780 = vmatpush3.bf16.msra.mxu0 %v6058_v63  ;;  %v6044_v34 = vld [vmem:[%s9236_s0 + $0x1a0] ss:$8 sps:$4 sm:$0xff]   ;;  %v6061_v43 = vld [vmem:[%s9237_s1 + $0xf8] sm:$0xff]   ;;  %v6708_v48 = vld [vmem:[%s9237_s1 + $0xf0] sm:$0xff]  }
  0x26   :  { %v588_v14 = vrot.slane %v586_v10, 5  ;;  %v602_v37 = vrot.slane %v600_v11, 5  ;;  %v614_v17 = vshll.u32 %v5509_v13, 16  ;;  %v626_v18 = vrot.slane %v625_v59, 4  ;;  %5781 = vmatprep.subr.bf16.mxu0 %v6059_v16  ;;  %v6701_v45 = vld [vmem:[%s9237_s1 + $0xb8] sm:$0xff]   ;;  %6003 = vmatprep.subr.bf16.mxu1 %v6061_v43  ;;  %v6721_v50 = vld [vmem:[%s9237_s1 + $0xe8] sm:$0xff]  }
  0x27   :  { %v628_v19 = vshll.u32 %v5510_v36, 16  ;;  %v5603_v58 = vcombine.low %v533_v12, %v547_v3  ;;  %v561_v46 = vsel %vm6522_vm2, %v556_v5, %v560_v8  ;;  %6011 = vmatpush3.bf16.msra.mxu1 %v6701_v45  ;;  %v6726_v52 = vld [vmem:[%s9237_s1 + $0xa8] sm:$0xff]   ;;  %v6738_v30 = vld [vmem:[%s9237_s1 + $0xa0] sm:$0xff]   ;;  %v6750_v53 = vld [vmem:[%s9237_s1 + $0x98] sm:$0xff]   ;;  %vm41_vm4 = vcmask 516096  }
  0x28   :  { %1244 = vrot.lane.b32.xlu0 %v6038_v6, %s6307_s13  ;;  %v584_v6 = vrot.slane %v583_v29, 4  ;;  %v616_v23 = vrot.slane %v614_v17, 5  ;;  %v603_v32 = vsel %vm6522_vm2, %v598_v7, %v602_v37  ;;  %6004 = vmatprep.subr.bf16.mxu1 %v6708_v48  ;;  %v6731_v29 = vld [vmem:[%s9237_s1 + $0xe0] sm:$0xff]   ;;  %v6756_v55 = vld [vmem:[%s9237_s1 + $0xd0] sm:$0xff]   ;;  %v6768_v57 = vld [vmem:[%s9237_s1 + $0xc8] sm:$0xff]   ;;  %vm2159_vm5 = vcmask 1046528  }
  0x29   :  { %1148 = vrot.lane.b32.xlu1 %v5600_v22, %s6307_s13  ;;  %v575_v22 = vsel %vm6522_vm2, %v570_v47, %v574_v41  ;;  %v630_v24 = vrot.slane %v628_v19, 5  ;;  %5782 = vmatpush3.bf16.msra.mxu0 %v6060_v20  ;;  %v6763_v56 = vld [vmem:[%s9237_s1 + $0x90] sm:$0xff]   ;;  %v6774_v61 = vld [vmem:[%s9237_s1 + $0x88] sm:$0xff]   ;;  %v6780_v35 = vld [vmem:[%s9236_s0] sm:$0xf]  ;;  %vm2309_vm6 = vcmask 1045504  }
  0x2a   :  { %v5604_v25 = vcombine.low %v561_v46, %v575_v22  ;;  %v589_v31 = vsel %vm6522_vm2, %v584_v6, %v588_v14  ;;  %v617_v27 = vsel %vm6522_vm2, %v612_v15, %v616_v23  ;;  %5831 = vmatprep.subr.bf16.mxu0 %v6061_v43  ;;  %v6785_v38 = vld [vmem:[%s9236_s0 + $0x8] sm:$0xf]  ;;  %v6791_v39 = vld [vmem:[%s9236_s0 + $0x10] sm:$0xf]  ;;  %v6796_v40 = vld [vmem:[%s9237_s1 + $0xc0] sm:$0xff]   ;;  %v135_v1 = vshrl.u32 %v6780_v35, 16 }
  0x2b   :  { %v5605_v26 = vcombine.low %v589_v31, %v603_v32  ;;  %v631_v33 = vsel %vm6522_vm2, %v626_v18, %v630_v24  ;;  %v6801_v62 = vld [vmem:[%s9236_s0 + $0x18] sm:$0xf]  ;;  %v138_v4 = vshll.u32 %v6780_v35, 16  ;;  %v149_v5 = vshrl.u32 %v6785_v38, 16  ;;  %v116_v41 = vld [vmem:[%s9236_s0 + $0xc] sm:$0x1] }
  0x2c   :  { %1246 = vrot.lane.b32.xlu0 %v6039_v49, %s6307_s13  ;;  %v5606_v42 = vcombine.low %v617_v27, %v631_v33  ;;  %v6715_v49 = vld [vmem:[%s9237_s1 + $0xb0] sm:$0xff]   ;;  %v152_v8 = vshll.u32 %v6785_v38, 16  ;;  %v163_v47 = vshrl.u32 %v6791_v39, 16  ;;  %v166_v54 = vshll.u32 %v6791_v39, 16  ;;  %v118_v3 = vld [vmem:[%s9236_s0 + $0x1c] sm:$0x1] }
  0x2d   :  { %1150 = vrot.lane.b32.xlu1 %v5601_v44, %s6307_s13  ;;  %6012 = vmatpush3.bf16.msra.mxu1 %v6715_v49  ;;  %v6744_v44 = vld [vmem:[%s9237_s1 + $0xd8] sm:$0xff]   ;;  %v177_v59 = vshrl.u32 %v6801_v62, 16  ;;  %v180_v60 = vshll.u32 %v6801_v62, 16  ;;  %v137_v10 = vrot.slane %v135_v1, 4  ;;  %v140_v11 = vrot.slane %v138_v4, 5 }
  0x2e   :  { %6005 = vmatprep.subr.bf16.mxu1 %v6721_v50  ;;  %v151_v63 = vrot.slane %v149_v5, 4  ;;  %v117_v12 = vld [vmem:[%s9236_s0 + $0x14] sm:$0x1]  ;;  %v165_v6 = vrot.slane %v163_v47, 4  ;;  %v168_v7 = vrot.slane %v166_v54, 5  ;;  %v158_v36 = vshll.u32 %v116_v41, 16 }
  0x2f   :  { %v179_v13 = vrot.slane %v177_v59, 4  ;;  %v182_v14 = vrot.slane %v180_v60, 5  ;;  %v6833_v15 = vld [vmem:[%s9236_s0 + $0x20] sm:$0xf]  ;;  %v6838_v16 = vld [vmem:[%s9236_s0 + $0x28] sm:$0xf]  ;;  %v141_v17 = vor.u32 %v140_v11, %v137_v10 }
  0x30   :  { %1248 = vrot.lane.b32.xlu0 %v6040_v0, %s6307_s13  ;;  %v6806_v0 = vld [vmem:[%s9237_s1 + $0x80] sm:$0xff]   ;;  %v172_v19 = vshll.u32 %v117_v12, 16  ;;  %v186_v20 = vshll.u32 %v118_v3, 16  ;;  %v191_v46 = vshrl.u32 %v6833_v15, 16  ;;  %v194_v22 = vshll.u32 %v6833_v15, 16 }
  0x31   :  { %1152 = vrot.lane.b32.xlu1 %v5602_v9, %s6307_s13  ;;  %6013 = vmatpush3.bf16.msra.mxu1 %v6726_v52  ;;  %v115_v9 = vld [vmem:[%s9236_s0 + $0x4] sm:$0x1]  ;;  %v205_v23 = vshrl.u32 %v6838_v16, 16  ;;  %v208_v24 = vshll.u32 %v6838_v16, 16  ;;  %v142_v31 = vrot.slane %v141_v17, 4 }
  0x32   :  { %6006 = vmatprep.subr.bf16.mxu1 %v6731_v29  ;;  %v144_v37 = vshll.u32 %v115_v9, 16  ;;  %v188_v27 = vrot.slane %v186_v20, 5  ;;  %v119_v33 = vld [vmem:[%s9236_s0 + $0x24] sm:$0x1]  ;;  %v120_v43 = vld [vmem:[%s9236_s0 + $0x2c] sm:$0x1] }
  0x33   :  { %v193_v1 = vrot.slane %v191_v46, 4  ;;  %v196_v4 = vrot.slane %v194_v22, 5  ;;  %v207_v5 = vrot.slane %v205_v23, 4  ;;  %v6853_v47 = vld [vmem:[%s9236_s0 + $0x30] sm:$0xf]  ;;  %v200_v41 = vshll.u32 %v119_v33, 16 }
  0x34   :  { %1250 = vrot.lane.b32.xlu0 %v6041_v2, %s6307_s13  ;;  %v154_v2 = vrot.slane %v152_v8, 5  ;;  %v210_v8 = vrot.slane %v208_v24, 5  ;;  %v6862_v60 = vld [vmem:[%s9236_s0 + $0x38] sm:$0xf]  ;;  %v214_v10 = vshll.u32 %v120_v43, 16  ;;  %v219_v3 = vshrl.u32 %v6853_v47, 16 }
  0x35   :  { %1154 = vrot.lane.b32.xlu1 %v5603_v58, %s6307_s13  ;;  %6014 = vmatpush3.bf16.msra.mxu1 %v6738_v30  ;;  %v169_v58 = vor.u32 %v168_v7, %v165_v6  ;;  %v121_v12 = vld [vmem:[%s9236_s0 + $0x34] sm:$0x1]  ;;  %v222_v7 = vshll.u32 %v6853_v47, 16  ;;  %v202_v17 = vrot.slane %v200_v41, 5  ;;  %v6885_v20 = vld [vmem:[%s9236_s0 + $0x128] sm:$0xf] }
  0x36   :  { %6007 = vmatprep.subr.bf16.mxu1 %v6744_v44  ;;  %v155_v18 = vor.u32 %v154_v2, %v151_v63  ;;  %v197_v63 = vor.u32 %v196_v4, %v193_v1  ;;  %v211_v2 = vor.u32 %v210_v8, %v207_v5  ;;  %v228_v22 = vshll.u32 %v121_v12, 16  ;;  %v123_v41 = vld [vmem:[%s9236_s0 + $0x124] sm:$0x1] }
  0x37   :  { %v264_v33 = vshll.u32 %v6885_v20, 16  ;;  %v5560_v12 = vcombine.low %v6791_v39, %v6801_v62 }
  0x38   :  { %1252 = vrot.lane.b32.xlu0 %v6042_v21, %s6307_s13  ;;  %v183_v21 = vor.u32 %v182_v14, %v179_v13  ;;  %v156_v32 = vrot.slane %v155_v18, 4  ;;  %v233_v13 = vshrl.u32 %v6862_v60, 16  ;;  %v236_v14 = vshll.u32 %v6862_v60, 16 }
  0x39   :  { %1156 = vrot.lane.b32.xlu1 %v5604_v25, %s6307_s13  ;;  %6015 = vmatpush3.bf16.msra.mxu1 %v6750_v53  ;;  %v146_v25 = vrot.slane %v144_v37, 5  ;;  %v5559_v37 = vcombine.low %v6780_v35, %v6785_v38  ;;  %v216_v18 = vrot.slane %v214_v10, 5  ;;  %v212_v46 = vrot.slane %v211_v2, 4  ;;  %v122_v35 = vld [vmem:[%s9236_s0 + $0x3c] sm:$0x1] }
  0x3a   :  { %6008 = vmatprep.subr.bf16.mxu1 %v6756_v55  ;;  %v221_v38 = vrot.slane %v219_v3, 4  ;;  %v230_v1 = vrot.slane %v228_v22, 5  ;;  %v242_v4 = vshll.u32 %v122_v35, 16  ;;  %v266_v2 = vrot.slane %v264_v33, 5  ;;  %v124_v3 = vld [vmem:[%s9236_s0 + $0x12c] sm:$0x1] }
  0x3b   :  { %v147_v54 = vsel %vm6522_vm2, %v142_v31, %v146_v25  ;;  %v224_v25 = vrot.slane %v222_v7, 5  ;;  %v238_v31 = vrot.slane %v236_v14, 5  ;;  %v125_v33 = vld [vmem:[%s9236_s0 + $0x134] sm:$0x1] }
  0x3c   :  { %1254 = vrot.lane.b32.xlu0 %v6043_v28, %s6307_s13  ;;  %v160_v28 = vrot.slane %v158_v36, 5 }
  0x3d   :  { %1158 = vrot.lane.b32.xlu1 %v5605_v26, %s6307_s13  ;;  %6016 = vmatpush3.bf16.msra.mxu1 %v6763_v56  ;;  %v174_v26 = vrot.slane %v172_v19, 5  ;;  %v6880_v19 = vld [vmem:[%s9236_s0 + $0x120] sm:$0xf] }
  0x3e   :  { %6009 = vmatprep.subr.bf16.mxu1 %v6768_v57  ;;  %v161_v59 = vsel %vm6522_vm2, %v156_v32, %v160_v28  ;;  %v235_v28 = vrot.slane %v233_v13, 4  ;;  %v247_v32 = vshrl.u32 %v6880_v19, 16 }
  0x3f   :  { %v5575_v6 = vcombine.low %v147_v54, %v161_v59  ;;  %v217_v54 = vsel %vm6522_vm2, %v212_v46, %v216_v18  ;;  %v225_v59 = vor.u32 %v224_v25, %v221_v38  ;;  %v5561_v25 = vcombine.low %v6833_v15, %v6838_v16 }
  0x40   :  { %1256 = vrot.lane.b32.xlu0 %v6044_v34, %s6307_s13  ;;  %v170_v34 = vrot.slane %v169_v58, 4  ;;  %v249_v10 = vrot.slane %v247_v32, 4 }
  0x41   :  { %1160 = vrot.lane.b32.xlu1 %v5606_v42, %s6307_s13  ;;  %6017 = vmatpush3.bf16.msra.mxu1 %v6774_v61  ;;  %v184_v42 = vrot.slane %v183_v21, 4  ;;  %v198_v21 = vrot.slane %v197_v63, 4  ;;  %v226_v39 = vrot.slane %v225_v59, 4  ;;  %v284_v59 = vshll.u32 %v125_v33, 16 }
  0x42   :  { %6010 = vmatprep.subr.bf16.mxu1 %v6796_v40  ;;  %v175_v9 = vsel %vm6522_vm2, %v170_v34, %v174_v26  ;;  %v250_v26 = vshll.u32 %v6880_v19, 16  ;;  %v5563_v33 = vcombine.low %v6880_v19, %v6885_v20  ;;  %v129_v19 = vld [vmem:[%s9236_s0 + $0x154] sm:$0x1] }
  0x43   :  { %v189_v11 = vsel %vm6522_vm2, %v184_v42, %v188_v27  ;;  %v261_v27 = vshrl.u32 %v6885_v20, 16  ;;  %v203_v43 = vsel %vm6522_vm2, %v198_v21, %v202_v17 }
  0x44   :  { %v5576_v36 = vcombine.low %v175_v9, %v189_v11  ;;  %v239_v9 = vor.u32 %v238_v31, %v235_v28  ;;  %v252_v11 = vrot.slane %v250_v26, 5  ;;  %v5577_v13 = vcombine.low %v203_v43, %v217_v54 }
  0x45   :  { %6018 = vmatpush3.bf16.msra.mxu1 %v6806_v0  ;;  %v263_v63 = vrot.slane %v261_v27, 4  ;;  %v231_v28 = vsel %vm6522_vm2, %v226_v39, %v230_v1 }
  0x46   :  { %v240_v62 = vrot.slane %v239_v9, 4  ;;  %v253_v17 = vor.u32 %v252_v11, %v249_v10  ;;  %5955 = vmatprep.subr.bf16.mxu1 %v6105_v51 }
  0x47   :  { %v267_v18 = vor.u32 %v266_v2, %v263_v63 }
  0x48   :  { %v254_v31 = vrot.slane %v253_v17, 4  ;;  %v127_v17 = vld [vmem:[%s9236_s0 + $0x144] sm:$0x1] }
  0x49   :  { %v268_v26 = vrot.slane %v267_v18, 4 }
  0x76   :  { %v1067_v58 = vpop.permute.xlu0 %1066 }
  0x77   :  { %v1069_v23 = vpop.permute.xlu1 %1068  ;;  %v1316_v24 = vsel %vm27_vm3, %v5575_v6, %v1067_v58  ;;  %v6913_v6 = vld [vmem:[%s9236_s0 + $0x130] sm:$0xf]  ;;  %v270_v58 = vshll.u32 %v124_v3, 16 }
  0x78   :  { %1761 = vmatprep.mubr.bf16.mxu0 %v1316_v24  ;;  %v1320_v42 = vsel %vm27_vm3, %v5576_v36, %v1069_v23  ;;  %v256_v36 = vshll.u32 %v123_v41, 16  ;;  %v275_v21 = vshrl.u32 %v6913_v6, 16 }
  0x79   :  { %v272_v27 = vrot.slane %v270_v58, 5 }
  0x7a   :  { %v987_v34 = vpop.permute.xlu0 %986  ;;  %v258_v32 = vrot.slane %v256_v36, 5  ;;  %v277_v15 = vrot.slane %v275_v21, 4 }
  0x7b   :  { %v989_v5 = vpop.permute.xlu1 %988  ;;  %v1284_v8 = vsel %vm27_vm3, %v5559_v37, %v987_v34  ;;  %v244_v37 = vrot.slane %v242_v4, 5  ;;  %v6946_v4 = vld [vmem:[%s9236_s0 + $0x140] sm:$0xf]  ;;  %v273_v54 = vsel %vm6522_vm2, %v268_v26, %v272_v27 }
  0x7c   :  { %1762 = vmatmul.mubr.bf16.vlgmr.msra.gmra.mxu0 %v1284_v8  ;;  %v1288_v46 = vsel %vm27_vm3, %v5560_v12, %v989_v5  ;;  %v259_v8 = vsel %vm6522_vm2, %v254_v31, %v258_v32  ;;  %v303_v11 = vshrl.u32 %v6946_v4, 16  ;;  %v306_v12 = vshll.u32 %v6946_v4, 16 }
  0x7d   :  { %5832 = vmatpush3.bf16.msra.mxu0 %v6701_v45  ;;  %1769 = vmatprep.mubr.bf16.mxu0 %v1320_v42  ;;  %v6919_v45 = vld [vmem:[%s9236_s0 + $0x138] sm:$0xf]  ;;  %v5579_v39 = vcombine.low %v259_v8, %v273_v54 }
  0x7e   :  { %v1071_v7 = vpop.permute.xlu0 %1070  ;;  %5833 = vmatprep.subr.bf16.mxu0 %v6708_v48  ;;  %v278_v48 = vshll.u32 %v6913_v6, 16  ;;  %v289_v35 = vshrl.u32 %v6919_v45, 16  ;;  %v292_v38 = vshll.u32 %v6919_v45, 16  ;;  %v305_v18 = vrot.slane %v303_v11, 4 }
  0x7f   :  { %v991_v14 = vpop.permute.xlu1 %990  ;;  %v1324_v23 = vsel %vm27_vm3, %v5577_v13, %v1071_v7  ;;  %v308_v58 = vrot.slane %v306_v12, 5 }
  0x80   :  { %v280_v16 = vrot.slane %v278_v48, 5  ;;  %v291_v34 = vrot.slane %v289_v35, 4  ;;  %v294_v42 = vrot.slane %v292_v38, 5  ;;  %v1292_v9 = vsel %vm27_vm3, %v5561_v25, %v991_v14 }
  0x81   :  { %5834 = vmatpush3.bf16.msra.mxu0 %v6715_v49  ;;  %v245_v49 = vsel %vm6522_vm2, %v240_v62, %v244_v37  ;;  %v286_v14 = vrot.slane %v284_v59, 5  ;;  %v130_v59 = vld [vmem:[%s9236_s0 + $0x15c] sm:$0x1] }
  0x82   :  { %v1073_v22 = vpop.permute.xlu0 %1072  ;;  %5835 = vmatprep.subr.bf16.mxu0 %v6721_v50  ;;  %v126_v50 = vld [vmem:[%s9236_s0 + $0x13c] sm:$0x1]  ;;  %v5578_v1 = vcombine.low %v231_v28, %v245_v49  ;;  %v281_v41 = vor.u32 %v280_v16, %v277_v15  ;;  %v295_v10 = vor.u32 %v294_v42, %v291_v34  ;;  %v309_v28 = vor.u32 %v308_v58, %v305_v18 }
  0x83   :  { %v993_v24 = vpop.permute.xlu1 %992 }
  0x84   :  { %1770 = vmatmul.mubr.bf16.gmra.mxu0 %v1288_v46  ;;  %v1328_v2 = vsel %vm27_vm3, %v5578_v1, %v1073_v22  ;;  %v282_v62 = vrot.slane %v281_v41, 4  ;;  %v296_v37 = vrot.slane %v295_v10, 4  ;;  %v6988_v46 = vld [vmem:[%s9236_s0 + $0x150] sm:$0xf]  ;;  %v312_v22 = vshll.u32 %v127_v17, 16 }
  0x85   :  { %1777 = vmatprep.mubr.bf16.mxu0 %v1324_v23  ;;  %5836 = vmatpush3.bf16.msra.mxu0 %v6726_v52  ;;  %v6953_v52 = vld [vmem:[%s9236_s0 + $0x148] sm:$0xf]  ;;  %v334_v26 = vshll.u32 %v6988_v46, 16  ;;  %v340_v10 = vshll.u32 %v129_v19, 16  ;;  %v7058_v17 = vld [vmem:[%s9236_s0 + $0x130] sm:$0xf] }
  0x86   :  { %v1075_v43 = vpop.permute.xlu0 %1074  ;;  %5837 = vmatprep.subr.bf16.mxu0 %v6731_v29  ;;  %v298_v29 = vshll.u32 %v126_v50, 16  ;;  %v317_v3 = vshrl.u32 %v6953_v52, 16  ;;  %v320_v7 = vshll.u32 %v6953_v52, 16  ;;  %v287_v35 = vsel %vm6522_vm2, %v282_v62, %v286_v14 }
  0x87   :  { %v6948_v5 = vpop.permute.xlu1 %994  ;;  %v1332_v25 = vsel %vm27_vm3, %v5579_v39, %v1075_v43  ;;  %v314_v16 = vrot.slane %v312_v22, 5  ;;  %v7020_v43 = vld [vmem:[%s9237_s1 + $0x118] sm:$0xff]   ;;  %v336_v20 = vrot.slane %v334_v26, 5  ;;  %v342_v39 = vrot.slane %v340_v10, 5 }
  0x88   :  { %v319_v21 = vrot.slane %v317_v3, 4  ;;  %v354_v3 = vshll.u32 %v130_v59, 16 }
  0x89   :  { %5838 = vmatpush3.bf16.msra.mxu0 %v6738_v30  ;;  %v5562_v30 = vcombine.low %v6853_v47, %v6862_v60  ;;  %v322_v47 = vrot.slane %v320_v7, 5 }
  0x8a   :  { %v6962_v63 = vpop.permute.xlu0 %1076  ;;  %5839 = vmatprep.subr.bf16.mxu0 %v6744_v44  ;;  %v300_v44 = vrot.slane %v298_v29, 5 }
  0x8b   :  { %v6969_v13 = vpop.permute.xlu1 %996  ;;  %v1296_v48 = vsel %vm27_vm3, %v5562_v30, %v993_v24  ;;  %v323_v49 = vor.u32 %v322_v47, %v319_v21  ;;  %v331_v24 = vshrl.u32 %v6988_v46, 16 }
  0x8c   :  { %1778 = vmatmul.mubr.bf16.gmra.mxu0 %v1292_v9  ;;  %v301_v38 = vsel %vm6522_vm2, %v296_v37, %v300_v44  ;;  %v356_v37 = vrot.slane %v354_v3, 5  ;;  %v7053_v44 = vld [vmem:[%s9236_s0 + $0x128] sm:$0xf] }
  0x8d   :  { %1785 = vmatprep.mubr.bf16.mxu0 %v1328_v2  ;;  %5840 = vmatpush3.bf16.msra.mxu0 %v6750_v53  ;;  %v128_v53 = vld [vmem:[%s9236_s0 + $0x14c] sm:$0x1]  ;;  %v5580_v50 = vcombine.low %v287_v35, %v301_v38  ;;  %v324_v34 = vrot.slane %v323_v49, 4  ;;  %v5611_v21 = vcombine.low %v7053_v44, %v7058_v17  ;;  %v5565_v35 = vcombine.low %v6946_v4, %v6953_v52  ;;  %v7101_v4 = vld [vmem:[%s9236_s0 + $0x150] sm:$0xf] }
  0x8e   :  { %v6974_v36 = vpop.permute.xlu0 %1078  ;;  %5841 = vmatprep.subr.bf16.mxu0 %v6756_v55  ;;  %v6993_v55 = vld [vmem:[%s9236_s0 + $0x158] sm:$0xf]  ;;  %v326_v31 = vshll.u32 %v128_v53, 16  ;;  %v798_v10 = vshll.u32 %v7053_v44, 16 }
  0x8f   :  { %v6980_v60 = vpop.permute.xlu1 %998  ;;  %v345_v27 = vshrl.u32 %v6993_v55, 16  ;;  %v1336_v9 = vsel %vm27_vm3, %v5580_v50, %v6962_v63 }
  0x90   :  { %v328_v42 = vrot.slane %v326_v31, 5  ;;  %v1308_v52 = vsel %vm27_vm3, %v5565_v35, %v6980_v60  ;;  %v7121_v60 = vld [vmem:[%s9236_s0 + $0x10] sm:$0xf] }
  0x91   :  { %5842 = vmatpush3.bf16.msra.mxu0 %v6763_v56  ;;  %v348_v56 = vshll.u32 %v6993_v55, 16  ;;  %v347_v8 = vrot.slane %v345_v27, 4  ;;  %v6088_v27 = vld [vmem:[%s9236_s0 + $0x208] ss:$8 sps:$4 sm:$0xff]  }
  0x92   :  { %v7001_v23 = vpop.permute.xlu0 %1080  ;;  %5843 = vmatprep.subr.bf16.mxu0 %v6768_v57  ;;  %v310_v57 = vrot.slane %v309_v28, 4  ;;  %v329_v2 = vsel %vm6522_vm2, %v324_v34, %v328_v42 }
  0x93   :  { %v7005_v32 = vpop.permute.xlu1 %1000  ;;  %v350_v54 = vrot.slane %v348_v56, 5 }
  0x94   :  { %1786 = vmatmul.mubr.bf16.gmra.mxu0 %v1296_v48  ;;  %v315_v41 = vsel %vm6522_vm2, %v310_v57, %v314_v16  ;;  %v7085_v48 = vld [vmem:[%s9236_s0 + $0x140] sm:$0xf]  ;;  %v7116_v16 = vld [vmem:[%s9236_s0 + $0x8] sm:$0xf] }
  0x95   :  { %1793 = vmatprep.mubr.bf16.mxu0 %v1332_v25  ;;  %5844 = vmatpush3.bf16.msra.mxu0 %v6774_v61  ;;  %v333_v61 = vrot.slane %v331_v24, 4  ;;  %v5581_v7 = vcombine.low %v315_v41, %v329_v2  ;;  %v7096_v24 = vld [vmem:[%s9236_s0 + $0x148] sm:$0xf]  ;;  %v5607_v19 = vcombine.low %v7116_v16, %v7121_v60  ;;  %v795_v41 = vshrl.u32 %v7053_v44, 16 }
  0x96   :  { %v7014_v15 = vpop.permute.xlu0 %1242  ;;  %5845 = vmatprep.subr.bf16.mxu0 %v6796_v40  ;;  %v1300_v40 = vsel %vm27_vm3, %v5563_v33, %v6948_v5  ;;  %v351_v5 = vor.u32 %v350_v54, %v347_v8  ;;  %v5613_v57 = vcombine.low %v7096_v24, %v7101_v4  ;;  %v7137_v8 = vld [vmem:[%s9236_s0 + $0x160] sm:$0xf]  ;;  %v812_v2 = vshll.u32 %v7058_v17, 16 }
  0x97   :  { %v7022_v1 = vpop.permute.xlu1 %1146  ;;  %v337_v12 = vor.u32 %v336_v20, %v333_v61  ;;  %v1340_v18 = vsel %vm27_vm3, %v5581_v7, %v6974_v36  ;;  %v7080_v36 = vld [vmem:[%s9236_s0 + $0x138] sm:$0xf]  ;;  %v1380_v54 = vsel %vm27_vm3, %v5607_v19, %v7014_v15  ;;  %v809_v15 = vshrl.u32 %v7058_v17, 16  ;;  %v6095_v17 = vld [vmem:[%s9236_s0 + $0x228] ss:$8 sps:$4 sm:$0xff]  }
  0x98   :  { %v352_v62 = vrot.slane %v351_v5, 4  ;;  %v5612_v49 = vcombine.low %v7080_v36, %v7085_v48  ;;  %v7132_v20 = vld [vmem:[%s9236_s0 + $0x158] sm:$0xf]  ;;  %v683_v35 = vshrl.u32 %v7116_v16, 16  ;;  %v5543_v19 = vld [vmem:[%s9236_s0 + $0xc] sm:$0x1] }
  0x99   :  { %5846 = vmatpush3.bf16.msra.mxu0 %v6806_v0  ;;  %v5564_v0 = vcombine.low %v6913_v6, %v6919_v45  ;;  %v338_v14 = vrot.slane %v337_v12, 4  ;;  %v6073_v5 = vld [vmem:[%s9236_s0 + $0xd8] ss:$8 sps:$4 sm:$0xff]  }
  0x9a   :  { %v7033_v29 = vpop.permute.xlu0 %1244  ;;  %5931 = vmatprep.subr.bf16.mxu0 %v7020_v43  ;;  %v357_v53 = vsel %vm6522_vm2, %v352_v62, %v356_v37  ;;  %v811_v62 = vrot.slane %v809_v15, 4  ;;  %v814_v37 = vrot.slane %v812_v2, 5  ;;  %v1348_v44 = vsel %vm27_vm3, %v6073_v5, %v7022_v1  ;;  %v5516_v1 = vld [vmem:[%s9236_s0 + $0x30] sm:$0xf] }
  0x9b   :  { %v7040_v11 = vpop.permute.xlu1 %1148  ;;  %v1304_v6 = vsel %vm27_vm3, %v5564_v0, %v6969_v13  ;;  %v343_v47 = vsel %vm6522_vm2, %v338_v14, %v342_v39  ;;  %v6085_v13 = vld [vmem:[%s9236_s0 + $0x1f8] ss:$8 sps:$4 sm:$0xff]   ;;  %v797_v14 = vrot.slane %v795_v41, 4  ;;  %v800_v39 = vrot.slane %v798_v10, 5 }
  0x9c   :  { %1794 = vmatmul.mubr.bf16.gmra.mxu0 %v1300_v40  ;;  %v5582_v22 = vcombine.low %v343_v47, %v357_v53  ;;  %v5614_v40 = vcombine.low %v7132_v20, %v7137_v8  ;;  %v5515_v47 = vld [vmem:[%s9236_s0 + $0x28] sm:$0xf]  ;;  %v756_v41 = vshll.u32 %v5516_v1, 16  ;;  %v6101_v10 = vld [vmem:[%s9236_s0 + $0xf8] ss:$8 sps:$4 sm:$0xff]   ;;  %v837_v5 = vshrl.u32 %v7085_v48, 16 }
  0x9d   :  { %1801 = vmatprep.mubr.bf16.mxu0 %v1336_v9  ;;  %v7151_v9 = vld [vmem:[%s9236_s0 + $0x18] sm:$0xf]  ;;  %v801_v53 = vor.u32 %v800_v39, %v797_v14  ;;  %v5546_v39 = vld [vmem:[%s9236_s0 + $0x24] sm:$0x1] }
  0x9e   :  { %v7046_v63 = vpop.permute.xlu0 %1246  ;;  %v1344_v56 = vsel %vm27_vm3, %v5582_v22, %v7001_v23  ;;  %v5566_v23 = vcombine.low %v6988_v46, %v6993_v55  ;;  %v6091_v55 = vld [vmem:[%s9236_s0 + $0x218] ss:$8 sps:$4 sm:$0xff]   ;;  %v6098_v22 = vld [vmem:[%s9236_s0 + $0xe8] ss:$8 sps:$4 sm:$0xff]  }
  0x9f   :  { %v7048_v30 = vpop.permute.xlu1 %1150 }
  0xa0   :  { %v1312_v46 = vsel %vm27_vm3, %v5566_v23, %v7005_v32  ;;  %v7156_v32 = vld [vmem:[%s9236_s0 + $0x20] sm:$0xf] }
  0xa1   :  { %v5608_v0 = vcombine.low %v7151_v9, %v7156_v32 }
  0xa2   :  { %v7062_v45 = vpop.permute.xlu0 %1248 }
  0xa3   :  { %v7066_v58 = vpop.permute.xlu1 %1152 }
  0xa4   :  { %1802 = vmatmul.mubr.bf16.gmra.mxu0 %v1304_v6  ;;  %v1384_v6 = vsel %vm27_vm3, %v5608_v0, %v7033_v29  ;;  %v686_v29 = vshll.u32 %v7116_v16, 16  ;;  %v711_v16 = vshrl.u32 %v7151_v9, 16  ;;  %v5545_v0 = vld [vmem:[%s9236_s0 + $0x1c] sm:$0x1] }
  0xa5   :  { %1809 = vmatprep.mubr.bf16.mxu0 %v1340_v18  ;;  %v6097_v18 = vld [vmem:[%s9237_s1 + $0x110] sm:$0xff]  }
  0xa6   :  { %v1251_v38 = vpop.permute.xlu0 %1250 }
  0xa7   :  { %v1155_v25 = vpop.permute.xlu1 %1154  ;;  %v1396_v28 = vsel %vm27_vm3, %v5611_v21, %v1251_v38  ;;  %v697_v38 = vshrl.u32 %v7121_v60, 16 }
  0xa8   :  { %1890 = vmatprep.mubr.bf16.mxu1 %v1396_v28  ;;  %v1364_v31 = vsel %vm27_vm3, %v6085_v13, %v1155_v25  ;;  %v815_v13 = vor.u32 %v814_v37, %v811_v62  ;;  %v700_v25 = vshll.u32 %v7121_v60, 16  ;;  %v714_v60 = vshll.u32 %v7151_v9, 16 }
  0xa9   :  { %1891 = vmatmul.mubr.bf16.vlgmr.msra.gmra.mxu1 %v1364_v31  ;;  %v6100_v31 = vld [vmem:[%s9237_s1 + $0x108] sm:$0xff]   ;;  %v753_v9 = vshrl.u32 %v5516_v1, 16 }
  0xaa   :  { %v1253_v26 = vpop.permute.xlu0 %1252  ;;  %v716_v14 = vrot.slane %v714_v60, 5  ;;  %5956 = vmatpush3.bf16.msra.mxu1 %v6105_v51 }
  0xab   :  { %v1157_v33 = vpop.permute.xlu1 %1156  ;;  %v1400_v50 = vsel %vm27_vm3, %v5612_v49, %v1253_v26  ;;  %v5609_v49 = vcombine.low %v5515_v47, %v5516_v1  ;;  %v7199_v26 = vrot.slane %v815_v13, 4 }
  0xac   :  { %1810 = vmatmul.mubr.bf16.gmra.mxu0 %v1308_v52  ;;  %1898 = vmatprep.mubr.bf16.mxu1 %v1400_v50  ;;  %v1368_v34 = vsel %vm27_vm3, %v6088_v27, %v1157_v33  ;;  %v7197_v52 = vrot.slane %v801_v53, 4  ;;  %v685_v27 = vrot.slane %v683_v35, 4  ;;  %v699_v33 = vrot.slane %v697_v38, 4 }
  0xad   :  { %1817 = vmatprep.mubr.bf16.mxu0 %v1344_v56  ;;  %v688_v56 = vrot.slane %v686_v29, 5  ;;  %v1352_v50 = vsel %vm27_vm3, %v6098_v22, %v7040_v11  ;;  %v1388_v23 = vsel %vm27_vm3, %v5609_v49, %v7046_v63  ;;  %v7219_v11 = vld [vmem:[%s9236_s0 + $0x40] sm:$0xf]  ;;  %v5544_v63 = vld [vmem:[%s9236_s0 + $0x14] sm:$0x1]  ;;  %v720_v29 = vshll.u32 %v5545_v0, 16 }
  0xae   :  { %v1255_v42 = vpop.permute.xlu0 %1254  ;;  %v734_v38 = vshll.u32 %v5546_v39, 16  ;;  %v5547_v22 = vld [vmem:[%s9236_s0 + $0x2c] sm:$0x1]  ;;  %v5552_v0 = vld [vmem:[%s9236_s0 + $0x134] sm:$0x1] }
  0xaf   :  { %v1404_v61 = vsel %vm27_vm3, %v5613_v57, %v1255_v42  ;;  %v1159_v59 = vpop.permute.xlu1 %1158  ;;  %v702_v57 = vrot.slane %v700_v25, 5  ;;  %v6103_v42 = vld [vmem:[%s9237_s1 + $0x100] sm:$0xff]   ;;  %v5548_v25 = vld [vmem:[%s9236_s0 + $0x34] sm:$0x1]  ;;  %v748_v60 = vshll.u32 %v5547_v22, 16 }
  0xb0   :  { %v1372_v3 = vsel %vm27_vm3, %v6091_v55, %v1159_v59  ;;  %v739_v55 = vshrl.u32 %v5515_v47, 16  ;;  %v826_v59 = vshll.u32 %v7080_v36, 16 }
  0xb1   :  { %1899 = vmatmul.mubr.bf16.gmra.mxu1 %v1368_v34  ;;  %v7211_v34 = vld [vmem:[%s9236_s0 + $0x38] sm:$0xf]  ;;  %v703_v15 = vor.u32 %v702_v57, %v699_v33  ;;  %v784_v33 = vshll.u32 %v7219_v11, 16 }
  0xb2   :  { %1906 = vmatprep.mubr.bf16.mxu1 %v1404_v61  ;;  %v1257_v12 = vpop.permute.xlu0 %1256  ;;  %v725_v61 = vshrl.u32 %v7156_v32, 16  ;;  %v5610_v2 = vcombine.low %v7211_v34, %v7219_v11  ;;  %v767_v49 = vshrl.u32 %v7211_v34, 16 }
  0xb3   :  { %v1408_v7 = vsel %vm27_vm3, %v5614_v40, %v1257_v12  ;;  %v1161_v21 = vpop.permute.xlu1 %1160  ;;  %v689_v40 = vor.u32 %v688_v56, %v685_v27  ;;  %v706_v12 = vshll.u32 %v5544_v63, 16  ;;  %v704_v13 = vrot.slane %v703_v15, 4 }
  0xb4   :  { %1818 = vmatmul.mubr.bf16.gmra.mxu0 %v1312_v46  ;;  %v1376_v28 = vsel %vm27_vm3, %v6095_v17, %v1161_v21  ;;  %v728_v46 = vshll.u32 %v7156_v32, 16  ;;  %v692_v32 = vshll.u32 %v5543_v19, 16  ;;  %v727_v62 = vrot.slane %v725_v61, 4 }
  0xb5   :  { %1858 = vmatprep.mubr.bf16.mxu0 %v1380_v54  ;;  %v742_v54 = vshll.u32 %v5515_v47, 16  ;;  %v1356_v21 = vsel %vm27_vm3, %v6101_v10, %v7048_v30  ;;  %v690_v47 = vrot.slane %v689_v40, 4  ;;  %v1392_v1 = vsel %vm27_vm3, %v5610_v2, %v7062_v45  ;;  %v5550_v2 = vld [vmem:[%s9236_s0 + $0x44] sm:$0x1] }
  0xb6   :  { %v730_v37 = vrot.slane %v728_v46, 5  ;;  %v694_v53 = vrot.slane %v692_v32, 5  ;;  %v708_v35 = vrot.slane %v706_v12, 5  ;;  %v770_v45 = vshll.u32 %v7211_v34, 16 }
  0xb7   :  { %v744_v17 = vrot.slane %v742_v54, 5  ;;  %v781_v56 = vshrl.u32 %v7219_v11, 16  ;;  %v722_v11 = vrot.slane %v720_v29, 5  ;;  %v736_v19 = vrot.slane %v734_v38, 5 }
  0xb8   :  { %v731_v30 = vor.u32 %v730_v37, %v727_v62  ;;  %v695_v57 = vsel %vm6522_vm2, %v690_v47, %v694_v53  ;;  %v769_v46 = vrot.slane %v767_v49, 4  ;;  %v786_v40 = vrot.slane %v784_v33, 5 }
  0xb9   :  { %1907 = vmatmul.mubr.bf16.gmra.mxu1 %v1372_v3  ;;  %v840_v3 = vshll.u32 %v7085_v48, 16  ;;  %v783_v54 = vrot.slane %v781_v56, 4  ;;  %v750_v10 = vrot.slane %v748_v60, 5  ;;  %v851_v32 = vshrl.u32 %v7096_v24, 16  ;;  %v5554_v48 = vld [vmem:[%s9236_s0 + $0x144] sm:$0x1] }
  0xba   :  { %1914 = vmatprep.mubr.bf16.mxu1 %v1408_v7  ;;  %v713_v7 = vrot.slane %v711_v16, 4  ;;  %v709_v16 = vsel %vm6522_vm2, %v704_v13, %v708_v35  ;;  %v732_v61 = vrot.slane %v731_v30, 4  ;;  %v854_v12 = vshll.u32 %v7096_v24, 16 }
  0xbb   :  { %v787_v37 = vor.u32 %v786_v40, %v783_v54  ;;  %v839_v47 = vrot.slane %v837_v5, 4  ;;  %v853_v53 = vrot.slane %v851_v32, 4  ;;  %v879_v56 = vshrl.u32 %v7132_v20, 16 }
  0xbc   :  { %1859 = vmatmul.mubr.bf16.vlgmr.msra.gmra.mxu0 %v1348_v44  ;;  %v741_v44 = vrot.slane %v739_v55, 4  ;;  %v772_v55 = vrot.slane %v770_v45, 5  ;;  %v737_v24 = vsel %vm6522_vm2, %v732_v61, %v736_v19  ;;  %v856_v13 = vrot.slane %v854_v12, 5 }
  0xbd   :  { %5932 = vmatpush3.bf16.msra.mxu0 %v7020_v43  ;;  %1866 = vmatprep.mubr.bf16.mxu0 %v1384_v6  ;;  %v823_v43 = vshrl.u32 %v7080_v36, 16  ;;  %v755_v6 = vrot.slane %v753_v9, 4  ;;  %v5549_v36 = vld [vmem:[%s9236_s0 + $0x3c] sm:$0x1]  ;;  %v788_v30 = vrot.slane %v787_v37, 4  ;;  %v882_v33 = vshll.u32 %v7132_v20, 16 }
  0xbe   :  { %5933 = vmatprep.subr.bf16.mxu0 %v6097_v18  ;;  %v773_v62 = vor.u32 %v772_v55, %v769_v46  ;;  %v846_v19 = vshll.u32 %v5554_v48, 16  ;;  %v881_v55 = vrot.slane %v879_v56, 4 }
  0xbf   :  { %v7266_v34 = vrot.slane %v823_v43, 4  ;;  %v884_v54 = vrot.slane %v882_v33, 5 }
  0xc0   :  { %v774_v22 = vrot.slane %v773_v62, 4 }
  0xc1   :  { %1915 = vmatmul.mubr.bf16.gmra.mxu1 %v1376_v28  ;;  %5934 = vmatpush3.bf16.msra.mxu0 %v6097_v18  ;;  %v758_v18 = vrot.slane %v756_v41, 5  ;;  %v717_v28 = vor.u32 %v716_v14, %v713_v7  ;;  %v5623_v41 = vcombine.low %v695_v57, %v709_v16  ;;  %v865_v7 = vshrl.u32 %v7101_v4, 16  ;;  %v5556_v57 = vld [vmem:[%s9236_s0 + $0x154] sm:$0x1] }
  0xc2   :  { %5935 = vmatprep.subr.bf16.mxu0 %v6100_v31  ;;  %v868_v14 = vshll.u32 %v7101_v4, 16  ;;  %v857_v16 = vor.u32 %v856_v13, %v853_v53  ;;  %v874_v46 = vshll.u32 %v5556_v57, 16 }
  0xc3   :  { %v759_v27 = vor.u32 %v758_v18, %v755_v6  ;;  %v718_v63 = vrot.slane %v717_v28, 4  ;;  %v867_v35 = vrot.slane %v865_v7, 4 }
  0xc4   :  { %1867 = vmatmul.mubr.bf16.gmra.mxu0 %v1352_v50  ;;  %v6104_v50 = vld [vmem:[%s9236_s0 + $0x108] ss:$8 sps:$4 sm:$0xff]   ;;  %v870_v29 = vrot.slane %v868_v14, 5 }
  0xc5   :  { %1874 = vmatprep.mubr.bf16.mxu0 %v1388_v23  ;;  %5936 = vmatpush3.bf16.msra.mxu0 %v6100_v31  ;;  %v745_v31 = vor.u32 %v744_v17, %v741_v44  ;;  %v762_v23 = vshll.u32 %v5548_v25, 16  ;;  %v1360_v9 = vsel %vm27_vm3, %v6104_v50, %v7066_v58  ;;  %v5551_v58 = vld [vmem:[%s9236_s0 + $0x12c] sm:$0x1]  ;;  %v723_v39 = vsel %vm6522_vm2, %v718_v63, %v722_v11 }
  0xc6   :  { %5937 = vmatprep.subr.bf16.mxu0 %v6103_v42  ;;  %v776_v44 = vshll.u32 %v5549_v36, 16  ;;  %v790_v17 = vshll.u32 %v5550_v2, 16  ;;  %v804_v4 = vshll.u32 %v5551_v58, 16  ;;  %v5624_v38 = vcombine.low %v723_v39, %v737_v24  ;;  %v5555_v50 = vld [vmem:[%s9236_s0 + $0x14c] sm:$0x1] }
  0xc7   :  { %v746_v43 = vrot.slane %v745_v31, 4  ;;  %v764_v15 = vrot.slane %v762_v23, 5  ;;  %v871_v60 = vor.u32 %v870_v29, %v867_v35  ;;  %v893_v23 = vshrl.u32 %v7137_v8, 16  ;;  %v5558_v58 = vld [vmem:[%s9236_s0 + $0x164] sm:$0x1]  ;;  %v6106_v29 = vld [vmem:[%s9238_s4 + $0x10] sm:$0xff]  }
  0xc8   :  { %v778_v28 = vrot.slane %v776_v44, 5  ;;  %v792_v49 = vrot.slane %v790_v17, 5  ;;  %v806_v45 = vrot.slane %v804_v4, 5  ;;  %v896_v11 = vshll.u32 %v7137_v8, 16  ;;  %5957 = vmatprep.subr.bf16.mxu1 %v6106_v29 }
  0xc9   :  { %5938 = vmatpush3.bf16.msra.mxu0 %v6103_v42  ;;  %v7268_v42 = vrot.slane %v826_v59, 5  ;;  %v760_v59 = vrot.slane %v759_v27, 4  ;;  %v751_v6 = vsel %vm6522_vm2, %v746_v43, %v750_v10  ;;  %v5553_v27 = vld [vmem:[%s9236_s0 + $0x13c] sm:$0x1]  ;;  %v860_v61 = vshll.u32 %v5555_v50, 16  ;;  %5958 = vmatpush3.bf16.msra.mxu1 %v6106_v29 }
  0xca   :  { %v779_v20 = vsel %vm6522_vm2, %v774_v22, %v778_v28  ;;  %v807_v63 = vsel %vm6522_vm2, %v7197_v52, %v806_v45  ;;  %v895_v40 = vrot.slane %v893_v23, 4  ;;  %v5557_v52 = vld [vmem:[%s9236_s0 + $0x15c] sm:$0x1]  ;;  %v858_v2 = vrot.slane %v857_v16, 4 }
  0xcb   :  { %v765_v18 = vsel %vm6522_vm2, %v760_v59, %v764_v15  ;;  %v829_v5 = vor.u32 %v7268_v42, %v7266_v34  ;;  %v793_v34 = vsel %vm6522_vm2, %v788_v30, %v792_v49  ;;  %v832_v42 = vshll.u32 %v5553_v27, 16 }
  0xcc   :  { %1875 = vmatmul.mubr.bf16.gmra.mxu0 %v1356_v21  ;;  %v818_v21 = vshll.u32 %v5552_v0, 16  ;;  %v5625_v25 = vcombine.low %v751_v6, %v765_v18  ;;  %v848_v15 = vrot.slane %v846_v19, 5  ;;  %v862_v32 = vrot.slane %v860_v61, 5 }
  0xcd   :  { %1882 = vmatprep.mubr.bf16.mxu0 %v1392_v1  ;;  %v842_v1 = vrot.slane %v840_v3, 5  ;;  %v830_v36 = vrot.slane %v829_v5, 4  ;;  %v834_v10 = vrot.slane %v832_v42, 5  ;;  %v872_v12 = vrot.slane %v871_v60, 4 }
  0xce   :  { %v820_v31 = vrot.slane %v818_v21, 5  ;;  %v885_v0 = vor.u32 %v884_v54, %v881_v55  ;;  %v888_v62 = vshll.u32 %v5557_v52, 16  ;;  %v902_v24 = vshll.u32 %v5558_v58, 16 }
  0xcf   :  { %v843_v3 = vor.u32 %v842_v1, %v839_v47  ;;  %v835_v14 = vsel %vm6522_vm2, %v830_v36, %v834_v10  ;;  %v863_v37 = vsel %vm6522_vm2, %v858_v2, %v862_v32  ;;  %v6308_v35 = vmov 0.0  }
  0xd0   :  { %v821_v8 = vsel %vm6522_vm2, %v7199_v26, %v820_v31  ;;  %v876_v26 = vrot.slane %v874_v46, 5  ;;  %v886_v6 = vrot.slane %v885_v0, 4  ;;  %v890_v4 = vrot.slane %v888_v62, 5  ;;  %28 = vst.msk [vmem:[#allocation2] sm:$0xff] %vm27_vm3, %v6308_v35  ;;  %29 = vst.msk [vmem:[#allocation2 + $0x8] sm:$0xff] %vm27_vm3, %v6308_v35 }
  0xd1   :  { %v5627_v43 = vcombine.low %v807_v63, %v821_v8  ;;  %v844_v59 = vrot.slane %v843_v3, 4  ;;  %v904_v47 = vrot.slane %v902_v24, 5  ;;  %30 = vst.msk [vmem:[#allocation2 + $0x10] sm:$0xff] %vm27_vm3, %v6308_v35  ;;  %31 = vst.msk [vmem:[#allocation2 + $0xf0] sm:$0xff] %vm27_vm3, %v6308_v35 }
  0xd2   :  { %v877_v44 = vsel %vm6522_vm2, %v872_v12, %v876_v26  ;;  %v891_v1 = vsel %vm6522_vm2, %v886_v6, %v890_v4  ;;  %32 = vst.msk [vmem:[#allocation2 + $0xf8] sm:$0xff] %vm27_vm3, %v6308_v35  ;;  %33 = vst.msk [vmem:[#allocation2 + $0x100] sm:$0xff] %vm27_vm3, %v6308_v35 }
  0xd3   :  { %v849_v39 = vsel %vm6522_vm2, %v844_v59, %v848_v15  ;;  %v5629_v18 = vcombine.low %v863_v37, %v877_v44  ;;  %35 = vst.msk [vmem:[#allocation2 + $0xd8] sm:$0xff] %vm27_vm3, %v6308_v35  ;;  %36 = vst.msk [vmem:[#allocation2 + $0xe0] sm:$0xff] %vm27_vm3, %v6308_v35 }
  0xd4   :  { %1883 = vmatmul.mubr.bf16.gmra.mxu0 %v1360_v9  ;;  %v898_v9 = vrot.slane %v896_v11, 5  ;;  %v5628_v17 = vcombine.low %v835_v14, %v849_v39  ;;  %37 = vst.msk [vmem:[#allocation2 + $0xe8] sm:$0xff] %vm27_vm3, %v6308_v35  ;;  %38 = vst.msk [vmem:[#allocation2 + $0x1c8] sm:$0xff] %vm27_vm3, %v6308_v35 }
  0xd5   :  { %5939 = vmatprep.mubr.msk.bf16.mxu0 %vm27_vm3, %v5623_v41  ;;  %v5626_v41 = vcombine.low %v779_v20, %v793_v34  ;;  %39 = vst.msk [vmem:[#allocation2 + $0x1d0] sm:$0xff] %vm27_vm3, %v6308_v35  ;;  %40 = vst.msk [vmem:[#allocation2 + $0x1d8] sm:$0xff] %vm27_vm3, %v6308_v35 }
  0xd6   :  { %v899_v7 = vor.u32 %v898_v9, %v895_v40  ;;  %45 = vst.msk [vmem:[#allocation2 + $0x4f] sm:$0x1] %vm41_vm4, %v6308_v35  ;;  %65 = vst.msk [vmem:[#allocation2 + $0x58] sm:$0x1] %vm41_vm4, %v6308_v35 }
  0xd7   :  { %43 = vst.msk [vmem:[#allocation2 + $0x1f] sm:$0x1] %vm41_vm4, %v6308_v35  ;;  %44 = vst.msk [vmem:[#allocation2 + $0x37] sm:$0x1] %vm41_vm4, %v6308_v35 }
  0xd8   :  { %v900_v21 = vrot.slane %v899_v7, 4  ;;  %46 = vst.msk [vmem:[#allocation2 + $0x67] sm:$0x1] %vm41_vm4, %v6308_v35  ;;  %47 = vst.msk [vmem:[#allocation2 + $0x7f] sm:$0x1] %vm41_vm4, %v6308_v35 }
  0xd9   :  { %48 = vst.msk [vmem:[#allocation2 + $0x97] sm:$0x1] %vm41_vm4, %v6308_v35  ;;  %49 = vst.msk [vmem:[#allocation2 + $0xaf] sm:$0x1] %vm41_vm4, %v6308_v35 }
  0xda   :  { %v905_v53 = vsel %vm6522_vm2, %v900_v21, %v904_v47  ;;  %50 = vst.msk [vmem:[#allocation2 + $0xc7] sm:$0x1] %vm41_vm4, %v6308_v35  ;;  %53 = vst.msk [vmem:[#allocation2 + $0x10f] sm:$0x1] %vm41_vm4, %v6308_v35 }
  0xdb   :  { %v5630_v13 = vcombine.low %v891_v1, %v905_v53  ;;  %54 = vst.msk [vmem:[#allocation2 + $0x127] sm:$0x1] %vm41_vm4, %v6308_v35  ;;  %55 = vst.msk [vmem:[#allocation2 + $0x13f] sm:$0x1] %vm41_vm4, %v6308_v35  ;;  %v7479_v53 = vld [vmem:[%s9239_s3 + $0x1] ss:$0 sm:$0xff] }
  0xdc   :  { %5940 = vmatmul.mubr.msk.bf16.vlgmr.msra.gmra.mxu0 %vm27_vm3, %v5624_v38  ;;  %56 = vst.msk [vmem:[#allocation2 + $0x157] sm:$0x1] %vm41_vm4, %v6308_v35  ;;  %57 = vst.msk [vmem:[#allocation2 + $0x16f] sm:$0x1] %vm41_vm4, %v6308_v35  ;;  %v6107_v38 = vld [vmem:[%s9238_s4 + $0x8] sm:$0xff]  }
  0xdd   :  { %5943 = vmatprep.mubr.msk.bf16.mxu0 %vm27_vm3, %v5625_v25  ;;  %58 = vst.msk [vmem:[#allocation2 + $0x187] sm:$0x1] %vm41_vm4, %v6308_v35  ;;  %59 = vst.msk [vmem:[#allocation2 + $0x19f] sm:$0x1] %vm41_vm4, %v6308_v35  ;;  %5959 = vmatprep.subr.bf16.mxu1 %v6107_v38  ;;  %v6108_v25 = vld [vmem:[%s9238_s4] sm:$0xff]  }
  0xde   :  { %60 = vst.msk [vmem:[#allocation2 + $0x1b7] sm:$0x1] %vm41_vm4, %v6308_v35  ;;  %63 = vst.msk [vmem:[#allocation2 + $0x28] sm:$0x1] %vm41_vm4, %v6308_v35  ;;  %5960 = vmatpush3.bf16.msra.mxu1 %v6107_v38 }
  0xdf   :  { %64 = vst.msk [vmem:[#allocation2 + $0x40] sm:$0x1] %vm41_vm4, %v6308_v35  ;;  %66 = vst.msk [vmem:[#allocation2 + $0x70] sm:$0x1] %vm41_vm4, %v6308_v35  ;;  %5961 = vmatprep.subr.bf16.mxu1 %v6108_v25 }
  0xe0   :  { %67 = vst.msk [vmem:[#allocation2 + $0x88] sm:$0x1] %vm41_vm4, %v6308_v35  ;;  %68 = vst.msk [vmem:[#allocation2 + $0xa0] sm:$0x1] %vm41_vm4, %v6308_v35 }
  0xe1   :  { %69 = vst.msk [vmem:[#allocation2 + $0xb8] sm:$0x1] %vm41_vm4, %v6308_v35  ;;  %70 = vst.msk [vmem:[#allocation2 + $0xd0] sm:$0x1] %vm41_vm4, %v6308_v35 }
  0xe2   :  { %73 = vst.msk [vmem:[#allocation2 + $0x118] sm:$0x1] %vm41_vm4, %v6308_v35  ;;  %74 = vst.msk [vmem:[#allocation2 + $0x130] sm:$0x1] %vm41_vm4, %v6308_v35  ;;  %5962 = vmatpush3.bf16.msra.mxu1 %v6108_v25 }
  0xe3   :  { %75 = vst.msk [vmem:[#allocation2 + $0x148] sm:$0x1] %vm41_vm4, %v6308_v35  ;;  %76 = vst.msk [vmem:[#allocation2 + $0x160] sm:$0x1] %vm41_vm4, %v6308_v35 }
  0xe4   :  { %5944 = vmatmul.mubr.msk.bf16.gmra.mxu0 %vm27_vm3, %v5626_v41  ;;  %77 = vst.msk [vmem:[#allocation2 + $0x178] sm:$0x1] %vm41_vm4, %v6308_v35  ;;  %78 = vst.msk [vmem:[#allocation2 + $0x190] sm:$0x1] %vm41_vm4, %v6308_v35 }
  0xe5   :  { %5947 = vmatprep.mubr.msk.bf16.mxu0 %vm27_vm3, %v5627_v43  ;;  %79 = vst.msk [vmem:[#allocation2 + $0x1a8] sm:$0x1] %vm41_vm4, %v6308_v35  ;;  %80 = vst.msk [vmem:[#allocation2 + $0x1c0] sm:$0x1] %vm41_vm4, %v6308_v35 }
  0xe6   :  { %42 = vst.msk [vmem:[#allocation2 + $0x7] sm:$0x1] %vm41_vm4, %v6308_v35  ;;  %51 = vst.msk [vmem:[#allocation2 + $0xdf] sm:$0x1] %vm41_vm4, %v6308_v35 }
  0xe7   :  { %52 = vst.msk [vmem:[#allocation2 + $0xf7] sm:$0x1] %vm41_vm4, %v6308_v35  ;;  %61 = vst.msk [vmem:[#allocation2 + $0x1cf] sm:$0x1] %vm41_vm4, %v6308_v35 }
  0xe8   :  { %62 = vst.msk [vmem:[#allocation2 + $0x10] sm:$0x1] %vm41_vm4, %v6308_v35  ;;  %71 = vst.msk [vmem:[#allocation2 + $0xe8] sm:$0x1] %vm41_vm4, %v6308_v35 }
  0xe9   :  { %72 = vst.msk [vmem:[#allocation2 + $0x100] sm:$0x1] %vm41_vm4, %v6308_v35  ;;  %81 = vst.msk [vmem:[#allocation2 + $0x1d8] sm:$0x1] %vm41_vm4, %v6308_v35 }
  0xec   :  { %5948 = vmatmul.mubr.msk.bf16.gmra.mxu0 %vm27_vm3, %v5628_v17 }
  0xed   :  { %5951 = vmatprep.mubr.msk.bf16.mxu0 %vm27_vm3, %v5629_v18 }
  0xef   :  { %v2038_v35 = vld [vmem:[#allocation2 + $0xf] sm:$0x3] }
  0xf0   :  { %v2096_v25 = vmul.f32 %v7479_v53, %v2038_v35 }
  0xf4   :  { %5952 = vmatmul.mubr.msk.bf16.gmra.mxu0 %vm27_vm3, %v5630_v13  ;;  %v2037_v13 = vld [vmem:[#allocation2 + $0x7] sm:$0xff] }
 0x13c   :  { %v5783_v22 = vpop.f32.mrf.mxu0 }
 0x13e   :  { %v5784_v28 = vpop.f32.mrf.mxu0 }
 0x13f   :  { %v7418_v30 = vadd.f32 %v5784_v28, %v5783_v22  ;;  %v2095_v22 = vmul.f32 %v7479_v53, %v2037_v13  ;;  %v7490_v28 = vld [vmem:[%s9239_s3 + $0x2] ss:$0 sm:$0xff] }
 0x140   :  { %v5786_v49 = vpop.f32.mrf.mxu0  ;;  %9248 = vst [vmem:[#allocation3_spill] sm:$0xff] %v7490_v28 }
 0x142   :  { %v5787_v45 = vpop.f32.mrf.mxu0 }
 0x143   :  { %v7420_v31 = vadd.f32 %v5787_v45, %v5786_v49 }
 0x144   :  { %v5789_v27 = vpop.f32.mrf.mxu0 }
 0x146   :  { %v5790_v48 = vpop.f32.mrf.mxu0 }
 0x147   :  { %v7422_v5 = vadd.f32 %v5790_v48, %v5789_v27  ;;  %v7499_v48 = vld [vmem:[%s9239_s3] ss:$0 sm:$0xff] }
 0x148   :  { %v5792_v3 = vpop.f32.mrf.mxu0 }
 0x14a   :  { %v5793_v56 = vpop.f32.mrf.mxu0 }
 0x14b   :  { %v7424_v33 = vadd.f32 %v5793_v56, %v5792_v3  ;;  %v2160_v3 = vrot.slane %v2095_v22, 1  ;;  %v2161_v56 = vrot.slane %v2096_v25, 1 }
 0x14c   :  { %v5795_v50 = vpop.f32.mrf.mxu0 }
 0x14e   :  { %v5796_v57 = vpop.f32.mrf.mxu0 }
 0x14f   :  { %v7426_v16 = vadd.f32 %v5796_v57, %v5795_v50  ;;  %v2245_v50 = vmul.f32 %v7490_v28, %v2037_v13  ;;  %v2246_v57 = vmul.f32 %v7490_v28, %v2038_v35 }
 0x150   :  { %v5798_v60 = vpop.f32.mrf.mxu0 }
 0x152   :  { %v5799_v23 = vpop.f32.mrf.mxu0 }
 0x153   :  { %v7428_v11 = vadd.f32 %v5799_v23, %v5798_v60 }
 0x154   :  { %v5801_v20 = vpop.f32.mrf.mxu0 }
 0x156   :  { %v5802_v34 = vpop.f32.mrf.mxu0 }
 0x157   :  { %v7430_v42 = vadd.f32 %v5802_v34, %v5801_v20  ;;  %v2074_v20 = vmul.f32 %v7499_v48, %v2037_v13 }
 0x158   :  { %v5804_v19 = vpop.f32.mrf.mxu0 }
 0x15a   :  { %v5805_v63 = vpop.f32.mrf.mxu0 }
 0x15b   :  { %v7432_v8 = vadd.f32 %v5805_v63, %v5804_v19  ;;  %v2162_v19 = vsel %vm2159_vm5, %v2160_v3, %v2161_v56  ;;  %v2310_v63 = vrot.slane %v2245_v50, 2 }
 0x15c   :  { %v5807_v61 = vpop.f32.mrf.mxu0 }
 0x15e   :  { %v5808_v46 = vpop.f32.mrf.mxu0 }
 0x15f   :  { %v7434_v55 = vadd.f32 %v5808_v46, %v5807_v61  ;;  %v2311_v61 = vrot.slane %v2246_v57, 2 }
 0x160   :  { %v5810_v54 = vpop.f32.mrf.mxu0 }
 0x162   :  { %v5811_v40 = vpop.f32.mrf.mxu0 }
 0x163   :  { %v7436_v9 = vadd.f32 %v5811_v40, %v5810_v54  ;;  %v2224_v40 = vadd.f32 %v2162_v19, %v2074_v20 }
 0x164   :  { %v5813_v41 = vpop.f32.mrf.mxu0 }
 0x166   :  { %v5814_v36 = vpop.f32.mrf.mxu0 }
 0x167   :  { %v7438_v43 = vadd.f32 %v5814_v36, %v5813_v41  ;;  %v2053_v41 = vld [vmem:[#allocation2 + $0xf7] sm:$0xff]  ;;  %v2054_v36 = vld [vmem:[#allocation2 + $0xff] sm:$0x3] }
 0x168   :  { %v5816_v10 = vpop.f32.mrf.mxu0 }
 0x169   :  { %v7440_v59 = vpop.f32.mrf.mxu1 }
 0x16a   :  { %v5817_v15 = vpop.f32.mrf.mxu0 }
 0x16b   :  { %v7442_v52 = vadd.f32 %v5817_v15, %v5816_v10  ;;  %v7444_v2 = vpop.f32.mrf.mxu1  ;;  %v7516_v10 = vld [vmem:[%s9240_s2] ss:$0 sm:$0xff] }
 0x16c   :  { %v5819_v32 = vpop.f32.mrf.mxu0  ;;  %v1764_v13 = vadd.f32 %v7418_v30, %v7516_v10  ;;  %v7533_v25 = vadd.f32 %v7420_v31, %v7516_v10  ;;  %v1772_v3 = vadd.f32 %v7422_v5, %v7516_v10  ;;  %v1775_v56 = vadd.f32 %v7424_v33, %v7516_v10 }
 0x16d   :  { %v7446_v12 = vpop.f32.mrf.mxu1  ;;  %v5873_v50 = vadd.f32 %v7444_v2, %v7440_v59  ;;  %v7543_v30 = vadd.f32 %v7426_v16, %v7516_v10  ;;  %v7547_v20 = vadd.f32 %v7428_v11, %v7516_v10  ;;  %v7551_v31 = vadd.f32 %v7430_v42, %v7516_v10  ;;  %v2772_v42 = vld [vmem:[#allocation2 + $0xdf] sm:$0xff] }
 0x16e   :  { %v5820_v26 = vpop.f32.mrf.mxu0  ;;  %v7557_v33 = vadd.f32 %v7432_v8, %v7516_v10  ;;  %v1796_v59 = vadd.f32 %v7434_v55, %v7516_v10  ;;  %v1799_v11 = vadd.f32 %v7436_v9, %v7516_v10  ;;  %v1804_v8 = vadd.f32 %v7438_v43, %v7516_v10  ;;  %v7586_v43 = vld [vmem:[%s9239_s3 + $0x6] ss:$0 sm:$0xff] }
 0x16f   :  { %v7448_v58 = vadd.f32 %v5820_v26, %v5819_v32  ;;  %v7450_v0 = vpop.f32.mrf.mxu1  ;;  %v2312_v32 = vsel %vm2309_vm6, %v2310_v63, %v2311_v61  ;;  %v7569_v55 = vadd.f32 %v7442_v52, %v7516_v10  ;;  %v7591_v52 = vld [vmem:[%s9239_s3 + $0x7] ss:$0 sm:$0xff] }
 0x170   :  { %v5822_v7 = vpop.f32.mrf.mxu0  ;;  %v7529_v22 = vadd.f32 %v2312_v32, %v2224_v40  ;;  %v5876_v5 = vadd.f32 %v7450_v0, %v7446_v12  ;;  %v2773_v40 = vld [vmem:[#allocation2 + $0xe7] sm:$0x3]  ;;  %v2261_v32 = vmul.f32 %v7490_v28, %v2053_v41  ;;  %v2262_v12 = vmul.f32 %v7490_v28, %v2054_v36 }
 0x171   :  { %v7452_v39 = vpop.f32.mrf.mxu1  ;;  %v7573_v9 = vadd.f32 %v5873_v50, %v1796_v59 }
 0x172   :  { %v5823_v14 = vpop.f32.mrf.mxu0  ;;  %9249 = vst [vmem:[#allocation4_spill] sm:$0xff] %v7529_v22 }
 0x173   :  { %v7454_v62 = vadd.f32 %v5823_v14, %v5822_v7  ;;  %v7460_v44 = vpop.f32.mrf.mxu1  ;;  %v2111_v7 = vmul.f32 %v7479_v53, %v2053_v41  ;;  %v2112_v14 = vmul.f32 %v7479_v53, %v2054_v36  ;;  %9250 = vst [vmem:[#allocation5_spill] sm:$0xff] %v7573_v9  ;;  %v7581_v36 = vadd.f32 %v5876_v5, %v1799_v11  ;;  %v7604_v11 = vld [vmem:[%s9239_s3 + $0x8] ss:$0 sm:$0xff] }
 0x174   :  { %v7456_v24 = vpop.f32.mrf.mxu0  ;;  %v5879_v0 = vadd.f32 %v7460_v44, %v7452_v39  ;;  %v2082_v39 = vmul.f32 %v7499_v48, %v2053_v41  ;;  %v2334_v41 = vrot.slane %v2261_v32, 2  ;;  %v2995_v28 = vmul.f32 %v7604_v11, %v2772_v42 }
 0x175   :  { %v7466_v18 = vpop.f32.mrf.mxu1  ;;  %v2184_v2 = vrot.slane %v2111_v7, 1  ;;  %v2185_v19 = vrot.slane %v2112_v14, 1  ;;  %9251 = vst [vmem:[#allocation6_spill] sm:$0xff] %v7581_v36  ;;  %v2335_v36 = vrot.slane %v2262_v12, 2 }
 0x176   :  { %v7458_v37 = vpop.f32.mrf.mxu0  ;;  %v7608_v22 = vadd.f32 %v5879_v0, %v1804_v8 }
 0x177   :  { %v7472_v47 = vpop.f32.mrf.mxu1  ;;  %v2186_v14 = vsel %vm2159_vm5, %v2184_v2, %v2185_v19  ;;  %v2996_v2 = vmul.f32 %v7604_v11, %v2773_v40 }
 0x178   :  { %v7462_v17 = vpop.f32.mrf.mxu0  ;;  %9253 = vst [vmem:[#allocation8_spill] sm:$0xff] %v7608_v22  ;;  %v2232_v19 = vadd.f32 %v2186_v14, %v2082_v39  ;;  %v5882_v32 = vadd.f32 %v7472_v47, %v7466_v18 }
 0x179   :  { %v7483_v29 = vpop.f32.mrf.mxu1  ;;  %v3067_v18 = vrot.slane %v2996_v2, 2 }
 0x17a   :  { %v7464_v6 = vpop.f32.mrf.mxu0 }
 0x17b   :  { %v7492_v45 = vpop.f32.mrf.mxu1 }
 0x17c   :  { %v7468_v4 = vpop.f32.mrf.mxu0 }
 0x17d   :  { %v7503_v23 = vpop.f32.mrf.mxu1 }
 0x17e   :  { %v7470_v21 = vpop.f32.mrf.mxu0 }
 0x17f   :  { %v7511_v54 = vpop.f32.mrf.mxu1 }
 0x180   :  { %v7474_v1 = vpop.f32.mrf.mxu0  ;;  %v5888_v47 = vadd.f32 %v7511_v54, %v7503_v23 }
 0x181   :  { %v7527_v35 = vpop.f32.mrf.mxu1 }
 0x182   :  { %v7481_v51 = vpop.f32.mrf.mxu0 }
 0x183   :  { %v5890_v63 = vpop.f32.mrf.mxu1 }
 0x184   :  { %v5853_v38 = vpop.f32.mrf.mxu0 }
 0x185   :  { %v5892_v50 = vpop.f32.mrf.mxu1 }
 0x186   :  { %v5854_v49 = vpop.f32.mrf.mxu0 }
 0x187   :  { %v5855_v61 = vadd.f32 %v5854_v49, %v5853_v38  ;;  %v7577_v38 = vadd.f32 %v7448_v58, %v7516_v10  ;;  %v5849_v49 = vadd.f32 %v7470_v21, %v7468_v4  ;;  %v7595_v58 = vmul.f32 %v7586_v43, %v2772_v42  ;;  %v5893_v0 = vpop.f32.mrf.mxu1 }
 0x188   :  { %v7494_v27 = vpop.f32.mrf.mxu0  ;;  %v2846_v4 = vmul.f32 %v7591_v52, %v2772_v42  ;;  %v2847_v21 = vmul.f32 %v7591_v52, %v2773_v40 }
 0x189   :  { %9252 = vst [vmem:[#allocation7_spill] sm:$0xff] %v7595_v58  ;;  %v1869_v59 = vadd.f32 %v5855_v61, %v1772_v3  ;;  %v1815_v58 = vadd.f32 %v7454_v62, %v7516_v10  ;;  %v1861_v3 = vadd.f32 %v5849_v49, %v1764_v13  ;;  %v5827_v61 = vadd.f32 %v7458_v37, %v7456_v24 }
 0x18a   :  { %v5857_v60 = vpop.f32.mrf.mxu0  ;;  %v2917_v12 = vrot.slane %v2846_v4, 1  ;;  %v2918_v8 = vrot.slane %v2847_v21, 1  ;;  %v5885_v24 = vadd.f32 %v7492_v45, %v7483_v29  ;;  %v3066_v13 = vrot.slane %v2995_v28, 2 }
 0x18b   :  { %v5858_v5 = vadd.f32 %v5857_v60, %v7494_v27  ;;  %v5852_v27 = vadd.f32 %v7481_v51, %v7474_v1  ;;  %v2336_v1 = vsel %vm2309_vm6, %v2334_v41, %v2335_v36  ;;  %v5830_v51 = vadd.f32 %v7464_v6, %v7462_v17 }
 0x18c   :  { %v7506_v34 = vpop.f32.mrf.mxu0  ;;  %v5894_v17 = vadd.f32 %v5893_v0, %v5892_v50  ;;  %v1820_v45 = vadd.f32 %v5827_v61, %v7516_v10 }
 0x18d   :  { %v1872_v40 = vadd.f32 %v5858_v5, %v1775_v56  ;;  %v1823_v54 = vadd.f32 %v5830_v51, %v7516_v10 }
 0x18e   :  { %v7509_v46 = vpop.f32.mrf.mxu0 }
 0x18f   :  { %v7663_v4 = vadd.f32 %v5894_v17, %v1823_v54 }
 0x190   :  { %v7518_v15 = vpop.f32.mrf.mxu0 }
 0x192   :  { %v7521_v26 = vpop.f32.mrf.mxu0 }
 0x193   :  { %v5864_v6 = vadd.f32 %v7521_v26, %v7518_v15  ;;  %v7644_v15 = vsel %vm2309_vm6, %v3066_v13, %v3067_v18  ;;  %v7646_v26 = vadd.f32 %v2336_v1, %v2232_v19 }
 0x194   :  { %v5865_v57 = vpop.f32.mrf.mxu0 }
 0x195   :  { %v1880_v39 = vadd.f32 %v5864_v6, %v7547_v20 }
 0x196   :  { %v5866_v16 = vpop.f32.mrf.mxu0 }
 0x197   :  { %v5867_v22 = vadd.f32 %v5866_v16, %v5865_v57  ;;  %v5861_v57 = vadd.f32 %v7509_v46, %v7506_v34  ;;  %v1864_v16 = vadd.f32 %v5852_v27, %v7533_v25  ;;  %v7637_v46 = vsel %vm2159_vm5, %v2917_v12, %v2918_v8  ;;  %v9254_v8 = vld [vmem:[#allocation3_spill] sm:$0xff] }
 0x198   :  { %v5868_v7 = vpop.f32.mrf.mxu0 }
 0x199   :  { %v1885_v34 = vadd.f32 %v5867_v22, %v7551_v31  ;;  %v7651_v22 = vadd.f32 %v5885_v24, %v7577_v38  ;;  %v7653_v31 = vadd.f32 %v5888_v47, %v1815_v58 }
 0x19a   :  { %v5869_v44 = vpop.f32.mrf.mxu0 }
 0x19b   :  { %v5870_v29 = vadd.f32 %v5869_v44, %v5868_v7  ;;  %v1877_v7 = vadd.f32 %v5861_v57, %v7543_v30 }
 0x19c   :  { %v5941_v9 = vpop.f32.mrf.mxu0 }
 0x19d   :  { %v1966_v60 = vadd.f32 %v5941_v9, %v1869_v59  ;;  %v5891_v9 = vadd.f32 %v5890_v63, %v7527_v35  ;;  %v7641_v35 = vadd.f32 %v5882_v32, %v7569_v55  ;;  %v1888_v36 = vadd.f32 %v5870_v29, %v7557_v33  ;;  %v7699_v32 = vld [vmem:[%s9239_s3 + $0x3] ss:$0 sm:$0xff] }
 0x19e   :  { %v1957_v62 = vpop.f32.mrf.mxu0 }
 0x19f   :  { %2023 = vst.msk [vmem:[#allocation2 + $0x50] sm:$0xff] %vm27_vm3, %v1966_v60  ;;  %v1958_v42 = vadd.f32 %v1957_v62, %v1861_v3  ;;  %v7661_v44 = vadd.f32 %v5891_v9, %v1820_v45  ;;  %v7704_v62 = vld [vmem:[%s9239_s3 + $0x4] ss:$0 sm:$0xff]  ;;  %v9255_v9 = vld [vmem:[#allocation4_spill] sm:$0xff] }
 0x1a0   :  { %v5942_v37 = vpop.f32.mrf.mxu0 }
 0x1a1   :  { %2021 = vst.msk [vmem:[#allocation2 + $0x20] sm:$0xff] %vm27_vm3, %v1958_v42  ;;  %v1969_v56 = vadd.f32 %v5942_v37, %v1872_v40 }
 0x1a2   :  { %v1960_v28 = vpop.f32.mrf.mxu0 }
 0x1a3   :  { %2024 = vst.msk [vmem:[#allocation2 + $0x68] sm:$0xff] %vm27_vm3, %v1969_v56  ;;  %v1961_v23 = vadd.f32 %v1960_v28, %v1864_v16  ;;  %v9256_v28 = vld [vmem:[#allocation8_spill] sm:$0xff] }
 0x1a4   :  { %v5945_v25 = vpop.f32.mrf.mxu0 }
 0x1a5   :  { %2022 = vst.msk [vmem:[#allocation2 + $0x38] sm:$0xff] %vm27_vm3, %v1961_v23  ;;  %v1982_v63 = vadd.f32 %v5945_v25, %v1885_v34 }
 0x1a6   :  { %v7655_v10 = vld [vmem:[#allocation2 + $0x4f] sm:$0xff]  ;;  %v7657_v49 = vld [vmem:[#allocation2 + $0x57] sm:$0x3]  ;;  %v1973_v55 = vpop.f32.mrf.mxu0 }
 0x1a7   :  { %v7667_v30 = vmul.f32 %v7479_v53, %v7657_v49  ;;  %2027 = vst.msk [vmem:[#allocation2 + $0xb0] sm:$0xff] %vm27_vm3, %v1982_v63  ;;  %v1974_v38 = vadd.f32 %v1973_v55, %v1877_v7  ;;  %v2761_v58 = vld [vmem:[#allocation2 + $0x57] sm:$0x3]  ;;  %v7672_v21 = vmul.f32 %v7586_v43, %v7655_v10  ;;  %v7676_v33 = vmul.f32 %v7591_v52, %v7655_v10 }
 0x1a8   :  { %v5946_v20 = vpop.f32.mrf.mxu0  ;;  %v2039_v14 = vld [vmem:[#allocation2 + $0x1f] sm:$0xff]  ;;  %v2040_v50 = vld [vmem:[#allocation2 + $0x27] sm:$0x3]  ;;  %v7679_v59 = vmul.f32 %v7591_v52, %v2761_v58  ;;  %v7683_v41 = vmul.f32 %v7604_v11, %v7655_v10  ;;  %v7686_v2 = vmul.f32 %v7604_v11, %v2761_v58  ;;  %v7690_v27 = vmul.f32 %v7499_v48, %v7655_v10 }
 0x1a9   :  { %v2391_v5 = vld [vmem:[#allocation2 + $0x27] sm:$0x3]  ;;  %2025 = vst.msk [vmem:[#allocation2 + $0x80] sm:$0xff] %vm27_vm3, %v1974_v38  ;;  %v1985_v60 = vadd.f32 %v5946_v20, %v1888_v36  ;;  %v2075_v3 = vmul.f32 %v7499_v48, %v2039_v14  ;;  %v2097_v19 = vmul.f32 %v7479_v53, %v2039_v14  ;;  %v2098_v61 = vmul.f32 %v7479_v53, %v2040_v50  ;;  %v9257_v38 = vld [vmem:[#allocation5_spill] sm:$0xff] }
 0x1aa   :  { %v1976_v12 = vpop.f32.mrf.mxu0  ;;  %v2247_v0 = vmul.f32 %v9254_v8, %v2039_v14  ;;  %v2248_v42 = vmul.f32 %v9254_v8, %v2040_v50  ;;  %v2427_v40 = vmul.f32 %v7699_v32, %v2039_v14  ;;  %v2464_v1 = vmul.f32 %v7704_v62, %v2039_v14 }
 0x1ab   :  { %2028 = vst.msk [vmem:[#allocation2 + $0xc8] sm:$0xff] %vm27_vm3, %v1985_v60  ;;  %v1977_v51 = vadd.f32 %v1976_v12, %v1880_v39  ;;  %v2163_v24 = vrot.slane %v2097_v19, 1  ;;  %v2164_v37 = vrot.slane %v2098_v61, 1  ;;  %v2465_v13 = vmul.f32 %v7704_v62, %v2391_v5  ;;  %v7733_v39 = vld [vmem:[%s9239_s3 + $0x5] ss:$0 sm:$0xff] }
 0x1ac   :  { %v7712_v18 = vld [vmem:[#allocation2 + $0x37] sm:$0xff]  ;;  %v7714_v47 = vld [vmem:[#allocation2 + $0x3f] sm:$0x3]  ;;  %v5949_v57 = vpop.f32.mrf.mxu0  ;;  %v2313_v56 = vrot.slane %v2247_v0, 2  ;;  %v2314_v16 = vrot.slane %v2248_v42, 2  ;;  %v2443_v17 = vadd.f32 %v2427_v40, %v9255_v9  ;;  %v2528_v6 = vrot.slane %v2464_v1, 1 }
 0x1ad   :  { %v7719_v29 = vmul.f32 %v7479_v53, %v7714_v47  ;;  %2026 = vst.msk [vmem:[#allocation2 + $0x98] sm:$0xff] %vm27_vm3, %v1977_v51  ;;  %v1998_v45 = vadd.f32 %v5949_v57, %v9256_v28  ;;  %v2165_v23 = vsel %vm2159_vm5, %v2163_v24, %v2164_v37  ;;  %v2393_v34 = vld [vmem:[#allocation2 + $0x3f] sm:$0x3]  ;;  %v2428_v54 = vmul.f32 %v7699_v32, %v7712_v18 }
 0x1ae   :  { %v1989_v25 = vpop.f32.mrf.mxu0  ;;  %v2225_v63 = vadd.f32 %v2165_v23, %v2075_v3  ;;  %v2315_v7 = vsel %vm2309_vm6, %v2313_v56, %v2314_v16  ;;  %v2466_v55 = vmul.f32 %v7704_v62, %v7712_v18  ;;  %v2467_v36 = vmul.f32 %v7704_v62, %v2393_v34  ;;  %v2759_v24 = vld [vmem:[#allocation2 + $0x3f] sm:$0x3] }
 0x1af   :  { %2031 = vst.msk [vmem:[#allocation2 + $0x140] sm:$0xff] %vm27_vm3, %v1998_v45  ;;  %v1990_v58 = vadd.f32 %v1989_v25, %v9257_v38  ;;  %v2529_v20 = vrot.slane %v2465_v13, 1  ;;  %v2613_v50 = vmul.f32 %v7733_v39, %v2039_v14  ;;  %v2614_v60 = vmul.f32 %v7733_v39, %v2391_v5  ;;  %v9258_v56 = vld [vmem:[#allocation6_spill] sm:$0xff] }
 0x1b0   :  { %v5950_v3 = vpop.f32.mrf.mxu0  ;;  %v2375_v19 = vadd.f32 %v2315_v7, %v2225_v63  ;;  %v2531_v61 = vrot.slane %v2466_v55, 1  ;;  %v2532_v12 = vrot.slane %v2467_v36, 1  ;;  %v2615_v0 = vmul.f32 %v7733_v39, %v7712_v18 }
 0x1b1   :  { %2029 = vst.msk [vmem:[#allocation2 + $0x110] sm:$0xff] %vm27_vm3, %v1990_v58  ;;  %v2001_v42 = vadd.f32 %v5950_v3, %v7641_v35  ;;  %v2530_v40 = vsel %vm2159_vm5, %v2528_v6, %v2529_v20  ;;  %v2616_v1 = vmul.f32 %v7733_v39, %v2393_v34  ;;  %v2677_v51 = vrot.slane %v2613_v50, 2 }
 0x1b2   :  { %v1992_v14 = vpop.f32.mrf.mxu0  ;;  %v2444_v37 = vadd.f32 %v2428_v54, %v2375_v19  ;;  %v2533_v5 = vsel %vm2159_vm5, %v2531_v61, %v2532_v12  ;;  %v2592_v13 = vadd.f32 %v2530_v40, %v2443_v17  ;;  %v2678_v57 = vrot.slane %v2614_v60, 2 }
 0x1b3   :  { %2032 = vst.msk [vmem:[#allocation2 + $0x158] sm:$0xff] %vm27_vm3, %v2001_v42  ;;  %v1993_v16 = vadd.f32 %v1992_v14, %v9258_v56  ;;  %v2680_v9 = vrot.slane %v2615_v0, 2  ;;  %v2681_v28 = vrot.slane %v2616_v1, 2  ;;  %v2795_v35 = vmul.f32 %v7586_v43, %v7712_v18 }
 0x1b4   :  { %v5953_v6 = vpop.f32.mrf.mxu0  ;;  %v2593_v45 = vadd.f32 %v2533_v5, %v2444_v37  ;;  %v2679_v23 = vsel %vm2309_vm6, %v2677_v51, %v2678_v57  ;;  %v2832_v34 = vmul.f32 %v7591_v52, %v7712_v18  ;;  %v2833_v54 = vmul.f32 %v7591_v52, %v2759_v24 }
 0x1b5   :  { %2030 = vst.msk [vmem:[#allocation2 + $0x128] sm:$0xff] %vm27_vm3, %v1993_v16  ;;  %v2014_v17 = vadd.f32 %v5953_v6, %v7661_v44  ;;  %v2682_v25 = vsel %vm2309_vm6, %v2680_v9, %v2681_v28  ;;  %v2741_v63 = vadd.f32 %v2679_v23, %v2592_v13  ;;  %v2899_v7 = vrot.slane %v7676_v33, 1  ;;  %v7788_v6 = vld [vmem:[#allocation2 + $0x67] sm:$0xff] }
 0x1b6   :  { %v2005_v55 = vpop.f32.mrf.mxu0  ;;  %v2742_v36 = vadd.f32 %v2682_v25, %v2593_v45  ;;  %v2896_v38 = vrot.slane %v2832_v34, 1  ;;  %v2897_v58 = vrot.slane %v2833_v54, 1  ;;  %v2900_v20 = vrot.slane %v7679_v59, 1  ;;  %v2397_v34 = vld [vmem:[#allocation2 + $0x6f] sm:$0x3] }
 0x1b7   :  { %2035 = vst.msk [vmem:[#allocation2 + $0x1a0] sm:$0xff] %vm27_vm3, %v2014_v17  ;;  %v2006_v50 = vadd.f32 %v2005_v55, %v7651_v22  ;;  %v2811_v60 = vadd.f32 %v2795_v35, %v2741_v63  ;;  %v2981_v3 = vmul.f32 %v7604_v11, %v7712_v18  ;;  %v2982_v44 = vmul.f32 %v7604_v11, %v2759_v24  ;;  %v2395_v35 = vld [vmem:[#allocation2 + $0x57] sm:$0x3] }
 0x1b8   :  { %v5954_v19 = vpop.f32.mrf.mxu0  ;;  %v2812_v61 = vadd.f32 %v7672_v21, %v2742_v36  ;;  %v2898_v33 = vsel %vm2159_vm5, %v2896_v38, %v2897_v58  ;;  %v2901_v12 = vsel %vm2159_vm5, %v2899_v7, %v2900_v20  ;;  %v3048_v0 = vrot.slane %v7683_v41, 2 }
 0x1b9   :  { %2033 = vst.msk [vmem:[#allocation2 + $0x170] sm:$0xff] %vm27_vm3, %v2006_v50  ;;  %v2017_v59 = vadd.f32 %v5954_v19, %v7663_v4  ;;  %v2960_v22 = vadd.f32 %v2898_v33, %v2811_v60  ;;  %v3045_v42 = vrot.slane %v2981_v3, 2  ;;  %v3046_v40 = vrot.slane %v2982_v44, 2 }
 0x1ba   :  { %v2008_v1 = vpop.f32.mrf.mxu0  ;;  %v2961_v51 = vadd.f32 %v2901_v12, %v2812_v61  ;;  %v3049_v24 = vrot.slane %v7686_v2, 2  ;;  %v2076_v21 = vmul.f32 %v7499_v48, %v7712_v18  ;;  %v2099_v14 = vmul.f32 %v7479_v53, %v7712_v18 }
 0x1bb   :  { %2036 = vst.msk [vmem:[#allocation2 + $0x1b8] sm:$0xff] %vm27_vm3, %v2017_v59  ;;  %v2009_v41 = vadd.f32 %v2008_v1, %v7653_v31  ;;  %v3047_v37 = vsel %vm2309_vm6, %v3045_v42, %v3046_v40  ;;  %v2101_v4 = vmul.f32 %v7479_v53, %v7655_v10  ;;  %v2167_v5 = vrot.slane %v7719_v29, 1 }
 0x1bc   :  { %v3050_v13 = vsel %vm2309_vm6, %v3048_v0, %v3049_v24  ;;  %v3109_v2 = vadd.f32 %v3047_v37, %v2960_v22  ;;  %v2166_v57 = vrot.slane %v2099_v14, 1  ;;  %v2170_v56 = vrot.slane %v7667_v30, 1  ;;  %v7817_v24 = vld [vmem:[#allocation2 + $0x7f] sm:$0xff]  ;;  %v2765_v37 = vld [vmem:[#allocation2 + $0x87] sm:$0x3] }
 0x1bd   :  { %2034 = vst.msk [vmem:[#allocation2 + $0x188] sm:$0xff] %vm27_vm3, %v2009_v41  ;;  %v3110_v16 = vadd.f32 %v3050_v13, %v2961_v51  ;;  %v2169_v9 = vrot.slane %v2101_v4, 1  ;;  %v2249_v31 = vmul.f32 %v9254_v8, %v7712_v18  ;;  %v2250_v28 = vmul.f32 %v9254_v8, %v7714_v47  ;;  %v2763_v51 = vld [vmem:[#allocation2 + $0x6f] sm:$0x3] }
 0x1be   :  { %v2168_v29 = vsel %vm2159_vm5, %v2166_v57, %v2167_v5  ;;  %v2251_v45 = vmul.f32 %v9254_v8, %v7655_v10  ;;  %v2252_v30 = vmul.f32 %v9254_v8, %v7657_v49  ;;  %v2429_v23 = vmul.f32 %v7699_v32, %v7655_v10 }
 0x1bf   :  { %v3125_v54 = vpack.c.bf16 %v3110_v16, %v3109_v2  ;;  %v2171_v18 = vsel %vm2159_vm5, %v2169_v9, %v2170_v56  ;;  %v2226_v17 = vadd.f32 %v2168_v29, %v2076_v21  ;;  %v2316_v47 = vrot.slane %v2249_v31, 2 }
 0x1c0   :  { %v2227_v25 = vadd.f32 %v2171_v18, %v7690_v27  ;;  %v2317_v63 = vrot.slane %v2250_v28, 2  ;;  %v2319_v7 = vrot.slane %v2251_v45, 2  ;;  %v2320_v55 = vrot.slane %v2252_v30, 2 }
 0x1c1   :  { %5963 = vmatprep.mubr.msk.bf16.mxu1 %vm27_vm3, %v3125_v54  ;;  %v2430_v36 = vmul.f32 %v7699_v32, %v7788_v6  ;;  %v2468_v49 = vmul.f32 %v7704_v62, %v7655_v10  ;;  %v2469_v38 = vmul.f32 %v7704_v62, %v2395_v35  ;;  %v2470_v58 = vmul.f32 %v7704_v62, %v7788_v6 }
 0x1c2   :  { %v2318_v20 = vsel %vm2309_vm6, %v2316_v47, %v2317_v63  ;;  %v2321_v27 = vsel %vm2309_vm6, %v2319_v7, %v2320_v55  ;;  %v2471_v50 = vmul.f32 %v7704_v62, %v2397_v34  ;;  %v2617_v60 = vmul.f32 %v7733_v39, %v7655_v10 }
 0x1c3   :  { %v2376_v3 = vadd.f32 %v2318_v20, %v2226_v17  ;;  %v2377_v44 = vadd.f32 %v2321_v27, %v2227_v25  ;;  %v2534_v19 = vrot.slane %v2468_v49, 1  ;;  %v2535_v61 = vrot.slane %v2469_v38, 1  ;;  %v2048_v27 = vld [vmem:[#allocation2 + $0x87] sm:$0x3] }
 0x1c4   :  { %v2537_v33 = vrot.slane %v2470_v58, 1  ;;  %v2538_v12 = vrot.slane %v2471_v50, 1  ;;  %v2618_v0 = vmul.f32 %v7733_v39, %v2395_v35  ;;  %v2619_v59 = vmul.f32 %v7733_v39, %v7788_v6 }
 0x1c5   :  { %v2445_v22 = vadd.f32 %v2429_v23, %v2376_v3  ;;  %v2446_v42 = vadd.f32 %v2430_v36, %v2377_v44  ;;  %v2536_v40 = vsel %vm2159_vm5, %v2534_v19, %v2535_v61  ;;  %v2620_v1 = vmul.f32 %v7733_v39, %v2397_v34  ;;  %v2046_v36 = vld [vmem:[#allocation2 + $0x6f] sm:$0x3] }
 0x1c6   :  { %v2539_v10 = vsel %vm2159_vm5, %v2537_v33, %v2538_v12  ;;  %v2683_v21 = vrot.slane %v2617_v60, 2  ;;  %v2684_v14 = vrot.slane %v2618_v0, 2  ;;  %v2686_v41 = vrot.slane %v2619_v59, 2 }
 0x1c7   :  { %v2594_v4 = vadd.f32 %v2536_v40, %v2445_v22  ;;  %v2595_v5 = vadd.f32 %v2539_v10, %v2446_v42  ;;  %v2687_v13 = vrot.slane %v2620_v1, 2  ;;  %v2797_v2 = vmul.f32 %v7586_v43, %v7788_v6 }
 0x1c8   :  { %v2685_v57 = vsel %vm2309_vm6, %v2683_v21, %v2684_v14  ;;  %v2798_v56 = vmul.f32 %v7586_v43, %v7817_v24  ;;  %v2836_v16 = vmul.f32 %v7591_v52, %v7788_v6  ;;  %v2837_v9 = vmul.f32 %v7591_v52, %v2763_v51 }
 0x1c9   :  { %v2688_v31 = vsel %vm2309_vm6, %v2686_v41, %v2687_v13  ;;  %v2743_v28 = vadd.f32 %v2685_v57, %v2594_v4  ;;  %v2838_v35 = vmul.f32 %v7591_v52, %v7817_v24  ;;  %v2839_v29 = vmul.f32 %v7591_v52, %v2765_v37  ;;  %v7857_v4 = vld [vmem:[#allocation2 + $0x97] sm:$0xff] }
 0x1ca   :  { %v2744_v45 = vadd.f32 %v2688_v31, %v2595_v5  ;;  %v2902_v30 = vrot.slane %v2836_v16, 1  ;;  %v2903_v23 = vrot.slane %v2837_v9, 1  ;;  %v2985_v34 = vmul.f32 %v7604_v11, %v7788_v6 }
 0x1cb   :  { %v2813_v54 = vadd.f32 %v2797_v2, %v2743_v28  ;;  %v2905_v18 = vrot.slane %v2838_v35, 1  ;;  %v2906_v17 = vrot.slane %v2839_v29, 1  ;;  %v2986_v47 = vmul.f32 %v7604_v11, %v2763_v51  ;;  %v2401_v28 = vld [vmem:[#allocation2 + $0x9f] sm:$0x3] }
 0x1cc   :  { %v2814_v25 = vadd.f32 %v2798_v56, %v2744_v45  ;;  %v2904_v63 = vsel %vm2159_vm5, %v2902_v30, %v2903_v23  ;;  %v2987_v7 = vmul.f32 %v7604_v11, %v7817_v24  ;;  %v2988_v55 = vmul.f32 %v7604_v11, %v2765_v37  ;;  %v2399_v56 = vld [vmem:[#allocation2 + $0x87] sm:$0x3] }
 0x1cd   :  { %v2907_v49 = vsel %vm2159_vm5, %v2905_v18, %v2906_v17  ;;  %v2962_v38 = vadd.f32 %v2904_v63, %v2813_v54  ;;  %v3051_v58 = vrot.slane %v2985_v34, 2  ;;  %v3052_v20 = vrot.slane %v2986_v47, 2 }
 0x1ce   :  { %v2963_v50 = vadd.f32 %v2907_v49, %v2814_v25  ;;  %v3054_v60 = vrot.slane %v2987_v7, 2  ;;  %v3055_v3 = vrot.slane %v2988_v55, 2  ;;  %v2078_v44 = vmul.f32 %v7499_v48, %v7788_v6 }
 0x1cf   :  { %v3053_v19 = vsel %vm2309_vm6, %v3051_v58, %v3052_v20  ;;  %v2079_v61 = vmul.f32 %v7499_v48, %v7817_v24  ;;  %v2103_v33 = vmul.f32 %v7479_v53, %v7788_v6  ;;  %v2104_v12 = vmul.f32 %v7479_v53, %v2046_v36 }
 0x1d0   :  { %v3056_v0 = vsel %vm2309_vm6, %v3054_v60, %v3055_v3  ;;  %v3111_v59 = vadd.f32 %v3053_v19, %v2962_v38  ;;  %v2105_v22 = vmul.f32 %v7479_v53, %v7817_v24  ;;  %v2106_v42 = vmul.f32 %v7479_v53, %v2048_v27 }
 0x1d1   :  { %v3112_v40 = vadd.f32 %v3056_v0, %v2963_v50  ;;  %v2172_v1 = vrot.slane %v2103_v33, 1  ;;  %v2173_v51 = vrot.slane %v2104_v12, 1  ;;  %v2253_v10 = vmul.f32 %v9254_v8, %v7788_v6  ;;  %v7880_v50 = vld [vmem:[#allocation2 + $0xaf] sm:$0xff] }
 0x1d2   :  { %v2175_v21 = vrot.slane %v2105_v22, 1  ;;  %v2176_v14 = vrot.slane %v2106_v42, 1  ;;  %v2254_v41 = vmul.f32 %v9254_v8, %v2046_v36  ;;  %v2255_v37 = vmul.f32 %v9254_v8, %v7817_v24 }
 0x1d3   :  { %v3126_v5 = vpack.c.bf16 %v3112_v40, %v3111_v59  ;;  %v2174_v13 = vsel %vm2159_vm5, %v2172_v1, %v2173_v51  ;;  %v2256_v2 = vmul.f32 %v9254_v8, %v2048_v27  ;;  %v2322_v57 = vrot.slane %v2253_v10, 2  ;;  %v2769_v59 = vld [vmem:[#allocation2 + $0xb7] sm:$0x3] }
 0x1d4   :  { %v2177_v16 = vsel %vm2159_vm5, %v2175_v21, %v2176_v14  ;;  %v2228_v9 = vadd.f32 %v2174_v13, %v2078_v44  ;;  %v2323_v6 = vrot.slane %v2254_v41, 2  ;;  %v2325_v31 = vrot.slane %v2255_v37, 2 }
 0x1d5   :  { %5964 = vmatmul.mubr.msk.bf16.vlgmr.msra.gmra.mxu1 %vm27_vm3, %v3126_v5  ;;  %v2229_v35 = vadd.f32 %v2177_v16, %v2079_v61  ;;  %v2326_v29 = vrot.slane %v2256_v2, 2  ;;  %v2431_v45 = vmul.f32 %v7699_v32, %v7817_v24  ;;  %v2432_v30 = vmul.f32 %v7699_v32, %v7857_v4 }
 0x1d6   :  { %v2324_v23 = vsel %vm2309_vm6, %v2322_v57, %v2323_v6  ;;  %v2472_v34 = vmul.f32 %v7704_v62, %v7817_v24  ;;  %v2473_v54 = vmul.f32 %v7704_v62, %v2399_v56  ;;  %v2474_v18 = vmul.f32 %v7704_v62, %v7857_v4 }
 0x1d7   :  { %v2327_v17 = vsel %vm2309_vm6, %v2325_v31, %v2326_v29  ;;  %v2378_v47 = vadd.f32 %v2324_v23, %v2228_v9  ;;  %v2475_v25 = vmul.f32 %v7704_v62, %v2401_v28  ;;  %v2621_v63 = vmul.f32 %v7733_v39, %v7817_v24  ;;  %v2767_v24 = vld [vmem:[#allocation2 + $0x9f] sm:$0x3] }
 0x1d8   :  { %v2379_v7 = vadd.f32 %v2327_v17, %v2229_v35  ;;  %v2540_v55 = vrot.slane %v2472_v34, 1  ;;  %v2541_v36 = vrot.slane %v2473_v54, 1  ;;  %v2543_v49 = vrot.slane %v2474_v18, 1  ;;  %v2050_v23 = vld [vmem:[#allocation2 + $0x9f] sm:$0x3] }
 0x1d9   :  { %v2447_v38 = vadd.f32 %v2431_v45, %v2378_v47  ;;  %v2544_v58 = vrot.slane %v2475_v25, 1  ;;  %v2622_v20 = vmul.f32 %v7733_v39, %v2399_v56  ;;  %v2623_v27 = vmul.f32 %v7733_v39, %v7857_v4  ;;  %v2052_v47 = vld [vmem:[#allocation2 + $0xb7] sm:$0x3] }
 0x1da   :  { %v2448_v60 = vadd.f32 %v2432_v30, %v2379_v7  ;;  %v2542_v3 = vsel %vm2159_vm5, %v2540_v55, %v2541_v36  ;;  %v2624_v44 = vmul.f32 %v7733_v39, %v2401_v28  ;;  %v2689_v19 = vrot.slane %v2621_v63, 2 }
 0x1db   :  { %v2545_v61 = vsel %vm2159_vm5, %v2543_v49, %v2544_v58  ;;  %v2596_v33 = vadd.f32 %v2542_v3, %v2447_v38  ;;  %v2690_v12 = vrot.slane %v2622_v20, 2  ;;  %v2692_v0 = vrot.slane %v2623_v27, 2 }
 0x1dc   :  { %v2597_v22 = vadd.f32 %v2545_v61, %v2448_v60  ;;  %v2693_v42 = vrot.slane %v2624_v44, 2  ;;  %v2799_v40 = vmul.f32 %v7586_v43, %v7857_v4  ;;  %v2800_v1 = vmul.f32 %v7586_v43, %v7880_v50 }
 0x1dd   :  { %v2691_v51 = vsel %vm2309_vm6, %v2689_v19, %v2690_v12  ;;  %v2840_v10 = vmul.f32 %v7591_v52, %v7857_v4  ;;  %v2841_v21 = vmul.f32 %v7591_v52, %v2767_v24  ;;  %v2842_v14 = vmul.f32 %v7591_v52, %v7880_v50 }
 0x1de   :  { %v2694_v41 = vsel %vm2309_vm6, %v2692_v0, %v2693_v42  ;;  %v2745_v37 = vadd.f32 %v2691_v51, %v2596_v33  ;;  %v2843_v5 = vmul.f32 %v7591_v52, %v2769_v59  ;;  %v2989_v13 = vmul.f32 %v7604_v11, %v7857_v4  ;;  %v2403_v51 = vld [vmem:[#allocation2 + $0xb7] sm:$0x3] }
 0x1df   :  { %v2746_v2 = vadd.f32 %v2694_v41, %v2597_v22  ;;  %v2908_v57 = vrot.slane %v2840_v10, 1  ;;  %v2909_v56 = vrot.slane %v2841_v21, 1  ;;  %v2911_v16 = vrot.slane %v2842_v14, 1  ;;  %v2404_v22 = vld [vmem:[#allocation2 + $0xc7] sm:$0xff]  ;;  %v2405_v10 = vld [vmem:[#allocation2 + $0xcf] sm:$0x3] }
 0x1e0   :  { %v2815_v9 = vadd.f32 %v2799_v40, %v2745_v37  ;;  %v2912_v6 = vrot.slane %v2843_v5, 1  ;;  %v2990_v31 = vmul.f32 %v7604_v11, %v2767_v24  ;;  %v2991_v28 = vmul.f32 %v7604_v11, %v7880_v50 }
 0x1e1   :  { %v2816_v35 = vadd.f32 %v2800_v1, %v2746_v2  ;;  %v2910_v29 = vsel %vm2159_vm5, %v2908_v57, %v2909_v56  ;;  %v2992_v45 = vmul.f32 %v7604_v11, %v2769_v59  ;;  %v3057_v30 = vrot.slane %v2989_v13, 2 }
 0x1e2   :  { %v2913_v34 = vsel %vm2159_vm5, %v2911_v16, %v2912_v6  ;;  %v2964_v54 = vadd.f32 %v2910_v29, %v2815_v9  ;;  %v3058_v18 = vrot.slane %v2990_v31, 2  ;;  %v3060_v17 = vrot.slane %v2991_v28, 2 }
 0x1e3   :  { %v2965_v25 = vadd.f32 %v2913_v34, %v2816_v35  ;;  %v3061_v63 = vrot.slane %v2992_v45, 2  ;;  %v2080_v7 = vmul.f32 %v7499_v48, %v7857_v4  ;;  %v2081_v55 = vmul.f32 %v7499_v48, %v7880_v50 }
 0x1e4   :  { %v3059_v36 = vsel %vm2309_vm6, %v3057_v30, %v3058_v18  ;;  %v2107_v49 = vmul.f32 %v7479_v53, %v7857_v4  ;;  %v2108_v38 = vmul.f32 %v7479_v53, %v2050_v23  ;;  %v2109_v58 = vmul.f32 %v7479_v53, %v7880_v50 }
 0x1e5   :  { %v3062_v20 = vsel %vm2309_vm6, %v3060_v17, %v3061_v63  ;;  %v3113_v27 = vadd.f32 %v3059_v36, %v2964_v54  ;;  %v2110_v60 = vmul.f32 %v7479_v53, %v2052_v47  ;;  %v2257_v3 = vmul.f32 %v9254_v8, %v7857_v4 }
 0x1e6   :  { %v3114_v44 = vadd.f32 %v3062_v20, %v2965_v25  ;;  %v2178_v19 = vrot.slane %v2107_v49, 1  ;;  %v2179_v24 = vrot.slane %v2108_v38, 1  ;;  %v2181_v61 = vrot.slane %v2109_v58, 1  ;;  %v2771_v25 = vld [vmem:[#allocation2 + $0xcf] sm:$0x3] }
 0x1e7   :  { %v2182_v33 = vrot.slane %v2110_v60, 1  ;;  %v2258_v12 = vmul.f32 %v9254_v8, %v2050_v23  ;;  %v2259_v0 = vmul.f32 %v9254_v8, %v7880_v50  ;;  %v2260_v59 = vmul.f32 %v9254_v8, %v2052_v47 }
 0x1e8   :  { %v3127_v42 = vpack.c.bf16 %v3114_v44, %v3113_v27  ;;  %v2180_v40 = vsel %vm2159_vm5, %v2178_v19, %v2179_v24  ;;  %v2328_v1 = vrot.slane %v2257_v3, 2  ;;  %v2433_v4 = vmul.f32 %v7699_v32, %v7880_v50  ;;  %v2055_v44 = vld [vmem:[#allocation2 + $0x10f] sm:$0xff] }
 0x1e9   :  { %v2183_v21 = vsel %vm2159_vm5, %v2181_v61, %v2182_v33  ;;  %v2230_v14 = vadd.f32 %v2180_v40, %v2080_v7  ;;  %v2329_v41 = vrot.slane %v2258_v12, 2  ;;  %v2331_v37 = vrot.slane %v2259_v0, 2  ;;  %v2056_v12 = vld [vmem:[#allocation2 + $0x117] sm:$0x3] }
 0x1ea   :  { %5967 = vmatprep.mubr.msk.bf16.mxu1 %vm27_vm3, %v3127_v42  ;;  %v2231_v5 = vadd.f32 %v2183_v21, %v2081_v55  ;;  %v2332_v13 = vrot.slane %v2260_v59, 2  ;;  %v2434_v2 = vmul.f32 %v7699_v32, %v2404_v22  ;;  %v2476_v57 = vmul.f32 %v7704_v62, %v7880_v50 }
 0x1eb   :  { %v2330_v56 = vsel %vm2309_vm6, %v2328_v1, %v2329_v41  ;;  %v2477_v16 = vmul.f32 %v7704_v62, %v2403_v51  ;;  %v2478_v9 = vmul.f32 %v7704_v62, %v2404_v22  ;;  %v2479_v6 = vmul.f32 %v7704_v62, %v2405_v10 }
 0x1ec   :  { %v2333_v31 = vsel %vm2309_vm6, %v2331_v37, %v2332_v13  ;;  %v2380_v28 = vadd.f32 %v2330_v56, %v2230_v14  ;;  %v2546_v35 = vrot.slane %v2476_v57, 1  ;;  %v2625_v29 = vmul.f32 %v7733_v39, %v7880_v50  ;;  %v9259_v14 = vld [vmem:[#allocation7_spill] sm:$0xff] }
 0x1ed   :  { %v2381_v45 = vadd.f32 %v2333_v31, %v2231_v5  ;;  %v2547_v30 = vrot.slane %v2477_v16, 1  ;;  %v2549_v23 = vrot.slane %v2478_v9, 1  ;;  %v2550_v34 = vrot.slane %v2479_v6, 1  ;;  %v7960_v13 = vld [vmem:[#allocation2 + $0x127] sm:$0xff]  ;;  %v2407_v6 = vld [vmem:[#allocation2 + $0x117] sm:$0x3] }
 0x1ee   :  { %v2449_v54 = vadd.f32 %v2433_v4, %v2380_v28  ;;  %v2626_v18 = vmul.f32 %v7733_v39, %v2403_v51  ;;  %v2627_v17 = vmul.f32 %v7733_v39, %v2404_v22  ;;  %v2628_v47 = vmul.f32 %v7733_v39, %v2405_v10 }
 0x1ef   :  { %v2450_v63 = vadd.f32 %v2434_v2, %v2381_v45  ;;  %v2548_v7 = vsel %vm2159_vm5, %v2546_v35, %v2547_v30  ;;  %v2551_v55 = vsel %vm2159_vm5, %v2549_v23, %v2550_v34  ;;  %v2695_v36 = vrot.slane %v2625_v29, 2  ;;  %v2409_v29 = vld [vmem:[#allocation2 + $0x12f] sm:$0x3] }
 0x1f0   :  { %v2598_v49 = vadd.f32 %v2548_v7, %v2449_v54  ;;  %v2696_v50 = vrot.slane %v2626_v18, 2  ;;  %v2698_v38 = vrot.slane %v2627_v17, 2  ;;  %v2699_v58 = vrot.slane %v2628_v47, 2 }
 0x1f1   :  { %v2599_v20 = vadd.f32 %v2551_v55, %v2450_v63  ;;  %v2801_v27 = vmul.f32 %v7586_v43, %v2404_v22  ;;  %v2844_v60 = vmul.f32 %v7591_v52, %v2404_v22  ;;  %v2845_v3 = vmul.f32 %v7591_v52, %v2771_v25 }
 0x1f2   :  { %v2697_v19 = vsel %vm2309_vm6, %v2695_v36, %v2696_v50  ;;  %v2700_v24 = vsel %vm2309_vm6, %v2698_v38, %v2699_v58  ;;  %v2993_v61 = vmul.f32 %v7604_v11, %v2404_v22  ;;  %v2994_v33 = vmul.f32 %v7604_v11, %v2771_v25  ;;  %v7957_v22 = vld [vmem:[%s9239_s3 + $0x1] ss:$0 sm:$0xff] }
 0x1f3   :  { %v2747_v0 = vadd.f32 %v2697_v19, %v2598_v49  ;;  %v2748_v59 = vadd.f32 %v2700_v24, %v2599_v20  ;;  %v2914_v42 = vrot.slane %v2844_v60, 1  ;;  %v2915_v40 = vrot.slane %v2845_v3, 1  ;;  %v2775_v19 = vld [vmem:[#allocation2 + $0x12f] sm:$0x3] }
 0x1f4   :  { %v3063_v1 = vrot.slane %v2993_v61, 2  ;;  %v3064_v51 = vrot.slane %v2994_v33, 2  ;;  %v2083_v10 = vmul.f32 %v7499_v48, %v2055_v44  ;;  %v2113_v4 = vmul.f32 %v7479_v53, %v2055_v44 }
 0x1f5   :  { %v2817_v21 = vadd.f32 %v2801_v27, %v2747_v0  ;;  %v2818_v41 = vadd.f32 %v9259_v14, %v2748_v59  ;;  %v2916_v37 = vsel %vm2159_vm5, %v2914_v42, %v2915_v40  ;;  %v2114_v5 = vmul.f32 %v7957_v22, %v2056_v12  ;;  %v7984_v27 = vld [vmem:[#allocation2 + $0x13f] sm:$0xff]  ;;  %v2777_v59 = vld [vmem:[#allocation2 + $0x147] sm:$0x3] }
 0x1f6   :  { %v3065_v2 = vsel %vm2309_vm6, %v3063_v1, %v3064_v51  ;;  %v2187_v57 = vrot.slane %v2113_v4, 1  ;;  %v2263_v48 = vmul.f32 %v9254_v8, %v2055_v44  ;;  %v2264_v53 = vmul.f32 %v9254_v8, %v2056_v12 }
 0x1f7   :  { %v2966_v56 = vadd.f32 %v2916_v37, %v2817_v21  ;;  %v2967_v16 = vadd.f32 %v7637_v46, %v2818_v41  ;;  %v2188_v9 = vrot.slane %v2114_v5, 1  ;;  %v2435_v31 = vmul.f32 %v7699_v32, %v2055_v44 }
 0x1f8   :  { %v2337_v28 = vrot.slane %v2263_v48, 2  ;;  %v2338_v35 = vrot.slane %v2264_v53, 2  ;;  %v2436_v45 = vmul.f32 %v7699_v32, %v7960_v13  ;;  %v2480_v30 = vmul.f32 %v7704_v62, %v2055_v44 }
 0x1f9   :  { %v3115_v23 = vadd.f32 %v3065_v2, %v2966_v56  ;;  %v3116_v34 = vadd.f32 %v7644_v15, %v2967_v16  ;;  %v2189_v8 = vsel %vm2159_vm5, %v2187_v57, %v2188_v9  ;;  %v2451_v54 = vadd.f32 %v2435_v31, %v7646_v26 }
 0x1fa   :  { %v2233_v46 = vadd.f32 %v2189_v8, %v2083_v10  ;;  %v2339_v18 = vsel %vm2309_vm6, %v2337_v28, %v2338_v35  ;;  %v2481_v17 = vmul.f32 %v7704_v62, %v2407_v6  ;;  %v2482_v47 = vmul.f32 %v7704_v62, %v7960_v13  ;;  %v2058_v35 = vld [vmem:[#allocation2 + $0x12f] sm:$0x3] }
 0x1fb   :  { %v3128_v25 = vpack.c.bf16 %v3116_v34, %v3115_v23  ;;  %v2483_v63 = vmul.f32 %v7704_v62, %v2409_v29  ;;  %v2552_v7 = vrot.slane %v2480_v30, 1  ;;  %v2629_v55 = vmul.f32 %v7733_v39, %v2055_v44 }
 0x1fc   :  { %v2383_v36 = vadd.f32 %v2339_v18, %v2233_v46  ;;  %v2553_v15 = vrot.slane %v2481_v17, 1  ;;  %v2555_v49 = vrot.slane %v2482_v47, 1  ;;  %v2630_v50 = vmul.f32 %v7733_v39, %v2407_v6 }
 0x1fd   :  { %5968 = vmatmul.mubr.msk.bf16.gmra.mxu1 %vm27_vm3, %v3128_v25  ;;  %v2556_v26 = vrot.slane %v2483_v63, 1  ;;  %v2631_v38 = vmul.f32 %v7733_v39, %v7960_v13  ;;  %v2632_v58 = vmul.f32 %v7733_v39, %v2409_v29  ;;  %v2701_v20 = vrot.slane %v2629_v55, 2  ;;  %v8010_v29 = vld [vmem:[%s9239_s3] ss:$0 sm:$0xff] }
 0x1fe   :  { %v2452_v60 = vadd.f32 %v2436_v45, %v2383_v36  ;;  %v2554_v3 = vsel %vm2159_vm5, %v2552_v7, %v2553_v15  ;;  %v2702_v44 = vrot.slane %v2630_v50, 2  ;;  %v2803_v24 = vmul.f32 %v7586_v43, %v7960_v13 }
 0x1ff   :  { %v2557_v61 = vsel %vm2159_vm5, %v2555_v49, %v2556_v26  ;;  %v2600_v33 = vadd.f32 %v2554_v3, %v2451_v54  ;;  %v2704_v12 = vrot.slane %v2631_v38, 2  ;;  %v2705_v0 = vrot.slane %v2632_v58, 2  ;;  %v2060_v54 = vld [vmem:[#allocation2 + $0x147] sm:$0x3]  ;;  %v8028_v49 = vld [vmem:[%s9239_s3 + $0x2] ss:$0 sm:$0xff] }
 0x200   :  { %v2601_v42 = vadd.f32 %v2557_v61, %v2452_v60  ;;  %v2703_v40 = vsel %vm2309_vm6, %v2701_v20, %v2702_v44  ;;  %v2804_v1 = vmul.f32 %v7586_v43, %v7984_v27  ;;  %v2848_v51 = vmul.f32 %v7591_v52, %v7960_v13  ;;  %v8035_v60 = vld [vmem:[#allocation2 + $0x157] sm:$0xff]  ;;  %v2411_v61 = vld [vmem:[#allocation2 + $0x147] sm:$0x3] }
 0x201   :  { %v2706_v10 = vsel %vm2309_vm6, %v2704_v12, %v2705_v0  ;;  %v2749_v4 = vadd.f32 %v2703_v40, %v2600_v33  ;;  %v2849_v21 = vmul.f32 %v7591_v52, %v2775_v19  ;;  %v2850_v14 = vmul.f32 %v7591_v52, %v7984_v27 }
 0x202   :  { %v2750_v41 = vadd.f32 %v2706_v10, %v2601_v42  ;;  %v2851_v37 = vmul.f32 %v7591_v52, %v2777_v59  ;;  %v2920_v5 = vrot.slane %v2848_v51, 1  ;;  %v2997_v2 = vmul.f32 %v7604_v11, %v7960_v13 }
 0x203   :  { %v2819_v57 = vadd.f32 %v2803_v24, %v2749_v4  ;;  %v2921_v43 = vrot.slane %v2849_v21, 1  ;;  %v2923_v48 = vrot.slane %v2850_v14, 1  ;;  %v2998_v53 = vmul.f32 %v7604_v11, %v2775_v19 }
 0x204   :  { %v2820_v56 = vadd.f32 %v2804_v1, %v2750_v41  ;;  %v2924_v16 = vrot.slane %v2851_v37, 1  ;;  %v2999_v9 = vmul.f32 %v7604_v11, %v7984_v27  ;;  %v3000_v6 = vmul.f32 %v7604_v11, %v2777_v59 }
 0x205   :  { %v2922_v31 = vsel %vm2159_vm5, %v2920_v5, %v2921_v43  ;;  %v3069_v28 = vrot.slane %v2997_v2, 2  ;;  %v3070_v52 = vrot.slane %v2998_v53, 2  ;;  %v2084_v45 = vmul.f32 %v8010_v29, %v7960_v13 }
 0x206   :  { %v2925_v30 = vsel %vm2159_vm5, %v2923_v48, %v2924_v16  ;;  %v2968_v23 = vadd.f32 %v2922_v31, %v2819_v57  ;;  %v3072_v34 = vrot.slane %v2999_v9, 2  ;;  %v3073_v8 = vrot.slane %v3000_v6, 2 }
 0x207   :  { %v2969_v11 = vadd.f32 %v2925_v30, %v2820_v56  ;;  %v3071_v46 = vsel %vm2309_vm6, %v3069_v28, %v3070_v52  ;;  %v2085_v18 = vmul.f32 %v8010_v29, %v7984_v27  ;;  %v2115_v17 = vmul.f32 %v7957_v22, %v7960_v13 }
 0x208   :  { %v3074_v47 = vsel %vm2309_vm6, %v3072_v34, %v3073_v8  ;;  %v3117_v25 = vadd.f32 %v3071_v46, %v2968_v23  ;;  %v2116_v63 = vmul.f32 %v7957_v22, %v2058_v35  ;;  %v2117_v7 = vmul.f32 %v7957_v22, %v7984_v27  ;;  %v2781_v34 = vld [vmem:[#allocation2 + $0x177] sm:$0x3]  ;;  %v8066_v46 = vld [vmem:[%s9239_s3 + $0x6] ss:$0 sm:$0xff] }
 0x209   :  { %v3118_v55 = vadd.f32 %v3074_v47, %v2969_v11  ;;  %v2118_v36 = vmul.f32 %v7957_v22, %v2060_v54  ;;  %v2190_v15 = vrot.slane %v2115_v17, 1  ;;  %v2265_v50 = vmul.f32 %v8028_v49, %v7960_v13  ;;  %v2413_v13 = vld [vmem:[#allocation2 + $0x15f] sm:$0x3]  ;;  %v8076_v47 = vld [vmem:[%s9239_s3 + $0x7] ss:$0 sm:$0xff] }
 0x20a   :  { %v2191_v26 = vrot.slane %v2116_v63, 1  ;;  %v2193_v38 = vrot.slane %v2117_v7, 1  ;;  %v2266_v58 = vmul.f32 %v8028_v49, %v2058_v35  ;;  %v2267_v20 = vmul.f32 %v8028_v49, %v7984_v27  ;;  %v8060_v35 = vld [vmem:[#allocation2 + $0x16f] sm:$0xff] }
 0x20b   :  { %v3129_v3 = vpack.c.bf16 %v3118_v55, %v3117_v25  ;;  %v2194_v44 = vrot.slane %v2118_v36, 1  ;;  %v2268_v19 = vmul.f32 %v8028_v49, %v2060_v54  ;;  %v2340_v24 = vrot.slane %v2265_v50, 2 }
 0x20c   :  { %v2192_v33 = vsel %vm2159_vm5, %v2190_v15, %v2191_v26  ;;  %v2341_v12 = vrot.slane %v2266_v58, 2  ;;  %v2343_v0 = vrot.slane %v2267_v20, 2  ;;  %v2437_v59 = vmul.f32 %v7699_v32, %v7984_v27  ;;  %v8088_v58 = vld [vmem:[%s9239_s3 + $0x8] ss:$0 sm:$0xff] }
 0x20d   :  { %5971 = vmatprep.mubr.msk.bf16.mxu1 %vm27_vm3, %v3129_v3  ;;  %v2195_v42 = vsel %vm2159_vm5, %v2193_v38, %v2194_v44  ;;  %v2234_v40 = vadd.f32 %v2192_v33, %v2084_v45  ;;  %v2344_v1 = vrot.slane %v2268_v19, 2  ;;  %v2438_v51 = vmul.f32 %v7699_v32, %v8035_v60 }
 0x20e   :  { %v2235_v10 = vadd.f32 %v2195_v42, %v2085_v18  ;;  %v2342_v4 = vsel %vm2309_vm6, %v2340_v24, %v2341_v12  ;;  %v2484_v21 = vmul.f32 %v7704_v62, %v7984_v27  ;;  %v2485_v14 = vmul.f32 %v7704_v62, %v2411_v61 }
 0x20f   :  { %v2345_v41 = vsel %vm2309_vm6, %v2343_v0, %v2344_v1  ;;  %v2384_v37 = vadd.f32 %v2342_v4, %v2234_v40  ;;  %v2486_v5 = vmul.f32 %v7704_v62, %v8035_v60  ;;  %v2487_v2 = vmul.f32 %v7704_v62, %v2413_v13  ;;  %v2779_v62 = vld [vmem:[#allocation2 + $0x15f] sm:$0x3] }
 0x210   :  { %v2385_v57 = vadd.f32 %v2345_v41, %v2235_v10  ;;  %v2558_v43 = vrot.slane %v2484_v21, 1  ;;  %v2559_v48 = vrot.slane %v2485_v14, 1  ;;  %v2633_v32 = vmul.f32 %v7733_v39, %v7984_v27 }
 0x211   :  { %v2453_v53 = vadd.f32 %v2437_v59, %v2384_v37  ;;  %v2561_v56 = vrot.slane %v2486_v5, 1  ;;  %v2562_v16 = vrot.slane %v2487_v2, 1  ;;  %v2634_v9 = vmul.f32 %v7733_v39, %v2411_v61 }
 0x212   :  { %v2454_v6 = vadd.f32 %v2438_v51, %v2385_v57  ;;  %v2560_v31 = vsel %vm2159_vm5, %v2558_v43, %v2559_v48  ;;  %v2635_v28 = vmul.f32 %v7733_v39, %v8035_v60  ;;  %v2636_v52 = vmul.f32 %v7733_v39, %v2413_v13  ;;  %v2062_v13 = vld [vmem:[#allocation2 + $0x15f] sm:$0x3]  ;;  %v2064_v51 = vld [vmem:[#allocation2 + $0x177] sm:$0x3] }
 0x213   :  { %v2563_v45 = vsel %vm2159_vm5, %v2561_v56, %v2562_v16  ;;  %v2602_v30 = vadd.f32 %v2560_v31, %v2453_v53  ;;  %v2707_v27 = vrot.slane %v2633_v32, 2  ;;  %v2708_v23 = vrot.slane %v2634_v9, 2 }
 0x214   :  { %v2603_v8 = vadd.f32 %v2563_v45, %v2454_v6  ;;  %v2710_v54 = vrot.slane %v2635_v28, 2  ;;  %v2711_v11 = vrot.slane %v2636_v52, 2  ;;  %v2805_v39 = vmul.f32 %v8066_v46, %v8035_v60 }
 0x215   :  { %v2709_v18 = vsel %vm2309_vm6, %v2707_v27, %v2708_v23  ;;  %v2806_v17 = vmul.f32 %v8066_v46, %v8060_v35  ;;  %v2852_v25 = vmul.f32 %v8076_v47, %v8035_v60  ;;  %v2853_v63 = vmul.f32 %v8076_v47, %v2779_v62 }
 0x216   :  { %v2712_v7 = vsel %vm2309_vm6, %v2710_v54, %v2711_v11  ;;  %v2751_v55 = vadd.f32 %v2709_v18, %v2602_v30  ;;  %v2854_v36 = vmul.f32 %v8076_v47, %v8060_v35  ;;  %v2855_v15 = vmul.f32 %v8076_v47, %v2781_v34 }
 0x217   :  { %v2752_v50 = vadd.f32 %v2712_v7, %v2603_v8  ;;  %v2926_v26 = vrot.slane %v2852_v25, 1  ;;  %v2927_v38 = vrot.slane %v2853_v63, 1  ;;  %v3001_v20 = vmul.f32 %v8088_v58, %v8035_v60  ;;  %v8124_v25 = vld [vmem:[%s9239_s3 + $0x3] ss:$0 sm:$0xff] }
 0x218   :  { %v2821_v3 = vadd.f32 %v2805_v39, %v2751_v55  ;;  %v2929_v44 = vrot.slane %v2854_v36, 1  ;;  %v2930_v19 = vrot.slane %v2855_v15, 1  ;;  %v3002_v24 = vmul.f32 %v8088_v58, %v2779_v62  ;;  %v8115_v62 = vld [vmem:[#allocation2 + $0x187] sm:$0xff]  ;;  %v2417_v39 = vld [vmem:[#allocation2 + $0x18f] sm:$0x3] }
 0x219   :  { %v2822_v61 = vadd.f32 %v2806_v17, %v2752_v50  ;;  %v2928_v33 = vsel %vm2159_vm5, %v2926_v26, %v2927_v38  ;;  %v3003_v12 = vmul.f32 %v8088_v58, %v8060_v35  ;;  %v3004_v0 = vmul.f32 %v8088_v58, %v2781_v34  ;;  %v2415_v34 = vld [vmem:[#allocation2 + $0x177] sm:$0x3]  ;;  %v8134_v36 = vld [vmem:[%s9239_s3 + $0x4] ss:$0 sm:$0xff] }
 0x21a   :  { %v2931_v59 = vsel %vm2159_vm5, %v2929_v44, %v2930_v19  ;;  %v2970_v42 = vadd.f32 %v2928_v33, %v2821_v3  ;;  %v3075_v40 = vrot.slane %v3001_v20, 2  ;;  %v3076_v1 = vrot.slane %v3002_v24, 2  ;;  %v8146_v44 = vld [vmem:[%s9239_s3 + $0x5] ss:$0 sm:$0xff] }
 0x21b   :  { %v2971_v10 = vadd.f32 %v2931_v59, %v2822_v61  ;;  %v3078_v4 = vrot.slane %v3003_v12, 2  ;;  %v3079_v21 = vrot.slane %v3004_v0, 2  ;;  %v2086_v14 = vmul.f32 %v8010_v29, %v8035_v60 }
 0x21c   :  { %v3077_v41 = vsel %vm2309_vm6, %v3075_v40, %v3076_v1  ;;  %v2087_v37 = vmul.f32 %v8010_v29, %v8060_v35  ;;  %v2119_v5 = vmul.f32 %v7957_v22, %v8035_v60  ;;  %v2120_v2 = vmul.f32 %v7957_v22, %v2062_v13  ;;  %v8153_v40 = vld [vmem:[#allocation2 + $0x19f] sm:$0xff] }
 0x21d   :  { %v3080_v57 = vsel %vm2309_vm6, %v3078_v4, %v3079_v21  ;;  %v3119_v43 = vadd.f32 %v3077_v41, %v2970_v42  ;;  %v2121_v48 = vmul.f32 %v7957_v22, %v8060_v35  ;;  %v2122_v32 = vmul.f32 %v7957_v22, %v2064_v51 }
 0x21e   :  { %v3120_v53 = vadd.f32 %v3080_v57, %v2971_v10  ;;  %v2196_v56 = vrot.slane %v2119_v5, 1  ;;  %v2197_v16 = vrot.slane %v2120_v2, 1  ;;  %v2269_v9 = vmul.f32 %v8028_v49, %v8035_v60  ;;  %v2785_v5 = vld [vmem:[#allocation2 + $0x1a7] sm:$0x3] }
 0x21f   :  { %v2199_v6 = vrot.slane %v2121_v48, 1  ;;  %v2200_v31 = vrot.slane %v2122_v32, 1  ;;  %v2270_v28 = vmul.f32 %v8028_v49, %v2062_v13  ;;  %v2271_v52 = vmul.f32 %v8028_v49, %v8060_v35 }
 0x220   :  { %v3130_v45 = vpack.c.bf16 %v3120_v53, %v3119_v43  ;;  %v2198_v30 = vsel %vm2159_vm5, %v2196_v56, %v2197_v16  ;;  %v2272_v27 = vmul.f32 %v8028_v49, %v2064_v51  ;;  %v2346_v23 = vrot.slane %v2269_v9, 2 }
 0x221   :  { %v2201_v8 = vsel %vm2159_vm5, %v2199_v6, %v2200_v31  ;;  %v2236_v54 = vadd.f32 %v2198_v30, %v2086_v14  ;;  %v2347_v60 = vrot.slane %v2270_v28, 2  ;;  %v2349_v11 = vrot.slane %v2271_v52, 2 }
 0x222   :  { %5972 = vmatmul.mubr.msk.bf16.gmra.mxu1 %vm27_vm3, %v3130_v45  ;;  %v2237_v18 = vadd.f32 %v2201_v8, %v2087_v37  ;;  %v2350_v17 = vrot.slane %v2272_v27, 2  ;;  %v2439_v63 = vmul.f32 %v8124_v25, %v8060_v35  ;;  %v2440_v7 = vmul.f32 %v8124_v25, %v8115_v62 }
 0x223   :  { %v2348_v55 = vsel %vm2309_vm6, %v2346_v23, %v2347_v60  ;;  %v2488_v15 = vmul.f32 %v8134_v36, %v8060_v35  ;;  %v2489_v50 = vmul.f32 %v8134_v36, %v2415_v34  ;;  %v2490_v26 = vmul.f32 %v8134_v36, %v8115_v62 }
 0x224   :  { %v2351_v38 = vsel %vm2309_vm6, %v2349_v11, %v2350_v17  ;;  %v2386_v20 = vadd.f32 %v2348_v55, %v2236_v54  ;;  %v2491_v3 = vmul.f32 %v8134_v36, %v2417_v39  ;;  %v2637_v19 = vmul.f32 %v8146_v44, %v8060_v35  ;;  %v2783_v35 = vld [vmem:[#allocation2 + $0x18f] sm:$0x3] }
 0x225   :  { %v2387_v24 = vadd.f32 %v2351_v38, %v2237_v18  ;;  %v2564_v61 = vrot.slane %v2488_v15, 1  ;;  %v2565_v33 = vrot.slane %v2489_v50, 1  ;;  %v2567_v12 = vrot.slane %v2490_v26, 1  ;;  %v2066_v17 = vld [vmem:[#allocation2 + $0x18f] sm:$0x3] }
 0x226   :  { %v2455_v0 = vadd.f32 %v2439_v63, %v2386_v20  ;;  %v2568_v13 = vrot.slane %v2491_v3, 1  ;;  %v2638_v59 = vmul.f32 %v8146_v44, %v2415_v34  ;;  %v2639_v42 = vmul.f32 %v8146_v44, %v8115_v62  ;;  %v2068_v50 = vld [vmem:[#allocation2 + $0x1a7] sm:$0x3] }
 0x227   :  { %v2456_v1 = vadd.f32 %v2440_v7, %v2387_v24  ;;  %v2566_v51 = vsel %vm2159_vm5, %v2564_v61, %v2565_v33  ;;  %v2640_v10 = vmul.f32 %v8146_v44, %v2417_v39  ;;  %v2713_v4 = vrot.slane %v2637_v19, 2 }
 0x228   :  { %v2569_v21 = vsel %vm2159_vm5, %v2567_v12, %v2568_v13  ;;  %v2604_v14 = vadd.f32 %v2566_v51, %v2455_v0  ;;  %v2714_v41 = vrot.slane %v2638_v59, 2  ;;  %v2716_v37 = vrot.slane %v2639_v42, 2 }
 0x229   :  { %v2605_v2 = vadd.f32 %v2569_v21, %v2456_v1  ;;  %v2717_v57 = vrot.slane %v2640_v10, 2  ;;  %v2807_v43 = vmul.f32 %v8066_v46, %v8115_v62  ;;  %v2808_v48 = vmul.f32 %v8066_v46, %v8153_v40 }
 0x22a   :  { %v2715_v32 = vsel %vm2309_vm6, %v2713_v4, %v2714_v41  ;;  %v2856_v53 = vmul.f32 %v8076_v47, %v8115_v62  ;;  %v2857_v56 = vmul.f32 %v8076_v47, %v2783_v35  ;;  %v2858_v16 = vmul.f32 %v8076_v47, %v8153_v40 }
 0x22b   :  { %v2718_v9 = vsel %vm2309_vm6, %v2716_v37, %v2717_v57  ;;  %v2753_v6 = vadd.f32 %v2715_v32, %v2604_v14  ;;  %v2859_v31 = vmul.f32 %v8076_v47, %v2785_v5  ;;  %v3005_v28 = vmul.f32 %v8088_v58, %v8115_v62  ;;  %v2420_v14 = vld [vmem:[#allocation2 + $0x1b7] sm:$0xff] }
 0x22c   :  { %v2754_v52 = vadd.f32 %v2718_v9, %v2605_v2  ;;  %v2932_v45 = vrot.slane %v2856_v53, 1  ;;  %v2933_v30 = vrot.slane %v2857_v56, 1  ;;  %v2935_v27 = vrot.slane %v2858_v16, 1  ;;  %v2421_v2 = vld [vmem:[#allocation2 + $0x1bf] sm:$0x3] }
 0x22d   :  { %v2823_v23 = vadd.f32 %v2807_v43, %v2753_v6  ;;  %v2936_v34 = vrot.slane %v2859_v31, 1  ;;  %v3006_v8 = vmul.f32 %v8088_v58, %v2783_v35  ;;  %v3007_v54 = vmul.f32 %v8088_v58, %v8153_v40 }
 0x22e   :  { %v2824_v60 = vadd.f32 %v2808_v48, %v2754_v52  ;;  %v2934_v11 = vsel %vm2159_vm5, %v2932_v45, %v2933_v30  ;;  %v3008_v39 = vmul.f32 %v8088_v58, %v2785_v5  ;;  %v3081_v18 = vrot.slane %v3005_v28, 2  ;;  %v2419_v5 = vld [vmem:[#allocation2 + $0x1a7] sm:$0x3] }
 0x22f   :  { %v2937_v63 = vsel %vm2159_vm5, %v2935_v27, %v2936_v34  ;;  %v2972_v7 = vadd.f32 %v2934_v11, %v2823_v23  ;;  %v3082_v55 = vrot.slane %v3006_v8, 2  ;;  %v3084_v15 = vrot.slane %v3007_v54, 2 }
 0x230   :  { %v2973_v26 = vadd.f32 %v2937_v63, %v2824_v60  ;;  %v3085_v38 = vrot.slane %v3008_v39, 2  ;;  %v2088_v20 = vmul.f32 %v8010_v29, %v8115_v62  ;;  %v2089_v3 = vmul.f32 %v8010_v29, %v8153_v40 }
 0x231   :  { %v3083_v19 = vsel %vm2309_vm6, %v3081_v18, %v3082_v55  ;;  %v2123_v24 = vmul.f32 %v7957_v22, %v8115_v62  ;;  %v2124_v61 = vmul.f32 %v7957_v22, %v2066_v17  ;;  %v2125_v33 = vmul.f32 %v7957_v22, %v8153_v40  ;;  %v2788_v18 = vld [vmem:[#allocation2 + $0x1cf] sm:$0xff]  ;;  %v2787_v55 = vld [vmem:[#allocation2 + $0x1bf] sm:$0x3] }
 0x232   :  { %v3086_v12 = vsel %vm2309_vm6, %v3084_v15, %v3085_v38  ;;  %v3121_v0 = vadd.f32 %v3083_v19, %v2972_v7  ;;  %v2126_v13 = vmul.f32 %v7957_v22, %v2068_v50  ;;  %v2273_v59 = vmul.f32 %v8028_v49, %v8115_v62  ;;  %v2789_v38 = vld [vmem:[#allocation2 + $0x1d7] sm:$0x3] }
 0x233   :  { %v3122_v42 = vadd.f32 %v3086_v12, %v2973_v26  ;;  %v2202_v29 = vrot.slane %v2123_v24, 1  ;;  %v2203_v1 = vrot.slane %v2124_v61, 1  ;;  %v2205_v51 = vrot.slane %v2125_v33, 1 }
 0x234   :  { %v2206_v10 = vrot.slane %v2126_v13, 1  ;;  %v2274_v4 = vmul.f32 %v8028_v49, %v2066_v17  ;;  %v2275_v35 = vmul.f32 %v8028_v49, %v8153_v40  ;;  %v2276_v21 = vmul.f32 %v8028_v49, %v2068_v50 }
 0x235   :  { %v3131_v41 = vpack.c.bf16 %v3122_v42, %v3121_v0  ;;  %v2204_v37 = vsel %vm2159_vm5, %v2202_v29, %v2203_v1  ;;  %v2352_v22 = vrot.slane %v2273_v59, 2  ;;  %v2441_v62 = vmul.f32 %v8124_v25, %v8153_v40 }
 0x236   :  { %v2207_v57 = vsel %vm2159_vm5, %v2205_v51, %v2206_v10  ;;  %v2238_v43 = vadd.f32 %v2204_v37, %v2088_v20  ;;  %v2353_v48 = vrot.slane %v2274_v4, 2  ;;  %v2355_v32 = vrot.slane %v2275_v35, 2 }
 0x237   :  { %5975 = vmatprep.mubr.msk.bf16.mxu1 %vm27_vm3, %v3131_v41  ;;  %v2239_v53 = vadd.f32 %v2207_v57, %v2089_v3  ;;  %v2356_v56 = vrot.slane %v2276_v21, 2  ;;  %v2442_v49 = vmul.f32 %v8124_v25, %v2420_v14  ;;  %v2492_v16 = vmul.f32 %v8134_v36, %v8153_v40 }
 0x238   :  { %v2354_v9 = vsel %vm2309_vm6, %v2352_v22, %v2353_v48  ;;  %v2493_v6 = vmul.f32 %v8134_v36, %v2419_v5  ;;  %v2494_v31 = vmul.f32 %v8134_v36, %v2420_v14  ;;  %v2495_v28 = vmul.f32 %v8134_v36, %v2421_v2 }
 0x239   :  { %v2357_v52 = vsel %vm2309_vm6, %v2355_v32, %v2356_v56  ;;  %v2388_v45 = vadd.f32 %v2354_v9, %v2238_v43  ;;  %v2570_v30 = vrot.slane %v2492_v16, 1  ;;  %v2641_v27 = vmul.f32 %v8146_v44, %v8153_v40 }
 0x23a   :  { %v2389_v23 = vadd.f32 %v2357_v52, %v2239_v53  ;;  %v2571_v25 = vrot.slane %v2493_v6, 1  ;;  %v2573_v34 = vrot.slane %v2494_v31, 1  ;;  %v2574_v8 = vrot.slane %v2495_v28, 1 }
 0x23b   :  { %v2457_v54 = vadd.f32 %v2441_v62, %v2388_v45  ;;  %v2642_v60 = vmul.f32 %v8146_v44, %v2419_v5  ;;  %v2643_v11 = vmul.f32 %v8146_v44, %v2420_v14  ;;  %v2644_v39 = vmul.f32 %v8146_v44, %v2421_v2 }
 0x23c   :  { %v2458_v36 = vadd.f32 %v2442_v49, %v2389_v23  ;;  %v2572_v17 = vsel %vm2159_vm5, %v2570_v30, %v2571_v25  ;;  %v2575_v63 = vsel %vm2159_vm5, %v2573_v34, %v2574_v8  ;;  %v2719_v7 = vrot.slane %v2641_v27, 2 }
 0x23d   :  { %v2606_v40 = vadd.f32 %v2572_v17, %v2457_v54  ;;  %v2720_v15 = vrot.slane %v2642_v60, 2  ;;  %v2722_v50 = vrot.slane %v2643_v11, 2  ;;  %v2723_v26 = vrot.slane %v2644_v39, 2  ;;  %v3462_v17 = vld [vmem:[#allocation2 + $0x7] sm:$0xff] }
 0x23e   :  { %v2607_v20 = vadd.f32 %v2575_v63, %v2458_v36  ;;  %v2809_v3 = vmul.f32 %v8066_v46, %v2420_v14  ;;  %v2810_v19 = vmul.f32 %v8066_v46, %v2788_v18  ;;  %v2860_v44 = vmul.f32 %v8076_v47, %v2420_v14  ;;  %v3463_v63 = vld [vmem:[#allocation2 + $0xf] sm:$0x3] }
 0x23f   :  { %v2721_v24 = vsel %vm2309_vm6, %v2719_v7, %v2720_v15  ;;  %v2724_v61 = vsel %vm2309_vm6, %v2722_v50, %v2723_v26  ;;  %v2861_v33 = vmul.f32 %v8076_v47, %v2787_v55  ;;  %v2862_v12 = vmul.f32 %v8076_v47, %v2788_v18  ;;  %v8251_v15 = vld [vmem:[%s9239_s3 + $0x10] ss:$0 sm:$0xff] }
 0x240   :  { %v2755_v0 = vadd.f32 %v2721_v24, %v2606_v40  ;;  %v2756_v13 = vadd.f32 %v2724_v61, %v2607_v20  ;;  %v2863_v59 = vmul.f32 %v8076_v47, %v2789_v38  ;;  %v2938_v42 = vrot.slane %v2860_v44, 1  ;;  %v8246_v40 = vld [vmem:[%s9239_s3 + $0x12] ss:$0 sm:$0xff] }
 0x241   :  { %v2939_v29 = vrot.slane %v2861_v33, 1  ;;  %v2941_v1 = vrot.slane %v2862_v12, 1  ;;  %v3009_v51 = vmul.f32 %v8088_v58, %v2420_v14  ;;  %v3010_v46 = vmul.f32 %v8088_v58, %v2787_v55 }
 0x242   :  { %v2825_v10 = vadd.f32 %v2809_v3, %v2755_v0  ;;  %v2826_v4 = vadd.f32 %v2810_v19, %v2756_v13  ;;  %v2942_v35 = vrot.slane %v2863_v59, 1  ;;  %v3011_v21 = vmul.f32 %v8088_v58, %v2788_v18  ;;  %v8239_v18 = vld [vmem:[%s9239_s3 + $0x11] ss:$0 sm:$0xff]  ;;  %v8260_v0 = vld [vmem:[%s9239_s3 + $0x17] ss:$0 sm:$0xff] }
 0x243   :  { %v2940_v41 = vsel %vm2159_vm5, %v2938_v42, %v2939_v29  ;;  %v3012_v37 = vmul.f32 %v8088_v58, %v2789_v38  ;;  %v3087_v22 = vrot.slane %v3009_v51, 2  ;;  %v3088_v5 = vrot.slane %v3010_v46, 2  ;;  %v8265_v13 = vld [vmem:[%s9239_s3 + $0x18] ss:$0 sm:$0xff]  ;;  %v6110_v46 = vld [vmem:[%s9238_s4 + $0x30] sm:$0xff]  }
 0x244   :  { %v2943_v47 = vsel %vm2159_vm5, %v2941_v1, %v2942_v35  ;;  %v2974_v2 = vadd.f32 %v2940_v41, %v2825_v10  ;;  %v3090_v62 = vrot.slane %v3011_v21, 2  ;;  %v3521_v7 = vmul.f32 %v8239_v18, %v3462_v17  ;;  %v3400_v1 = vld [vmem:[#allocation2 + $0x50] sm:$0xff]  ;;  %v6109_v51 = vld [vmem:[%s9238_s4 + $0x38] sm:$0xff]  }
 0x245   :  { %v2975_v57 = vadd.f32 %v2943_v47, %v2826_v4  ;;  %v3089_v14 = vsel %vm2309_vm6, %v3087_v22, %v3088_v5  ;;  %v3091_v43 = vrot.slane %v3012_v37, 2  ;;  %v3522_v55 = vmul.f32 %v8239_v18, %v3463_v63  ;;  %v4195_v41 = vld [vmem:[#allocation2 + $0xdf] sm:$0xff]  ;;  %v4196_v37 = vld [vmem:[#allocation2 + $0xe7] sm:$0x3]  ;;  %5979 = vmatprep.subr.bf16.mxu0 %v6109_v51 }
 0x246   :  { %v3123_v48 = vadd.f32 %v3089_v14, %v2974_v2  ;;  %v3585_v50 = vrot.slane %v3521_v7, 1  ;;  %v3670_v38 = vmul.f32 %v8246_v40, %v3462_v17  ;;  %v3671_v20 = vmul.f32 %v8246_v40, %v3463_v63  ;;  %v3398_v5 = vld [vmem:[#allocation2 + $0x20] sm:$0xff]  ;;  %5980 = vmatpush3.bf16.msra.mxu0 %v6109_v51 }
 0x247   :  { %v3092_v32 = vsel %vm2309_vm6, %v3090_v62, %v3091_v43  ;;  %v3586_v26 = vrot.slane %v3522_v55, 1  ;;  %v3500_v44 = vmul.f32 %v8251_v15, %v3462_v17  ;;  %v4269_v62 = vmul.f32 %v8260_v0, %v4195_v41  ;;  %5981 = vmatprep.subr.bf16.mxu0 %v6110_v46  ;;  %v8300_v17 = vld [vmem:[%s9239_s3 + $0x16] ss:$0 sm:$0xff]  ;;  %v6112_v7 = vld [vmem:[%s9238_s4 + $0x20] sm:$0xff]  }
 0x248   :  { %v3124_v53 = vadd.f32 %v3092_v32, %v2975_v57  ;;  %v3734_v33 = vrot.slane %v3670_v38, 2  ;;  %v3735_v12 = vrot.slane %v3671_v20, 2  ;;  %v4270_v57 = vmul.f32 %v8260_v0, %v4196_v37 }
 0x249   :  { %v3587_v61 = vsel %vm2159_vm5, %v3585_v50, %v3586_v26  ;;  %v4418_v14 = vmul.f32 %v8265_v13, %v4195_v41  ;;  %v8308_v55 = vmul.f32 %v8300_v17, %v4195_v41 }
 0x24a   :  { %v3132_v56 = vpack.c.bf16 %v3124_v53, %v3123_v48  ;;  %v3649_v21 = vadd.f32 %v3587_v61, %v3500_v44  ;;  %v3736_v2 = vsel %vm2309_vm6, %v3734_v33, %v3735_v12  ;;  %v3401_v48 = vld [vmem:[#allocation2 + $0x68] sm:$0xff]  ;;  %5982 = vmatpush3.bf16.msra.mxu0 %v6110_v46 }
 0x24c   :  { %5976 = vmatmul.mubr.msk.bf16.gmra.mxu1 %vm27_vm3, %v3132_v56 }
 0x295   :  { %v5965_v49 = vpop.f32.mrf.mxu1 }
 0x296   :  { %v3288_v16 = vsub.f32 0.0, %v5965_v49 }
 0x297   :  { %v3223_v58 = vpop.f32.mrf.mxu1 }
 0x298   :  { %v3306_v9 = vmul.f32 1.442695, %v3288_v16  ;;  %v3286_v6 = vsub.f32 0.0, %v3223_v58 }
 0x299   :  { %v5966_v31 = vpop.f32.mrf.mxu1 }
 0x29a   :  { %6161 = vpow2.f32 %v3306_v9  ;;  %v3302_v28 = vmul.f32 1.442695, %v3286_v6  ;;  %v3289_v52 = vsub.f32 0.0, %v5966_v31  ;;  %v4340_v9 = vrot.slane %v4269_v62, 1  ;;  %v8367_v62 = vld [vmem:[%s9239_s3 + $0x13] ss:$0 sm:$0xff] }
 0x29b   :  { %v8233_v45 = vpop.f32.mrf.mxu1  ;;  %v4341_v6 = vrot.slane %v4270_v57, 1  ;;  %v8372_v57 = vld [vmem:[%s9239_s3 + $0x15] ss:$0 sm:$0xff] }
 0x29c   :  { %6163 = vpow2.f32 %v3302_v28  ;;  %v3308_v30 = vmul.f32 1.442695, %v3289_v52  ;;  %v3287_v27 = vsub.f32 0.0, %v8233_v45  ;;  %v4489_v28 = vrot.slane %v4418_v14, 2  ;;  %v3479_v52 = vld [vmem:[#allocation2 + $0xff] sm:$0x3] }
 0x29d   :  { %v8311_v50 = vsel %vm2159_vm5, %v4340_v9, %v4341_v6  ;;  %v8317_v38 = vmul.f32 %v8239_v18, %v3479_v52 }
 0x29e   :  { %6165 = vpow2.f32 %v3308_v30  ;;  %v3304_v23 = vmul.f32 1.442695, %v3287_v27 }
 0x29f   :  { %v3610_v33 = vrot.slane %v8317_v38, 1 }
 0x2a0   :  { %6167 = vpow2.f32 %v3304_v23 }
 0x2a7   :  { %v6162_v25 = vpop.eup %6161 }
 0x2a8   :  { %v3336_v34 = vadd.f32 1.0, %v6162_v25  ;;  %v3399_v25 = vld [vmem:[#allocation2 + $0x38] sm:$0xff] }
 0x2a9   :  { %v6164_v8 = vpop.eup %6163 }
 0x2aa   :  { %6169 = vrcp.f32 %v3336_v34  ;;  %v3334_v54 = vadd.f32 1.0, %v6164_v8  ;;  %v3798_v8 = vadd.f32 %v3736_v2, %v3649_v21 }
 0x2ab   :  { %v6166_v60 = vpop.eup %6165 }
 0x2ac   :  { %6171 = vrcp.f32 %v3334_v54  ;;  %v3337_v11 = vadd.f32 1.0, %v6166_v60 }
 0x2ad   :  { %v6168_v39 = vpop.eup %6167 }
 0x2ae   :  { %6173 = vrcp.f32 %v3337_v11  ;;  %v3335_v36 = vadd.f32 1.0, %v6168_v39 }
 0x2b0   :  { %6175 = vrcp.f32 %v3335_v36 }
 0x2b7   :  { %v6170_v3 = vpop.eup %6169 }
 0x2b8   :  { %v3384_v19 = vmul.f32 %v6170_v3, %v5965_v49  ;;  %v3478_v49 = vld [vmem:[#allocation2 + $0xf7] sm:$0xff] }
 0x2b9   :  { %v6172_v24 = vpop.eup %6171  ;;  %v8293_v60 = vmul.f32 %v8239_v18, %v3478_v49  ;;  %v8314_v26 = vmul.f32 %v8251_v15, %v3478_v49  ;;  %v8329_v12 = vmul.f32 %v8246_v40, %v3478_v49 }
 0x2ba   :  { %v3416_v59 = vmul.f32 0.1, %v3384_v19  ;;  %v3382_v42 = vmul.f32 %v6172_v24, %v3223_v58  ;;  %v6111_v58 = vld [vmem:[%s9238_s4 + $0x28] sm:$0xff]  }
 0x2bb   :  { %v6174_v29 = vpop.eup %6173  ;;  %5983 = vmatprep.subr.bf16.mxu0 %v6111_v58  ;;  %v3609_v61 = vrot.slane %v8293_v60, 1  ;;  %v8664_v60 = vld [vmem:[%s9239_s3 + $0x12] ss:$0 sm:$0xff] }
 0x2bc   :  { %v3432_v10 = vadd.f32 %v3416_v59, %v3400_v1  ;;  %v3414_v4 = vmul.f32 0.1, %v3382_v42  ;;  %v3385_v35 = vmul.f32 %v6174_v29, %v5966_v31  ;;  %v4419_v31 = vmul.f32 %v8265_v13, %v4196_v37  ;;  %5984 = vmatpush3.bf16.msra.mxu0 %v6111_v58  ;;  %v8359_v37 = vld [vmem:[%s9239_s3 + $0x14] ss:$0 sm:$0xff] }
 0x2bd   :  { %v6176_v22 = vpop.eup %6175  ;;  %v8273_v47 = vpop.f32.mrf.mxu1  ;;  %v8332_v59 = vmul.f32 %v8246_v40, %v3479_v52  ;;  %5985 = vmatprep.subr.bf16.mxu0 %v6112_v7 }
 0x2be   :  { %3448 = vst.msk [vmem:[#allocation2 + $0x50] sm:$0xff] %vm27_vm3, %v3432_v10  ;;  %v3430_v43 = vadd.f32 %v3414_v4, %v3398_v5  ;;  %v3417_v32 = vmul.f32 0.1, %v3385_v35  ;;  %v3383_v53 = vmul.f32 %v6176_v22, %v8233_v45  ;;  %v3292_v56 = vsub.f32 0.0, %v8273_v47 }
 0x2bf   :  { %v8282_v16 = vpop.f32.mrf.mxu1  ;;  %v4490_v54 = vrot.slane %v4419_v31, 2 }
 0x2c0   :  { %3446 = vst.msk [vmem:[#allocation2 + $0x20] sm:$0xff] %vm27_vm3, %v3430_v43  ;;  %v3433_v45 = vadd.f32 %v3417_v32, %v3401_v48  ;;  %v3415_v30 = vmul.f32 0.1, %v3383_v53  ;;  %v3314_v27 = vmul.f32 1.442695, %v3292_v56  ;;  %v3290_v23 = vsub.f32 0.0, %v8282_v16  ;;  %5986 = vmatpush3.bf16.msra.mxu0 %v6112_v7 }
 0x2c1   :  { %v8290_v34 = vpop.f32.mrf.mxu1  ;;  %v8322_v19 = vsel %vm2309_vm6, %v4489_v28, %v4490_v54 }
 0x2c2   :  { %3449 = vst.msk [vmem:[#allocation2 + $0x68] sm:$0xff] %vm27_vm3, %v3433_v45  ;;  %v3431_v11 = vadd.f32 %v3415_v30, %v3399_v25  ;;  %6177 = vpow2.f32 %v3314_v27  ;;  %v3310_v39 = vmul.f32 1.442695, %v3290_v23  ;;  %v3293_v36 = vsub.f32 0.0, %v8290_v34 }
 0x2c3   :  { %v8302_v63 = vpop.f32.mrf.mxu1 }
 0x2c4   :  { %3447 = vst.msk [vmem:[#allocation2 + $0x38] sm:$0xff] %vm27_vm3, %v3431_v11  ;;  %6179 = vpow2.f32 %v3310_v39  ;;  %v3316_v20 = vmul.f32 1.442695, %v3293_v36  ;;  %v3291_v3 = vsub.f32 0.0, %v8302_v63 }
 0x2c5   :  { %v8324_v44 = vld [vmem:[#allocation2 + $0x4f] sm:$0xff]  ;;  %v4184_v24 = vld [vmem:[#allocation2 + $0x57] sm:$0x3] }
 0x2c6   :  { %6181 = vpow2.f32 %v3316_v20  ;;  %v3312_v42 = vmul.f32 1.442695, %v3291_v3  ;;  %v8336_v29 = vmul.f32 %v8300_v17, %v8324_v44  ;;  %v8340_v1 = vmul.f32 %v8260_v0, %v8324_v44 }
 0x2c7   :  { %v3464_v51 = vld [vmem:[#allocation2 + $0x1f] sm:$0xff]  ;;  %v3465_v46 = vld [vmem:[#allocation2 + $0x27] sm:$0x3]  ;;  %v8343_v4 = vmul.f32 %v8260_v0, %v4184_v24  ;;  %v8347_v35 = vmul.f32 %v8265_v13, %v8324_v44  ;;  %v8350_v21 = vmul.f32 %v8265_v13, %v4184_v24  ;;  %v8354_v41 = vmul.f32 %v8251_v15, %v8324_v44 }
 0x2c8   :  { %v3815_v10 = vld [vmem:[#allocation2 + $0x27] sm:$0x3]  ;;  %6183 = vpow2.f32 %v3312_v42  ;;  %v3501_v22 = vmul.f32 %v8251_v15, %v3464_v51  ;;  %v3523_v5 = vmul.f32 %v8239_v18, %v3464_v51  ;;  %v3524_v2 = vmul.f32 %v8239_v18, %v3465_v46 }
 0x2c9   :  { %v3672_v14 = vmul.f32 %v8246_v40, %v3464_v51  ;;  %v3673_v43 = vmul.f32 %v8246_v40, %v3465_v46  ;;  %v3851_v48 = vmul.f32 %v8367_v62, %v3464_v51  ;;  %v3888_v32 = vmul.f32 %v8359_v37, %v3464_v51 }
 0x2ca   :  { %v3588_v53 = vrot.slane %v3523_v5, 1  ;;  %v3589_v56 = vrot.slane %v3524_v2, 1  ;;  %v3889_v49 = vmul.f32 %v8359_v37, %v3815_v10  ;;  %v4037_v58 = vmul.f32 %v8372_v57, %v3464_v51 }
 0x2cb   :  { %v3737_v9 = vrot.slane %v3672_v14, 2  ;;  %v3738_v6 = vrot.slane %v3673_v43, 2  ;;  %v8380_v31 = vld [vmem:[#allocation2 + $0x37] sm:$0xff]  ;;  %v3817_v28 = vld [vmem:[#allocation2 + $0x3f] sm:$0x3]  ;;  %v3867_v52 = vadd.f32 %v3851_v48, %v3798_v8  ;;  %v3952_v45 = vrot.slane %v3888_v32, 1 }
 0x2cc   :  { %v3590_v30 = vsel %vm2159_vm5, %v3588_v53, %v3589_v56  ;;  %v3852_v27 = vmul.f32 %v8367_v62, %v8380_v31  ;;  %v3890_v23 = vmul.f32 %v8359_v37, %v8380_v31  ;;  %v3891_v25 = vmul.f32 %v8359_v37, %v3817_v28  ;;  %v4182_v48 = vld [vmem:[#allocation2 + $0x3f] sm:$0x3] }
 0x2cd   :  { %v3650_v54 = vadd.f32 %v3590_v30, %v3501_v22  ;;  %v3739_v11 = vsel %vm2309_vm6, %v3737_v9, %v3738_v6  ;;  %v3953_v39 = vrot.slane %v3889_v49, 1  ;;  %v4038_v36 = vmul.f32 %v8372_v57, %v3815_v10 }
 0x2ce   :  { %v3955_v7 = vrot.slane %v3890_v23, 1  ;;  %v3956_v20 = vrot.slane %v3891_v25, 1  ;;  %v4039_v8 = vmul.f32 %v8372_v57, %v8380_v31  ;;  %v4040_v3 = vmul.f32 %v8372_v57, %v3817_v28 }
 0x2cf   :  { %v6178_v24 = vpop.eup %6177  ;;  %v3799_v42 = vadd.f32 %v3739_v11, %v3650_v54  ;;  %v3954_v51 = vsel %vm2159_vm5, %v3952_v45, %v3953_v39  ;;  %v4101_v46 = vrot.slane %v4037_v58, 2  ;;  %v4102_v5 = vrot.slane %v4038_v36, 2 }
 0x2d0   :  { %v3340_v2 = vadd.f32 1.0, %v6178_v24  ;;  %v3957_v22 = vsel %vm2159_vm5, %v3955_v7, %v3956_v20  ;;  %v4016_v14 = vadd.f32 %v3954_v51, %v3867_v52  ;;  %v4104_v43 = vrot.slane %v4039_v8, 2 }
 0x2d1   :  { %v6180_v10 = vpop.eup %6179  ;;  %v3868_v32 = vadd.f32 %v3852_v27, %v3799_v42  ;;  %v4103_v53 = vsel %vm2309_vm6, %v4101_v46, %v4102_v5  ;;  %v4105_v56 = vrot.slane %v4040_v3, 2  ;;  %v4218_v49 = vmul.f32 %v8300_v17, %v8380_v31  ;;  %v3467_v42 = vld [vmem:[#allocation2 + $0x3f] sm:$0x3] }
 0x2d2   :  { %6185 = vrcp.f32 %v3340_v2  ;;  %v3338_v9 = vadd.f32 1.0, %v6180_v10  ;;  %v4165_v6 = vadd.f32 %v4103_v53, %v4016_v14  ;;  %v4255_v58 = vmul.f32 %v8260_v0, %v8380_v31  ;;  %v3469_v2 = vld [vmem:[#allocation2 + $0x57] sm:$0x3] }
 0x2d3   :  { %v6182_v28 = vpop.eup %6181  ;;  %v4017_v45 = vadd.f32 %v3957_v22, %v3868_v32  ;;  %v4106_v52 = vsel %vm2309_vm6, %v4104_v43, %v4105_v56  ;;  %v4256_v30 = vmul.f32 %v8260_v0, %v4182_v48  ;;  %v4322_v27 = vrot.slane %v8340_v1, 1 }
 0x2d4   :  { %6187 = vrcp.f32 %v3338_v9  ;;  %v3341_v23 = vadd.f32 1.0, %v6182_v28  ;;  %v4234_v25 = vadd.f32 %v4218_v49, %v4165_v6  ;;  %v4319_v54 = vrot.slane %v4255_v58, 1 }
 0x2d5   :  { %v6184_v11 = vpop.eup %6183  ;;  %v4166_v39 = vadd.f32 %v4106_v52, %v4017_v45  ;;  %v4320_v36 = vrot.slane %v4256_v30, 1  ;;  %v4323_v7 = vrot.slane %v8343_v4, 1  ;;  %v4404_v20 = vmul.f32 %v8265_v13, %v8380_v31 }
 0x2d6   :  { %6189 = vrcp.f32 %v3341_v23  ;;  %v3339_v8 = vadd.f32 1.0, %v6184_v11  ;;  %v4405_v3 = vmul.f32 %v8265_v13, %v4182_v48  ;;  %v4471_v24 = vrot.slane %v8347_v35, 2 }
 0x2d7   :  { %v4235_v1 = vadd.f32 %v8336_v29, %v4166_v39  ;;  %v4321_v51 = vsel %vm2159_vm5, %v4319_v54, %v4320_v36  ;;  %v4324_v46 = vsel %vm2159_vm5, %v4322_v27, %v4323_v7  ;;  %v4468_v5 = vrot.slane %v4404_v20, 2  ;;  %v8429_v54 = vld [vmem:[#allocation2 + $0x67] sm:$0xff]  ;;  %v8432_v20 = vld [vmem:[#allocation2 + $0x57] sm:$0x3] }
 0x2d8   :  { %6191 = vrcp.f32 %v3339_v8  ;;  %v4383_v4 = vadd.f32 %v4321_v51, %v4234_v25  ;;  %v4469_v22 = vrot.slane %v4405_v3, 2  ;;  %v4472_v14 = vrot.slane %v8350_v21, 2 }
 0x2d9   :  { %v4384_v43 = vadd.f32 %v4324_v46, %v4235_v1  ;;  %v3502_v48 = vmul.f32 %v8251_v15, %v8380_v31  ;;  %v3525_v35 = vmul.f32 %v8239_v18, %v8380_v31  ;;  %v3526_v29 = vmul.f32 %v8239_v18, %v3467_v42 }
 0x2da   :  { %v4470_v10 = vsel %vm2309_vm6, %v4468_v5, %v4469_v22  ;;  %v4473_v32 = vsel %vm2309_vm6, %v4471_v24, %v4472_v14  ;;  %v3527_v53 = vmul.f32 %v8239_v18, %v8324_v44  ;;  %v3528_v56 = vmul.f32 %v8239_v18, %v3469_v2 }
 0x2db   :  { %v4532_v49 = vadd.f32 %v4470_v10, %v4383_v4  ;;  %v4533_v21 = vadd.f32 %v4473_v32, %v4384_v43  ;;  %v3591_v9 = vrot.slane %v3525_v35, 1  ;;  %v3592_v6 = vrot.slane %v3526_v29, 1 }
 0x2dc   :  { %v3594_v58 = vrot.slane %v3527_v53, 1  ;;  %v3595_v28 = vrot.slane %v3528_v56, 1  ;;  %v3674_v45 = vmul.f32 %v8246_v40, %v8380_v31  ;;  %v3675_v52 = vmul.f32 %v8246_v40, %v3467_v42  ;;  %v3821_v42 = vld [vmem:[#allocation2 + $0x6f] sm:$0x3] }
 0x2dd   :  { %v4548_v30 = vpack.c.bf16 %v4533_v21, %v4532_v49  ;;  %v3593_v27 = vsel %vm2159_vm5, %v3591_v9, %v3592_v6  ;;  %v3676_v23 = vmul.f32 %v8246_v40, %v8324_v44  ;;  %v3677_v25 = vmul.f32 %v8246_v40, %v3469_v2  ;;  %v3404_v53 = vld [vmem:[#allocation2 + $0xb0] sm:$0xff] }
 0x2de   :  { %v3596_v11 = vsel %vm2159_vm5, %v3594_v58, %v3595_v28  ;;  %v3651_v39 = vadd.f32 %v3593_v27, %v3502_v48  ;;  %v3740_v36 = vrot.slane %v3674_v45, 2  ;;  %v3741_v7 = vrot.slane %v3675_v52, 2 }
 0x2df   :  { %v6186_v31 = vpop.eup %6185  ;;  %5987 = vmatprep.mubr.msk.bf16.mxu0 %vm27_vm3, %v4548_v30  ;;  %v3652_v8 = vadd.f32 %v3596_v11, %v8354_v41  ;;  %v3743_v3 = vrot.slane %v3676_v23, 2  ;;  %v3744_v24 = vrot.slane %v3677_v25, 2  ;;  %v3853_v1 = vmul.f32 %v8367_v62, %v8324_v44  ;;  %v3402_v30 = vld [vmem:[#allocation2 + $0x80] sm:$0xff] }
 0x2e0   :  { %v3388_v51 = vmul.f32 %v6186_v31, %v8273_v47  ;;  %v3742_v46 = vsel %vm2309_vm6, %v3740_v36, %v3741_v7  ;;  %v3854_v5 = vmul.f32 %v8367_v62, %v8429_v54  ;;  %v3892_v2 = vmul.f32 %v8359_v37, %v8324_v44 }
 0x2e1   :  { %v6188_v4 = vpop.eup %6187  ;;  %v3745_v22 = vsel %vm2309_vm6, %v3743_v3, %v3744_v24  ;;  %v3800_v41 = vadd.f32 %v3742_v46, %v3651_v39  ;;  %v3893_v14 = vmul.f32 %v8359_v37, %v8432_v20  ;;  %v3894_v43 = vmul.f32 %v8359_v37, %v8429_v54 }
 0x2e2   :  { %v3420_v48 = vmul.f32 0.1, %v3388_v51  ;;  %v3386_v47 = vmul.f32 %v6188_v4, %v8282_v16  ;;  %v8450_v35 = vpop.f32.mrf.mxu1  ;;  %v3801_v29 = vadd.f32 %v3745_v22, %v3652_v8  ;;  %v3895_v10 = vmul.f32 %v8359_v37, %v3821_v42  ;;  %v3405_v8 = vld [vmem:[#allocation2 + $0xc8] sm:$0xff]  ;;  %v3403_v4 = vld [vmem:[#allocation2 + $0x98] sm:$0xff] }
 0x2e3   :  { %v6190_v32 = vpop.eup %6189  ;;  %v3296_v56 = vsub.f32 0.0, %v8450_v35  ;;  %v3869_v49 = vadd.f32 %v3853_v1, %v3800_v41  ;;  %v3958_v21 = vrot.slane %v3892_v2, 1  ;;  %v3959_v9 = vrot.slane %v3893_v14, 1 }
 0x2e4   :  { %v3436_v6 = vadd.f32 %v3420_v48, %v3404_v53  ;;  %v3418_v58 = vmul.f32 0.1, %v3386_v47  ;;  %v3389_v28 = vmul.f32 %v6190_v32, %v8290_v34  ;;  %v8455_v45 = vpop.f32.mrf.mxu1  ;;  %v3870_v52 = vadd.f32 %v3854_v5, %v3801_v29 }
 0x2e5   :  { %v6192_v16 = vpop.eup %6191  ;;  %v3322_v27 = vmul.f32 1.442695, %v3296_v56  ;;  %v3294_v23 = vsub.f32 0.0, %v8455_v45  ;;  %v3960_v25 = vsel %vm2159_vm5, %v3958_v21, %v3959_v9  ;;  %v3961_v11 = vrot.slane %v3894_v43, 1 }
 0x2e6   :  { %3452 = vst.msk [vmem:[#allocation2 + $0xb0] sm:$0xff] %vm27_vm3, %v3436_v6  ;;  %v3434_v39 = vadd.f32 %v3418_v58, %v3402_v30  ;;  %v3421_v36 = vmul.f32 0.1, %v3389_v28  ;;  %v3387_v7 = vmul.f32 %v6192_v16, %v8302_v63  ;;  %v8461_v31 = vpop.f32.mrf.mxu1  ;;  %v3962_v34 = vrot.slane %v3895_v10, 1  ;;  %v4186_v10 = vld [vmem:[#allocation2 + $0x6f] sm:$0x3] }
 0x2e7   :  { %6193 = vpow2.f32 %v3322_v27  ;;  %v3318_v3 = vmul.f32 1.442695, %v3294_v23  ;;  %v3297_v24 = vsub.f32 0.0, %v8461_v31  ;;  %v4018_v1 = vadd.f32 %v3960_v25, %v3869_v49 }
 0x2e8   :  { %3450 = vst.msk [vmem:[#allocation2 + $0x80] sm:$0xff] %vm27_vm3, %v3434_v39  ;;  %v3437_v51 = vadd.f32 %v3421_v36, %v3405_v8  ;;  %v3419_v46 = vmul.f32 0.1, %v3387_v7  ;;  %v8465_v5 = vpop.f32.mrf.mxu1  ;;  %v3963_v2 = vsel %vm2159_vm5, %v3961_v11, %v3962_v34  ;;  %v4041_v63 = vmul.f32 %v8372_v57, %v8324_v44 }
 0x2e9   :  { %6195 = vpow2.f32 %v3318_v3  ;;  %v3324_v22 = vmul.f32 1.442695, %v3297_v24  ;;  %v3295_v41 = vsub.f32 0.0, %v8465_v5  ;;  %v4019_v14 = vadd.f32 %v3963_v2, %v3870_v52 }
 0x2ea   :  { %3453 = vst.msk [vmem:[#allocation2 + $0xc8] sm:$0xff] %vm27_vm3, %v3437_v51  ;;  %v3435_v43 = vadd.f32 %v3419_v46, %v3403_v4  ;;  %v4042_v48 = vmul.f32 %v8372_v57, %v8432_v20  ;;  %v4043_v47 = vmul.f32 %v8372_v57, %v8429_v54  ;;  %v4044_v29 = vmul.f32 %v8372_v57, %v3821_v42  ;;  %v3471_v46 = vld [vmem:[#allocation2 + $0x6f] sm:$0x3] }
 0x2eb   :  { %6197 = vpow2.f32 %v3324_v22  ;;  %v3320_v44 = vmul.f32 1.442695, %v3295_v41  ;;  %v4107_v32 = vrot.slane %v4041_v63, 2  ;;  %v4220_v53 = vmul.f32 %v8300_v17, %v8429_v54 }
 0x2ec   :  { %3451 = vst.msk [vmem:[#allocation2 + $0x98] sm:$0xff] %vm27_vm3, %v3435_v43  ;;  %v4108_v56 = vrot.slane %v4042_v48, 2  ;;  %v4110_v49 = vrot.slane %v4043_v47, 2  ;;  %v4111_v21 = vrot.slane %v4044_v29, 2  ;;  %v4259_v20 = vmul.f32 %v8260_v0, %v8429_v54 }
 0x2ed   :  { %6199 = vpow2.f32 %v3320_v44  ;;  %v4260_v9 = vmul.f32 %v8260_v0, %v4186_v10  ;;  %v4408_v42 = vmul.f32 %v8265_v13, %v8429_v54  ;;  %v4409_v6 = vmul.f32 %v8265_v13, %v4186_v10 }
 0x2ee   :  { %v4109_v58 = vsel %vm2309_vm6, %v4107_v32, %v4108_v56  ;;  %v4112_v28 = vsel %vm2309_vm6, %v4110_v49, %v4111_v21  ;;  %v4325_v52 = vrot.slane %v4259_v20, 1  ;;  %v3504_v16 = vmul.f32 %v8251_v15, %v8429_v54 }
 0x2ef   :  { %v4167_v30 = vadd.f32 %v4109_v58, %v4018_v1  ;;  %v4168_v27 = vadd.f32 %v4112_v28, %v4019_v14  ;;  %v8490_v23 = vld [vmem:[#allocation2 + $0x7f] sm:$0xff]  ;;  %v4188_v25 = vld [vmem:[#allocation2 + $0x87] sm:$0x3]  ;;  %v4326_v11 = vrot.slane %v4260_v9, 1  ;;  %v4474_v39 = vrot.slane %v4408_v42, 2 }
 0x2f0   :  { %v4221_v36 = vmul.f32 %v8300_v17, %v8490_v23  ;;  %v4261_v7 = vmul.f32 %v8260_v0, %v8490_v23  ;;  %v4262_v34 = vmul.f32 %v8260_v0, %v4188_v25  ;;  %v4410_v8 = vmul.f32 %v8265_v13, %v8490_v23  ;;  %v3473_v48 = vld [vmem:[#allocation2 + $0x87] sm:$0x3] }
 0x2f1   :  { %v4236_v3 = vadd.f32 %v4220_v53, %v4167_v30  ;;  %v4327_v24 = vsel %vm2159_vm5, %v4325_v52, %v4326_v11  ;;  %v4411_v1 = vmul.f32 %v8265_v13, %v4188_v25  ;;  %v4475_v51 = vrot.slane %v4409_v6, 2 }
 0x2f2   :  { %v4237_v2 = vadd.f32 %v4221_v36, %v4168_v27  ;;  %v4328_v63 = vrot.slane %v4261_v7, 1  ;;  %v4329_v4 = vrot.slane %v4262_v34, 1  ;;  %v4477_v22 = vrot.slane %v4410_v8, 2 }
 0x2f3   :  { %v4385_v41 = vadd.f32 %v4327_v24, %v4236_v3  ;;  %v4476_v14 = vsel %vm2309_vm6, %v4474_v39, %v4475_v51  ;;  %v4478_v43 = vrot.slane %v4411_v1, 2  ;;  %v3505_v47 = vmul.f32 %v8251_v15, %v8490_v23  ;;  %v8518_v24 = vld [vmem:[#allocation2 + $0x97] sm:$0xff] }
 0x2f4   :  { %v6194_v29 = vpop.eup %6193  ;;  %v4330_v10 = vsel %vm2159_vm5, %v4328_v63, %v4329_v4  ;;  %v3529_v44 = vmul.f32 %v8239_v18, %v8429_v54  ;;  %v3530_v32 = vmul.f32 %v8239_v18, %v3471_v46  ;;  %v3531_v53 = vmul.f32 %v8239_v18, %v8490_v23  ;;  %v3823_v4 = vld [vmem:[#allocation2 + $0x87] sm:$0x3] }
 0x2f5   :  { %v3344_v56 = vadd.f32 1.0, %v6194_v29  ;;  %v4386_v49 = vadd.f32 %v4330_v10, %v4237_v2  ;;  %v4479_v21 = vsel %vm2309_vm6, %v4477_v22, %v4478_v43  ;;  %v4534_v20 = vadd.f32 %v4476_v14, %v4385_v41  ;;  %v3825_v14 = vld [vmem:[#allocation2 + $0x9f] sm:$0x3] }
 0x2f6   :  { %v6196_v9 = vpop.eup %6195  ;;  %v3532_v42 = vmul.f32 %v8239_v18, %v3473_v48  ;;  %v3597_v6 = vrot.slane %v3529_v44, 1  ;;  %v3598_v58 = vrot.slane %v3530_v32, 1  ;;  %v3600_v28 = vrot.slane %v3531_v53, 1 }
 0x2f7   :  { %6201 = vrcp.f32 %v3344_v56  ;;  %v3342_v52 = vadd.f32 1.0, %v6196_v9  ;;  %v4535_v30 = vadd.f32 %v4479_v21, %v4386_v49  ;;  %v3678_v27 = vmul.f32 %v8246_v40, %v8429_v54 }
 0x2f8   :  { %v6198_v25 = vpop.eup %6197  ;;  %v3599_v11 = vsel %vm2159_vm5, %v3597_v6, %v3598_v58  ;;  %v3601_v39 = vrot.slane %v3532_v42, 1  ;;  %v3679_v36 = vmul.f32 %v8246_v40, %v3471_v46  ;;  %v3680_v7 = vmul.f32 %v8246_v40, %v8490_v23 }
 0x2f9   :  { %6203 = vrcp.f32 %v3342_v52  ;;  %v3345_v34 = vadd.f32 1.0, %v6198_v25  ;;  %v4549_v8 = vpack.c.bf16 %v4535_v30, %v4534_v20  ;;  %v3653_v3 = vadd.f32 %v3599_v11, %v3504_v16  ;;  %v8540_v30 = vld [vmem:[#allocation2 + $0xaf] sm:$0xff] }
 0x2fa   :  { %v6200_v1 = vpop.eup %6199  ;;  %v3602_v51 = vsel %vm2159_vm5, %v3600_v28, %v3601_v39  ;;  %v3681_v54 = vmul.f32 %v8246_v40, %v3473_v48  ;;  %v3746_v2 = vrot.slane %v3678_v27, 2  ;;  %v3747_v63 = vrot.slane %v3679_v36, 2 }
 0x2fb   :  { %6205 = vrcp.f32 %v3345_v34  ;;  %v3343_v22 = vadd.f32 1.0, %v6200_v1  ;;  %5988 = vmatmul.mubr.msk.bf16.vlgmr.msra.gmra.mxu0 %vm27_vm3, %v4549_v8  ;;  %v3654_v46 = vadd.f32 %v3602_v51, %v3505_v47  ;;  %v3749_v41 = vrot.slane %v3680_v7, 2 }
 0x2fc   :  { %v3748_v43 = vsel %vm2309_vm6, %v3746_v2, %v3747_v63  ;;  %v3750_v16 = vrot.slane %v3681_v54, 2  ;;  %v3855_v29 = vmul.f32 %v8367_v62, %v8490_v23  ;;  %v3856_v10 = vmul.f32 %v8367_v62, %v8518_v24 }
 0x2fd   :  { %6207 = vrcp.f32 %v3343_v22  ;;  %v3802_v48 = vadd.f32 %v3748_v43, %v3653_v3  ;;  %v3896_v44 = vmul.f32 %v8359_v37, %v8490_v23  ;;  %v3897_v32 = vmul.f32 %v8359_v37, %v3823_v4  ;;  %v4192_v3 = vld [vmem:[#allocation2 + $0xb7] sm:$0x3] }
 0x2fe   :  { %v3751_v47 = vsel %vm2309_vm6, %v3749_v41, %v3750_v16  ;;  %v3898_v53 = vmul.f32 %v8359_v37, %v8518_v24  ;;  %v3899_v56 = vmul.f32 %v8359_v37, %v3825_v14  ;;  %v4045_v49 = vmul.f32 %v8372_v57, %v8490_v23  ;;  %v4190_v23 = vld [vmem:[#allocation2 + $0x9f] sm:$0x3] }
 0x2ff   :  { %v3803_v21 = vadd.f32 %v3751_v47, %v3654_v46  ;;  %v3871_v20 = vadd.f32 %v3855_v29, %v3802_v48  ;;  %v3964_v9 = vrot.slane %v3896_v44, 1  ;;  %v3965_v42 = vrot.slane %v3897_v32, 1 }
 0x300   :  { %v3967_v6 = vrot.slane %v3898_v53, 1  ;;  %v3968_v58 = vrot.slane %v3899_v56, 1  ;;  %v4046_v28 = vmul.f32 %v8372_v57, %v3823_v4  ;;  %v4047_v52 = vmul.f32 %v8372_v57, %v8518_v24 }
 0x301   :  { %v3872_v27 = vadd.f32 %v3856_v10, %v3803_v21  ;;  %v3966_v25 = vsel %vm2159_vm5, %v3964_v9, %v3965_v42  ;;  %v4048_v11 = vmul.f32 %v8372_v57, %v3825_v14  ;;  %v4113_v39 = vrot.slane %v4045_v49, 2  ;;  %v3408_v9 = vld [vmem:[#allocation2 + $0x140] sm:$0xff] }
 0x302   :  { %v3969_v36 = vsel %vm2159_vm5, %v3967_v6, %v3968_v58  ;;  %v4020_v7 = vadd.f32 %v3966_v25, %v3871_v20  ;;  %v4114_v34 = vrot.slane %v4046_v28, 2  ;;  %v4116_v8 = vrot.slane %v4047_v52, 2 }
 0x303   :  { %v4021_v1 = vadd.f32 %v3969_v36, %v3872_v27  ;;  %v4117_v51 = vrot.slane %v4048_v11, 2  ;;  %v4222_v54 = vmul.f32 %v8300_v17, %v8518_v24  ;;  %v4223_v2 = vmul.f32 %v8300_v17, %v8540_v30 }
 0x304   :  { %v6202_v63 = vpop.eup %6201  ;;  %v4115_v4 = vsel %vm2309_vm6, %v4113_v39, %v4114_v34  ;;  %v4263_v22 = vmul.f32 %v8260_v0, %v8518_v24  ;;  %v4264_v46 = vmul.f32 %v8260_v0, %v4190_v23  ;;  %v4265_v41 = vmul.f32 %v8260_v0, %v8540_v30 }
 0x305   :  { %v3392_v14 = vmul.f32 %v6202_v63, %v8450_v35  ;;  %v4118_v43 = vsel %vm2309_vm6, %v4116_v8, %v4117_v51  ;;  %v4169_v16 = vadd.f32 %v4115_v4, %v4020_v7  ;;  %v4266_v29 = vmul.f32 %v8260_v0, %v4192_v3 }
 0x306   :  { %v6204_v10 = vpop.eup %6203  ;;  %v4170_v48 = vadd.f32 %v4118_v43, %v4021_v1  ;;  %v4331_v44 = vrot.slane %v4263_v22, 1  ;;  %v4332_v32 = vrot.slane %v4264_v46, 1  ;;  %v4334_v47 = vrot.slane %v4265_v41, 1  ;;  %v3477_v43 = vld [vmem:[#allocation2 + $0xb7] sm:$0x3] }
 0x307   :  { %v3424_v53 = vmul.f32 0.1, %v3392_v14  ;;  %v3390_v56 = vmul.f32 %v6204_v10, %v8455_v45  ;;  %v4238_v49 = vadd.f32 %v4222_v54, %v4169_v16  ;;  %v4335_v21 = vrot.slane %v4266_v29, 1  ;;  %v3406_v45 = vld [vmem:[#allocation2 + $0x110] sm:$0xff]  ;;  %v3475_v54 = vld [vmem:[#allocation2 + $0x9f] sm:$0x3] }
 0x308   :  { %v6206_v20 = vpop.eup %6205  ;;  %v4239_v42 = vadd.f32 %v4223_v2, %v4170_v48  ;;  %v4333_v35 = vsel %vm2159_vm5, %v4331_v44, %v4332_v32  ;;  %v4412_v6 = vmul.f32 %v8265_v13, %v8518_v24  ;;  %v4413_v58 = vmul.f32 %v8265_v13, %v4190_v23  ;;  %v3407_v16 = vld [vmem:[#allocation2 + $0x128] sm:$0xff] }
 0x309   :  { %v3440_v28 = vadd.f32 %v3424_v53, %v3408_v9  ;;  %v3422_v52 = vmul.f32 0.1, %v3390_v56  ;;  %v3393_v27 = vmul.f32 %v6206_v20, %v8461_v31  ;;  %v4336_v25 = vsel %vm2159_vm5, %v4334_v47, %v4335_v21  ;;  %v3409_v31 = vld [vmem:[#allocation2 + $0x158] sm:$0xff] }
 0x30a   :  { %v6208_v11 = vpop.eup %6207  ;;  %v4387_v39 = vadd.f32 %v4333_v35, %v4238_v49  ;;  %v4388_v36 = vadd.f32 %v4336_v25, %v4239_v42  ;;  %v4414_v7 = vmul.f32 %v8265_v13, %v8540_v30  ;;  %v4415_v34 = vmul.f32 %v8265_v13, %v4192_v3 }
 0x30b   :  { %3456 = vst.msk [vmem:[#allocation2 + $0x140] sm:$0xff] %vm27_vm3, %v3440_v28  ;;  %v3438_v8 = vadd.f32 %v3422_v52, %v3406_v45  ;;  %v3425_v1 = vmul.f32 0.1, %v3393_v27  ;;  %v3391_v23 = vmul.f32 %v6208_v11, %v8465_v5  ;;  %v4480_v51 = vrot.slane %v4412_v6, 2 }
 0x30c   :  { %v8570_v2 = vpop.f32.mrf.mxu1  ;;  %v4481_v63 = vrot.slane %v4413_v58, 2  ;;  %v4483_v4 = vrot.slane %v4414_v7, 2  ;;  %v4484_v22 = vrot.slane %v4415_v34, 2  ;;  %v3506_v46 = vmul.f32 %v8251_v15, %v8518_v24 }
 0x30d   :  { %3454 = vst.msk [vmem:[#allocation2 + $0x110] sm:$0xff] %vm27_vm3, %v3438_v8  ;;  %v3441_v3 = vadd.f32 %v3425_v1, %v3409_v31  ;;  %v3423_v41 = vmul.f32 0.1, %v3391_v23  ;;  %v3300_v14 = vsub.f32 0.0, %v8570_v2  ;;  %v3507_v5 = vmul.f32 %v8251_v15, %v8540_v30  ;;  %v3828_v1 = vld [vmem:[#allocation2 + $0xc7] sm:$0xff] }
 0x30e   :  { %v8578_v29 = vpop.f32.mrf.mxu1  ;;  %v4482_v10 = vsel %vm2309_vm6, %v4480_v51, %v4481_v63  ;;  %v4485_v48 = vsel %vm2309_vm6, %v4483_v4, %v4484_v22  ;;  %v3533_v44 = vmul.f32 %v8239_v18, %v8518_v24  ;;  %v3534_v32 = vmul.f32 %v8239_v18, %v3475_v54  ;;  %v3827_v31 = vld [vmem:[#allocation2 + $0xb7] sm:$0x3]  ;;  %v3829_v63 = vld [vmem:[#allocation2 + $0xcf] sm:$0x3] }
 0x30f   :  { %3457 = vst.msk [vmem:[#allocation2 + $0x158] sm:$0xff] %vm27_vm3, %v3441_v3  ;;  %v3439_v47 = vadd.f32 %v3423_v41, %v3407_v16  ;;  %v3330_v53 = vmul.f32 1.442695, %v3300_v14  ;;  %v3298_v56 = vsub.f32 0.0, %v8578_v29  ;;  %v4536_v49 = vadd.f32 %v4482_v10, %v4387_v39 }
 0x310   :  { %v8587_v15 = vpop.f32.mrf.mxu1  ;;  %v4537_v21 = vadd.f32 %v4485_v48, %v4388_v36  ;;  %v3535_v20 = vmul.f32 %v8239_v18, %v8540_v30  ;;  %v3536_v9 = vmul.f32 %v8239_v18, %v3477_v43  ;;  %v3603_v42 = vrot.slane %v3533_v44, 1 }
 0x311   :  { %3455 = vst.msk [vmem:[#allocation2 + $0x128] sm:$0xff] %vm27_vm3, %v3439_v47  ;;  %6209 = vpow2.f32 %v3330_v53  ;;  %v3326_v35 = vmul.f32 1.442695, %v3298_v56  ;;  %v3301_v6 = vsub.f32 0.0, %v8587_v15  ;;  %v3604_v58 = vrot.slane %v3534_v32, 1 }
 0x312   :  { %v8594_v28 = vpop.f32.mrf.mxu1  ;;  %v4550_v52 = vpack.c.bf16 %v4537_v21, %v4536_v49  ;;  %v3606_v27 = vrot.slane %v3535_v20, 1  ;;  %v3607_v25 = vrot.slane %v3536_v9, 1  ;;  %v3682_v11 = vmul.f32 %v8246_v40, %v8518_v24 }
 0x313   :  { %6211 = vpow2.f32 %v3326_v35  ;;  %v3332_v45 = vmul.f32 1.442695, %v3301_v6  ;;  %v3299_v18 = vsub.f32 0.0, %v8594_v28  ;;  %v3605_v39 = vsel %vm2159_vm5, %v3603_v42, %v3604_v58  ;;  %v4194_v35 = vld [vmem:[#allocation2 + $0xcf] sm:$0x3] }
 0x314   :  { %5991 = vmatprep.mubr.msk.bf16.mxu0 %vm27_vm3, %v4550_v52  ;;  %v3608_v36 = vsel %vm2159_vm5, %v3606_v27, %v3607_v25  ;;  %v3655_v7 = vadd.f32 %v3605_v39, %v3506_v46  ;;  %v3683_v34 = vmul.f32 %v8246_v40, %v3475_v54  ;;  %v3684_v8 = vmul.f32 %v8246_v40, %v8540_v30 }
 0x315   :  { %6213 = vpow2.f32 %v3332_v45  ;;  %v3328_v23 = vmul.f32 1.442695, %v3299_v18  ;;  %v3656_v24 = vadd.f32 %v3608_v36, %v3507_v5  ;;  %v3685_v51 = vmul.f32 %v8246_v40, %v3477_v43 }
 0x316   :  { %v3752_v4 = vrot.slane %v3682_v11, 2  ;;  %v3753_v22 = vrot.slane %v3683_v34, 2  ;;  %v3755_v3 = vrot.slane %v3684_v8, 2  ;;  %v3857_v41 = vmul.f32 %v8367_v62, %v8540_v30 }
 0x317   :  { %6215 = vpow2.f32 %v3328_v23  ;;  %v3756_v46 = vrot.slane %v3685_v51, 2  ;;  %v3858_v54 = vmul.f32 %v8367_v62, %v3828_v1  ;;  %v3900_v14 = vmul.f32 %v8359_v37, %v8540_v30 }
 0x318   :  { %v3754_v16 = vsel %vm2309_vm6, %v3752_v4, %v3753_v22  ;;  %v3901_v5 = vmul.f32 %v8359_v37, %v3827_v31  ;;  %v3902_v40 = vmul.f32 %v8359_v37, %v3828_v1  ;;  %v3903_v43 = vmul.f32 %v8359_v37, %v3829_v63 }
 0x319   :  { %v3757_v10 = vsel %vm2309_vm6, %v3755_v3, %v3756_v46  ;;  %v3804_v48 = vadd.f32 %v3754_v16, %v3655_v7  ;;  %v3970_v44 = vrot.slane %v3900_v14, 1  ;;  %v4049_v32 = vmul.f32 %v8372_v57, %v8540_v30  ;;  %v3481_v14 = vld [vmem:[#allocation2 + $0x117] sm:$0x3] }
 0x31a   :  { %v3805_v47 = vadd.f32 %v3757_v10, %v3656_v24  ;;  %v3971_v53 = vrot.slane %v3901_v5, 1  ;;  %v3973_v56 = vrot.slane %v3902_v40, 1  ;;  %v3974_v49 = vrot.slane %v3903_v43, 1  ;;  %v8640_v40 = vld [vmem:[%s9239_s3 + $0x10] ss:$0 sm:$0xff] }
 0x31b   :  { %v3873_v21 = vadd.f32 %v3857_v41, %v3804_v48  ;;  %v4050_v20 = vmul.f32 %v8372_v57, %v3827_v31  ;;  %v4051_v9 = vmul.f32 %v8372_v57, %v3828_v1  ;;  %v4052_v42 = vmul.f32 %v8372_v57, %v3829_v63  ;;  %v3480_v31 = vld [vmem:[#allocation2 + $0x10f] sm:$0xff] }
 0x31c   :  { %v3874_v6 = vadd.f32 %v3858_v54, %v3805_v47  ;;  %v3972_v58 = vsel %vm2159_vm5, %v3970_v44, %v3971_v53  ;;  %v3975_v52 = vsel %vm2159_vm5, %v3973_v56, %v3974_v49  ;;  %v4119_v27 = vrot.slane %v4049_v32, 2  ;;  %v8646_v44 = vld [vmem:[%s9239_s3 + $0x11] ss:$0 sm:$0xff] }
 0x31d   :  { %v4022_v25 = vadd.f32 %v3972_v58, %v3873_v21  ;;  %v4120_v30 = vrot.slane %v4050_v20, 2  ;;  %v4122_v11 = vrot.slane %v4051_v9, 2  ;;  %v4123_v45 = vrot.slane %v4052_v42, 2 }
 0x31e   :  { %v6210_v18 = vpop.eup %6209  ;;  %v4023_v39 = vadd.f32 %v3975_v52, %v3874_v6  ;;  %v4224_v36 = vmul.f32 %v8300_v17, %v3828_v1  ;;  %v4267_v7 = vmul.f32 %v8260_v0, %v3828_v1  ;;  %v4268_v34 = vmul.f32 %v8260_v0, %v4194_v35  ;;  %v8632_v17 = vld [vmem:[%s9239_s3 + $0x18] ss:$0 sm:$0xff] }
 0x31f   :  { %v3348_v8 = vadd.f32 1.0, %v6210_v18  ;;  %v4121_v23 = vsel %vm2309_vm6, %v4119_v27, %v4120_v30  ;;  %v4124_v24 = vsel %vm2309_vm6, %v4122_v11, %v4123_v45  ;;  %v4416_v51 = vmul.f32 %v8265_v13, %v3828_v1  ;;  %v3831_v52 = vld [vmem:[#allocation2 + $0x117] sm:$0x3] }
 0x320   :  { %v6212_v63 = vpop.eup %6211  ;;  %v4171_v4 = vadd.f32 %v4121_v23, %v4022_v25  ;;  %v4172_v22 = vadd.f32 %v4124_v24, %v4023_v39  ;;  %v4337_v3 = vrot.slane %v4267_v7, 1  ;;  %v4338_v41 = vrot.slane %v4268_v34, 1  ;;  %v3833_v25 = vld [vmem:[#allocation2 + $0x12f] sm:$0x3] }
 0x321   :  { %6217 = vrcp.f32 %v3348_v8  ;;  %v3346_v46 = vadd.f32 1.0, %v6212_v63  ;;  %v4417_v0 = vmul.f32 %v8632_v17, %v4194_v35  ;;  %v4486_v54 = vrot.slane %v4416_v51, 2 }
 0x322   :  { %v6214_v16 = vpop.eup %6213  ;;  %v4240_v5 = vadd.f32 %v4224_v36, %v4171_v4  ;;  %v4241_v13 = vadd.f32 %v8308_v55, %v4172_v22  ;;  %v4339_v1 = vsel %vm2159_vm5, %v4337_v3, %v4338_v41  ;;  %v3509_v43 = vmul.f32 %v8640_v40, %v3480_v31 }
 0x323   :  { %6219 = vrcp.f32 %v3346_v46  ;;  %v3349_v10 = vadd.f32 1.0, %v6214_v16  ;;  %v4487_v48 = vrot.slane %v4417_v0, 2  ;;  %v3539_v32 = vmul.f32 %v8646_v44, %v3480_v31 }
 0x324   :  { %v6216_v55 = vpop.eup %6215  ;;  %v4389_v47 = vadd.f32 %v4339_v1, %v4240_v5  ;;  %v4390_v53 = vadd.f32 %v8311_v50, %v4241_v13  ;;  %v3540_v56 = vmul.f32 %v8646_v44, %v3481_v14  ;;  %v3611_v49 = vsel %vm2159_vm5, %v3609_v61, %v3610_v33  ;;  %v8659_v50 = vld [vmem:[#allocation2 + $0x127] sm:$0xff]  ;;  %v8688_v5 = vld [vmem:[#allocation2 + $0x13f] sm:$0xff] }
 0x325   :  { %6221 = vrcp.f32 %v3349_v10  ;;  %v3347_v21 = vadd.f32 1.0, %v6216_v55  ;;  %v4488_v20 = vsel %vm2309_vm6, %v4486_v54, %v4487_v48  ;;  %v3612_v9 = vrot.slane %v3539_v32, 1  ;;  %v4198_v10 = vld [vmem:[#allocation2 + $0x12f] sm:$0x3] }
 0x326   :  { %v4538_v42 = vadd.f32 %v4488_v20, %v4389_v47  ;;  %v4539_v35 = vadd.f32 %v8322_v19, %v4390_v53  ;;  %v3613_v6 = vrot.slane %v3540_v56, 1  ;;  %v3657_v58 = vadd.f32 %v3611_v49, %v8314_v26  ;;  %v8695_v53 = vld [vmem:[%s9239_s3 + $0x16] ss:$0 sm:$0xff] }
 0x327   :  { %6223 = vrcp.f32 %v3347_v21  ;;  %v3688_v38 = vmul.f32 %v8664_v60, %v3480_v31  ;;  %v3689_v61 = vmul.f32 %v8664_v60, %v3481_v14  ;;  %v3758_v33 = vrot.slane %v8329_v12, 2  ;;  %v4200_v21 = vld [vmem:[#allocation2 + $0x147] sm:$0x3] }
 0x328   :  { %v4551_v27 = vpack.c.bf16 %v4539_v35, %v4538_v42  ;;  %v3614_v19 = vsel %vm2159_vm5, %v3612_v9, %v3613_v6  ;;  %v3759_v26 = vrot.slane %v8332_v59, 2  ;;  %v3859_v30 = vmul.f32 %v8367_v62, %v3480_v31  ;;  %v3412_v42 = vld [vmem:[#allocation2 + $0x1a0] sm:$0xff] }
 0x329   :  { %v3658_v11 = vadd.f32 %v3614_v19, %v3509_v43  ;;  %v3761_v45 = vrot.slane %v3688_v38, 2  ;;  %v3762_v18 = vrot.slane %v3689_v61, 2  ;;  %v3860_v39 = vmul.f32 %v8367_v62, %v8659_v50 }
 0x32a   :  { %5992 = vmatmul.mubr.msk.bf16.gmra.mxu0 %vm27_vm3, %v4551_v27  ;;  %v3760_v36 = vsel %vm2309_vm6, %v3758_v33, %v3759_v26  ;;  %v3904_v12 = vmul.f32 %v8359_v37, %v3480_v31  ;;  %v3905_v7 = vmul.f32 %v8359_v37, %v3831_v52  ;;  %v3906_v59 = vmul.f32 %v8359_v37, %v8659_v50  ;;  %v3410_v26 = vld [vmem:[#allocation2 + $0x170] sm:$0xff] }
 0x32b   :  { %v3763_v34 = vsel %vm2309_vm6, %v3761_v45, %v3762_v18  ;;  %v3806_v8 = vadd.f32 %v3760_v36, %v3657_v58  ;;  %v3907_v23 = vmul.f32 %v8359_v37, %v3833_v25  ;;  %v4053_v24 = vmul.f32 %v8372_v57, %v3480_v31  ;;  %v8707_v58 = vld [vmem:[%s9239_s3 + $0x17] ss:$0 sm:$0xff] }
 0x32c   :  { %v3807_v51 = vadd.f32 %v3763_v34, %v3658_v11  ;;  %v3976_v62 = vrot.slane %v3904_v12, 1  ;;  %v3977_v63 = vrot.slane %v3905_v7, 1  ;;  %v3979_v4 = vrot.slane %v3906_v59, 1  ;;  %v3413_v7 = vld [vmem:[#allocation2 + $0x1b8] sm:$0xff] }
 0x32d   :  { %v3875_v22 = vadd.f32 %v3859_v30, %v3806_v8  ;;  %v3980_v3 = vrot.slane %v3907_v23, 1  ;;  %v4054_v41 = vmul.f32 %v8372_v57, %v3831_v52  ;;  %v4055_v46 = vmul.f32 %v8372_v57, %v8659_v50 }
 0x32e   :  { %v6218_v0 = vpop.eup %6217  ;;  %v3876_v54 = vadd.f32 %v3860_v39, %v3807_v51  ;;  %v3978_v14 = vsel %vm2159_vm5, %v3976_v62, %v3977_v63  ;;  %v4056_v16 = vmul.f32 %v8372_v57, %v3833_v25  ;;  %v4125_v37 = vrot.slane %v4053_v24, 2  ;;  %v3411_v63 = vld [vmem:[#allocation2 + $0x188] sm:$0xff] }
 0x32f   :  { %v3396_v31 = vmul.f32 %v6218_v0, %v8570_v2  ;;  %v3981_v13 = vsel %vm2159_vm5, %v3979_v4, %v3980_v3  ;;  %v4024_v1 = vadd.f32 %v3978_v14, %v3875_v22  ;;  %v4126_v43 = vrot.slane %v4054_v41, 2  ;;  %v3483_v41 = vld [vmem:[#allocation2 + $0x12f] sm:$0x3] }
 0x330   :  { %v6220_v48 = vpop.eup %6219  ;;  %v4025_v32 = vadd.f32 %v3981_v13, %v3876_v54  ;;  %v4128_v55 = vrot.slane %v4055_v46, 2  ;;  %v4129_v47 = vrot.slane %v4056_v16, 2  ;;  %v4226_v57 = vmul.f32 %v8695_v53, %v8659_v50  ;;  %v3485_v16 = vld [vmem:[#allocation2 + $0x147] sm:$0x3] }
 0x331   :  { %v3428_v56 = vmul.f32 0.1, %v3396_v31  ;;  %v3394_v2 = vmul.f32 %v6220_v48, %v8578_v29  ;;  %v4127_v49 = vsel %vm2309_vm6, %v4125_v37, %v4126_v43  ;;  %v4227_v20 = vmul.f32 %v8695_v53, %v8688_v5 }
 0x332   :  { %v6222_v9 = vpop.eup %6221  ;;  %v4130_v35 = vsel %vm2309_vm6, %v4128_v55, %v4129_v47  ;;  %v4173_v6 = vadd.f32 %v4127_v49, %v4024_v1  ;;  %v4271_v38 = vmul.f32 %v8707_v58, %v8659_v50  ;;  %v4272_v29 = vmul.f32 %v8707_v58, %v4198_v10 }
 0x333   :  { %v3444_v61 = vadd.f32 %v3428_v56, %v3412_v42  ;;  %v3426_v33 = vmul.f32 0.1, %v3394_v2  ;;  %v3397_v52 = vmul.f32 %v6222_v9, %v8587_v15  ;;  %v4174_v27 = vadd.f32 %v4130_v35, %v4025_v32 }
 0x334   :  { %v6224_v19 = vpop.eup %6223  ;;  %v4242_v25 = vadd.f32 %v4226_v57, %v4173_v6  ;;  %v4273_v30 = vmul.f32 %v8707_v58, %v8688_v5  ;;  %v4274_v11 = vmul.f32 %v8707_v58, %v4200_v21  ;;  %v4343_v45 = vrot.slane %v4271_v38, 1  ;;  %v8747_v38 = vld [vmem:[#allocation2 + $0x157] sm:$0xff] }
 0x335   :  { %3460 = vst.msk [vmem:[#allocation2 + $0x1a0] sm:$0xff] %vm27_vm3, %v3444_v61  ;;  %v3442_v18 = vadd.f32 %v3426_v33, %v3410_v26  ;;  %v3429_v39 = vmul.f32 0.1, %v3397_v52  ;;  %v3395_v36 = vmul.f32 %v6224_v19, %v8594_v28  ;;  %v4243_v12 = vadd.f32 %v4227_v20, %v4174_v27  ;;  %v3835_v52 = vld [vmem:[#allocation2 + $0x147] sm:$0x3] }
 0x336   :  { %v4344_v59 = vrot.slane %v4272_v29, 1  ;;  %v4346_v15 = vrot.slane %v4273_v30, 1  ;;  %v4347_v34 = vrot.slane %v4274_v11, 1  ;;  %v4420_v8 = vmul.f32 %v8632_v17, %v8659_v50  ;;  %v8753_v27 = vld [vmem:[%s9239_s3 + $0x13] ss:$0 sm:$0xff] }
 0x337   :  { %3458 = vst.msk [vmem:[#allocation2 + $0x170] sm:$0xff] %vm27_vm3, %v3442_v18  ;;  %v3445_v23 = vadd.f32 %v3429_v39, %v3413_v7  ;;  %v3427_v24 = vmul.f32 0.1, %v3395_v36  ;;  %v4421_v51 = vmul.f32 %v8632_v17, %v4198_v10  ;;  %v4422_v62 = vmul.f32 %v8632_v17, %v8688_v5  ;;  %v8764_v36 = vld [vmem:[%s9239_s3 + $0x14] ss:$0 sm:$0xff] }
 0x338   :  { %v4345_v28 = vsel %vm2159_vm5, %v4343_v45, %v4344_v59  ;;  %v4348_v4 = vsel %vm2159_vm5, %v4346_v15, %v4347_v34  ;;  %v4423_v22 = vmul.f32 %v8632_v17, %v4200_v21  ;;  %v4492_v3 = vrot.slane %v4420_v8, 2 }
 0x339   :  { %3461 = vst.msk [vmem:[#allocation2 + $0x1b8] sm:$0xff] %vm27_vm3, %v3445_v23  ;;  %v3443_v46 = vadd.f32 %v3427_v24, %v3411_v63  ;;  %v4391_v0 = vadd.f32 %v4345_v28, %v4242_v25  ;;  %v4392_v54 = vadd.f32 %v4348_v4, %v4243_v12  ;;  %v4493_v14 = vrot.slane %v4421_v51, 2  ;;  %v8777_v51 = vld [vmem:[%s9239_s3 + $0x15] ss:$0 sm:$0xff] }
 0x33a   :  { %v4495_v37 = vrot.slane %v4422_v62, 2  ;;  %v4496_v31 = vrot.slane %v4423_v22, 2  ;;  %v3510_v13 = vmul.f32 %v8640_v40, %v8659_v50  ;;  %v3511_v1 = vmul.f32 %v8640_v40, %v8688_v5 }
 0x33b   :  { %3459 = vst.msk [vmem:[#allocation2 + $0x188] sm:$0xff] %vm27_vm3, %v3443_v46  ;;  %v4494_v43 = vsel %vm2309_vm6, %v4492_v3, %v4493_v14  ;;  %v3541_v10 = vmul.f32 %v8646_v44, %v8659_v50  ;;  %v3542_v48 = vmul.f32 %v8646_v44, %v3483_v41  ;;  %v3543_v32 = vmul.f32 %v8646_v44, %v8688_v5 }
 0x33c   :  { %v4497_v55 = vsel %vm2309_vm6, %v4495_v37, %v4496_v31  ;;  %v4540_v47 = vadd.f32 %v4494_v43, %v4391_v0  ;;  %v3544_v57 = vmul.f32 %v8646_v44, %v3485_v16  ;;  %v3690_v56 = vmul.f32 %v8664_v60, %v8659_v50  ;;  %v3837_v50 = vld [vmem:[#allocation2 + $0x15f] sm:$0x3] }
 0x33d   :  { %v4541_v2 = vadd.f32 %v4497_v55, %v4392_v54  ;;  %v3615_v49 = vrot.slane %v3541_v10, 1  ;;  %v3616_v21 = vrot.slane %v3542_v48, 1  ;;  %v3618_v20 = vrot.slane %v3543_v32, 1  ;;  %v4202_v31 = vld [vmem:[#allocation2 + $0x15f] sm:$0x3] }
 0x33e   :  { %v3619_v9 = vrot.slane %v3544_v57, 1  ;;  %v3691_v42 = vmul.f32 %v8664_v60, %v3483_v41  ;;  %v3692_v35 = vmul.f32 %v8664_v60, %v8688_v5  ;;  %v3693_v6 = vmul.f32 %v8664_v60, %v3485_v16  ;;  %v8785_v54 = vld [vmem:[#allocation2 + $0x16f] sm:$0xff]  ;;  %v4204_v48 = vld [vmem:[#allocation2 + $0x177] sm:$0x3] }
 0x33f   :  { %v4552_v29 = vpack.c.bf16 %v4541_v2, %v4540_v47  ;;  %v3617_v61 = vsel %vm2159_vm5, %v3615_v49, %v3616_v21  ;;  %v3764_v33 = vrot.slane %v3690_v56, 2  ;;  %v3861_v19 = vmul.f32 %v8753_v27, %v8688_v5 }
 0x340   :  { %v3620_v26 = vsel %vm2159_vm5, %v3618_v20, %v3619_v9  ;;  %v3659_v25 = vadd.f32 %v3617_v61, %v3510_v13  ;;  %v3765_v30 = vrot.slane %v3691_v42, 2  ;;  %v3767_v11 = vrot.slane %v3692_v35, 2 }
 0x341   :  { %5995 = vmatprep.mubr.msk.bf16.mxu0 %vm27_vm3, %v4552_v29  ;;  %v3660_v45 = vadd.f32 %v3620_v26, %v3511_v1  ;;  %v3768_v18 = vrot.slane %v3693_v6, 2  ;;  %v3862_v39 = vmul.f32 %v8753_v27, %v8747_v38  ;;  %v3908_v12 = vmul.f32 %v8764_v36, %v8688_v5 }
 0x342   :  { %v3766_v7 = vsel %vm2309_vm6, %v3764_v33, %v3765_v30  ;;  %v3909_v59 = vmul.f32 %v8764_v36, %v3835_v52  ;;  %v3910_v15 = vmul.f32 %v8764_v36, %v8747_v38  ;;  %v3911_v34 = vmul.f32 %v8764_v36, %v3837_v50 }
 0x343   :  { %v3769_v8 = vsel %vm2309_vm6, %v3767_v11, %v3768_v18  ;;  %v3808_v23 = vadd.f32 %v3766_v7, %v3659_v25  ;;  %v3982_v24 = vrot.slane %v3908_v12, 1  ;;  %v4057_v62 = vmul.f32 %v8777_v51, %v8688_v5  ;;  %v3487_v18 = vld [vmem:[#allocation2 + $0x15f] sm:$0x3] }
 0x344   :  { %v3809_v63 = vadd.f32 %v3769_v8, %v3660_v45  ;;  %v3983_v28 = vrot.slane %v3909_v59, 1  ;;  %v3985_v4 = vrot.slane %v3910_v15, 1  ;;  %v3986_v22 = vrot.slane %v3911_v34, 1  ;;  %v3489_v59 = vld [vmem:[#allocation2 + $0x177] sm:$0x3] }
 0x345   :  { %v3877_v3 = vadd.f32 %v3861_v19, %v3808_v23  ;;  %v4058_v41 = vmul.f32 %v8777_v51, %v3835_v52  ;;  %v4059_v46 = vmul.f32 %v8777_v51, %v8747_v38  ;;  %v4060_v0 = vmul.f32 %v8777_v51, %v3837_v50 }
 0x346   :  { %v3878_v14 = vadd.f32 %v3862_v39, %v3809_v63  ;;  %v3984_v16 = vsel %vm2159_vm5, %v3982_v24, %v3983_v28  ;;  %v3987_v37 = vsel %vm2159_vm5, %v3985_v4, %v3986_v22  ;;  %v4131_v5 = vrot.slane %v4057_v62, 2 }
 0x347   :  { %v4026_v13 = vadd.f32 %v3984_v16, %v3877_v3  ;;  %v4132_v1 = vrot.slane %v4058_v41, 2  ;;  %v4134_v43 = vrot.slane %v4059_v46, 2  ;;  %v4135_v10 = vrot.slane %v4060_v0, 2 }
 0x348   :  { %v4027_v32 = vadd.f32 %v3987_v37, %v3878_v14  ;;  %v4228_v55 = vmul.f32 %v8695_v53, %v8747_v38  ;;  %v4229_v47 = vmul.f32 %v8695_v53, %v8785_v54  ;;  %v4275_v57 = vmul.f32 %v8707_v58, %v8747_v38 }
 0x349   :  { %v4133_v56 = vsel %vm2309_vm6, %v4131_v5, %v4132_v1  ;;  %v4136_v2 = vsel %vm2309_vm6, %v4134_v43, %v4135_v10  ;;  %v4276_v49 = vmul.f32 %v8707_v58, %v4202_v31  ;;  %v4277_v21 = vmul.f32 %v8707_v58, %v8785_v54  ;;  %v8827_v43 = vld [vmem:[#allocation2 + $0x187] sm:$0xff] }
 0x34a   :  { %v4175_v20 = vadd.f32 %v4133_v56, %v4026_v13  ;;  %v4176_v9 = vadd.f32 %v4136_v2, %v4027_v32  ;;  %v4278_v42 = vmul.f32 %v8707_v58, %v4204_v48  ;;  %v4349_v35 = vrot.slane %v4275_v57, 1 }
 0x34b   :  { %v4350_v6 = vrot.slane %v4276_v49, 1  ;;  %v4352_v29 = vrot.slane %v4277_v21, 1  ;;  %v4424_v61 = vmul.f32 %v8632_v17, %v8747_v38  ;;  %v4425_v33 = vmul.f32 %v8632_v17, %v4202_v31  ;;  %v3841_v49 = vld [vmem:[#allocation2 + $0x18f] sm:$0x3] }
 0x34c   :  { %v4244_v52 = vadd.f32 %v4228_v55, %v4175_v20  ;;  %v4245_v50 = vadd.f32 %v4229_v47, %v4176_v9  ;;  %v4353_v19 = vrot.slane %v4278_v42, 1  ;;  %v4426_v26 = vmul.f32 %v8632_v17, %v8785_v54 }
 0x34d   :  { %v4351_v25 = vsel %vm2159_vm5, %v4349_v35, %v4350_v6  ;;  %v4427_v30 = vmul.f32 %v8632_v17, %v4204_v48  ;;  %v4498_v11 = vrot.slane %v4424_v61, 2  ;;  %v4499_v45 = vrot.slane %v4425_v33, 2 }
 0x34e   :  { %v4354_v39 = vsel %vm2159_vm5, %v4352_v29, %v4353_v19  ;;  %v4393_v12 = vadd.f32 %v4351_v25, %v4244_v52  ;;  %v4501_v7 = vrot.slane %v4426_v26, 2  ;;  %v3512_v15 = vmul.f32 %v8640_v40, %v8747_v38 }
 0x34f   :  { %v4394_v34 = vadd.f32 %v4354_v39, %v4245_v50  ;;  %v4500_v8 = vsel %vm2309_vm6, %v4498_v11, %v4499_v45  ;;  %v4502_v23 = vrot.slane %v4427_v30, 2  ;;  %v3513_v24 = vmul.f32 %v8640_v40, %v8785_v54 }
 0x350   :  { %v4542_v62 = vadd.f32 %v4500_v8, %v4393_v12  ;;  %v3545_v63 = vmul.f32 %v8646_v44, %v8747_v38  ;;  %v3546_v28 = vmul.f32 %v8646_v44, %v3487_v18  ;;  %v3547_v4 = vmul.f32 %v8646_v44, %v8785_v54  ;;  %v4206_v8 = vld [vmem:[#allocation2 + $0x18f] sm:$0x3] }
 0x351   :  { %v4503_v22 = vsel %vm2309_vm6, %v4501_v7, %v4502_v23  ;;  %v3548_v3 = vmul.f32 %v8646_v44, %v3489_v59  ;;  %v3694_v41 = vmul.f32 %v8664_v60, %v8747_v38  ;;  %v3695_v46 = vmul.f32 %v8664_v60, %v3487_v18  ;;  %v3839_v38 = vld [vmem:[#allocation2 + $0x177] sm:$0x3]  ;;  %v8850_v7 = vld [vmem:[#allocation2 + $0x19f] sm:$0xff] }
 0x352   :  { %v4543_v0 = vadd.f32 %v4503_v22, %v4394_v34  ;;  %v3621_v14 = vrot.slane %v3545_v63, 1  ;;  %v3622_v16 = vrot.slane %v3546_v28, 1  ;;  %v3624_v37 = vrot.slane %v3547_v4, 1  ;;  %v4208_v28 = vld [vmem:[#allocation2 + $0x1a7] sm:$0x3] }
 0x353   :  { %v3625_v5 = vrot.slane %v3548_v3, 1  ;;  %v3696_v31 = vmul.f32 %v8664_v60, %v8785_v54  ;;  %v3697_v13 = vmul.f32 %v8664_v60, %v3489_v59  ;;  %v3770_v1 = vrot.slane %v3694_v41, 2 }
 0x354   :  { %v4553_v10 = vpack.c.bf16 %v4543_v0, %v4542_v62  ;;  %v3623_v48 = vsel %vm2159_vm5, %v3621_v14, %v3622_v16  ;;  %v3771_v32 = vrot.slane %v3695_v46, 2  ;;  %v3863_v55 = vmul.f32 %v8753_v27, %v8785_v54 }
 0x355   :  { %v3626_v47 = vsel %vm2159_vm5, %v3624_v37, %v3625_v5  ;;  %v3661_v57 = vadd.f32 %v3623_v48, %v3512_v15  ;;  %v3773_v56 = vrot.slane %v3696_v31, 2  ;;  %v3774_v2 = vrot.slane %v3697_v13, 2 }
 0x356   :  { %5996 = vmatmul.mubr.msk.bf16.gmra.mxu0 %vm27_vm3, %v4553_v10  ;;  %v3662_v21 = vadd.f32 %v3626_v47, %v3513_v24  ;;  %v3772_v20 = vsel %vm2309_vm6, %v3770_v1, %v3771_v32  ;;  %v3864_v9 = vmul.f32 %v8753_v27, %v8827_v43  ;;  %v3912_v42 = vmul.f32 %v8764_v36, %v8785_v54 }
 0x357   :  { %v3775_v35 = vsel %vm2309_vm6, %v3773_v56, %v3774_v2  ;;  %v3810_v6 = vadd.f32 %v3772_v20, %v3661_v57  ;;  %v3913_v29 = vmul.f32 %v8764_v36, %v3839_v38  ;;  %v3914_v61 = vmul.f32 %v8764_v36, %v8827_v43 }
 0x358   :  { %v3811_v33 = vadd.f32 %v3775_v35, %v3662_v21  ;;  %v3915_v52 = vmul.f32 %v8764_v36, %v3841_v49  ;;  %v3988_v50 = vrot.slane %v3912_v42, 1  ;;  %v4061_v19 = vmul.f32 %v8777_v51, %v8785_v54  ;;  %v3491_v21 = vld [vmem:[#allocation2 + $0x18f] sm:$0x3] }
 0x359   :  { %v3879_v26 = vadd.f32 %v3863_v55, %v3810_v6  ;;  %v3989_v25 = vrot.slane %v3913_v29, 1  ;;  %v3991_v30 = vrot.slane %v3914_v61, 1  ;;  %v4062_v11 = vmul.f32 %v8777_v51, %v3839_v38  ;;  %v3493_v29 = vld [vmem:[#allocation2 + $0x1a7] sm:$0x3] }
 0x35a   :  { %v3880_v45 = vadd.f32 %v3864_v9, %v3811_v33  ;;  %v3992_v18 = vrot.slane %v3915_v52, 1  ;;  %v4063_v39 = vmul.f32 %v8777_v51, %v8827_v43  ;;  %v4064_v12 = vmul.f32 %v8777_v51, %v3841_v49 }
 0x35b   :  { %v3990_v59 = vsel %vm2159_vm5, %v3988_v50, %v3989_v25  ;;  %v4137_v15 = vrot.slane %v4061_v19, 2  ;;  %v4138_v34 = vrot.slane %v4062_v11, 2  ;;  %v4230_v54 = vmul.f32 %v8695_v53, %v8827_v43 }
 0x35c   :  { %v3993_v23 = vsel %vm2159_vm5, %v3991_v30, %v3992_v18  ;;  %v4028_v24 = vadd.f32 %v3990_v59, %v3879_v26  ;;  %v4140_v62 = vrot.slane %v4063_v39, 2  ;;  %v4141_v63 = vrot.slane %v4064_v12, 2 }
 0x35d   :  { %v4029_v4 = vadd.f32 %v3993_v23, %v3880_v45  ;;  %v4139_v22 = vsel %vm2309_vm6, %v4137_v15, %v4138_v34  ;;  %v4231_v3 = vmul.f32 %v8695_v53, %v8850_v7  ;;  %v4279_v41 = vmul.f32 %v8707_v58, %v8827_v43  ;;  %v3844_v34 = vld [vmem:[#allocation2 + $0x1b7] sm:$0xff] }
 0x35e   :  { %v4142_v46 = vsel %vm2309_vm6, %v4140_v62, %v4141_v63  ;;  %v4177_v0 = vadd.f32 %v4139_v22, %v4028_v24  ;;  %v4280_v14 = vmul.f32 %v8707_v58, %v4206_v8  ;;  %v4281_v16 = vmul.f32 %v8707_v58, %v8850_v7  ;;  %v3843_v62 = vld [vmem:[#allocation2 + $0x1a7] sm:$0x3] }
 0x35f   :  { %v4178_v37 = vadd.f32 %v4142_v46, %v4029_v4  ;;  %v4282_v5 = vmul.f32 %v8707_v58, %v4208_v28  ;;  %v4355_v31 = vrot.slane %v4279_v41, 1  ;;  %v4428_v13 = vmul.f32 %v8632_v17, %v8827_v43  ;;  %v3845_v4 = vld [vmem:[#allocation2 + $0x1bf] sm:$0x3] }
 0x360   :  { %v4246_v1 = vadd.f32 %v4230_v54, %v4177_v0  ;;  %v4356_v10 = vrot.slane %v4280_v14, 1  ;;  %v4358_v48 = vrot.slane %v4281_v16, 1  ;;  %v4429_v32 = vmul.f32 %v8632_v17, %v4206_v8 }
 0x361   :  { %v4247_v38 = vadd.f32 %v4231_v3, %v4178_v37  ;;  %v4359_v55 = vrot.slane %v4282_v5, 1  ;;  %v4430_v47 = vmul.f32 %v8632_v17, %v8850_v7  ;;  %v4431_v57 = vmul.f32 %v8632_v17, %v4208_v28 }
 0x362   :  { %v4357_v56 = vsel %vm2159_vm5, %v4355_v31, %v4356_v10  ;;  %v4504_v2 = vrot.slane %v4428_v13, 2  ;;  %v4505_v49 = vrot.slane %v4429_v32, 2  ;;  %v3514_v20 = vmul.f32 %v8640_v40, %v8827_v43 }
 0x363   :  { %v4360_v9 = vsel %vm2159_vm5, %v4358_v48, %v4359_v55  ;;  %v4395_v42 = vadd.f32 %v4357_v56, %v4246_v1  ;;  %v4507_v35 = vrot.slane %v4430_v47, 2  ;;  %v4508_v6 = vrot.slane %v4431_v57, 2 }
 0x364   :  { %v4396_v61 = vadd.f32 %v4360_v9, %v4247_v38  ;;  %v4506_v33 = vsel %vm2309_vm6, %v4504_v2, %v4505_v49  ;;  %v3515_v52 = vmul.f32 %v8640_v40, %v8850_v7  ;;  %v3549_v50 = vmul.f32 %v8646_v44, %v8827_v43 }
 0x365   :  { %v4509_v19 = vsel %vm2309_vm6, %v4507_v35, %v4508_v6  ;;  %v4544_v26 = vadd.f32 %v4506_v33, %v4395_v42  ;;  %v3550_v25 = vmul.f32 %v8646_v44, %v3491_v21  ;;  %v3551_v30 = vmul.f32 %v8646_v44, %v8850_v7 }
 0x366   :  { %v4545_v11 = vadd.f32 %v4509_v19, %v4396_v61  ;;  %v3552_v45 = vmul.f32 %v8646_v44, %v3493_v29  ;;  %v3627_v18 = vrot.slane %v3549_v50, 1  ;;  %v3698_v39 = vmul.f32 %v8664_v60, %v8827_v43 }
 0x367   :  { %v3628_v12 = vrot.slane %v3550_v25, 1  ;;  %v3630_v40 = vrot.slane %v3551_v30, 1  ;;  %v3699_v59 = vmul.f32 %v8664_v60, %v3491_v21  ;;  %v3700_v15 = vmul.f32 %v8664_v60, %v8850_v7  ;;  %v4210_v21 = vld [vmem:[#allocation2 + $0x1bf] sm:$0x3] }
 0x368   :  { %v4554_v8 = vpack.c.bf16 %v4545_v11, %v4544_v26  ;;  %v3631_v54 = vrot.slane %v3552_v45, 1  ;;  %v3701_v23 = vmul.f32 %v8664_v60, %v3493_v29  ;;  %v3776_v24 = vrot.slane %v3698_v39, 2 }
 0x369   :  { %v3629_v44 = vsel %vm2159_vm5, %v3627_v18, %v3628_v12  ;;  %v3777_v63 = vrot.slane %v3699_v59, 2  ;;  %v3779_v28 = vrot.slane %v3700_v15, 2  ;;  %v3865_v43 = vmul.f32 %v8753_v27, %v8850_v7 }
 0x36a   :  { %5999 = vmatprep.mubr.msk.bf16.mxu0 %vm27_vm3, %v4554_v8  ;;  %v3632_v22 = vsel %vm2159_vm5, %v3630_v40, %v3631_v54  ;;  %v3663_v3 = vadd.f32 %v3629_v44, %v3514_v20  ;;  %v3780_v41 = vrot.slane %v3701_v23, 2  ;;  %v3866_v46 = vmul.f32 %v8753_v27, %v3844_v34 }
 0x36b   :  { %v3664_v0 = vadd.f32 %v3632_v22, %v3515_v52  ;;  %v3778_v60 = vsel %vm2309_vm6, %v3776_v24, %v3777_v63  ;;  %v3916_v14 = vmul.f32 %v8764_v36, %v8850_v7  ;;  %v3917_v16 = vmul.f32 %v8764_v36, %v3843_v62 }
 0x36c   :  { %v3781_v37 = vsel %vm2309_vm6, %v3779_v28, %v3780_v41  ;;  %v3812_v5 = vadd.f32 %v3778_v60, %v3663_v3  ;;  %v3918_v31 = vmul.f32 %v8764_v36, %v3844_v34  ;;  %v3919_v13 = vmul.f32 %v8764_v36, %v3845_v4  ;;  %v4211_v36 = vld [vmem:[#allocation2 + $0x1cf] sm:$0xff] }
 0x36d   :  { %v3813_v1 = vadd.f32 %v3781_v37, %v3664_v0  ;;  %v3994_v10 = vrot.slane %v3916_v14, 1  ;;  %v3995_v48 = vrot.slane %v3917_v16, 1  ;;  %v4065_v27 = vmul.f32 %v8777_v51, %v8850_v7  ;;  %v4212_v7 = vld [vmem:[#allocation2 + $0x1d7] sm:$0x3] }
 0x36e   :  { %v3881_v32 = vadd.f32 %v3865_v43, %v3812_v5  ;;  %v3997_v38 = vrot.slane %v3918_v31, 1  ;;  %v3998_v55 = vrot.slane %v3919_v13, 1  ;;  %v4066_v47 = vmul.f32 %v8777_v51, %v3843_v62 }
 0x36f   :  { %v3882_v57 = vadd.f32 %v3866_v46, %v3813_v1  ;;  %v3996_v56 = vsel %vm2159_vm5, %v3994_v10, %v3995_v48  ;;  %v4067_v2 = vmul.f32 %v8777_v51, %v3844_v34  ;;  %v4068_v49 = vmul.f32 %v8777_v51, %v3845_v4 }
 0x370   :  { %v3999_v20 = vsel %vm2159_vm5, %v3997_v38, %v3998_v55  ;;  %v4030_v9 = vadd.f32 %v3996_v56, %v3881_v32  ;;  %v4143_v42 = vrot.slane %v4065_v27, 2  ;;  %v4144_v35 = vrot.slane %v4066_v47, 2 }
 0x371   :  { %v4031_v6 = vadd.f32 %v3999_v20, %v3882_v57  ;;  %v4146_v29 = vrot.slane %v4067_v2, 2  ;;  %v4147_v61 = vrot.slane %v4068_v49, 2  ;;  %v4232_v33 = vmul.f32 %v8695_v53, %v3844_v34 }
 0x372   :  { %v4145_v52 = vsel %vm2309_vm6, %v4143_v42, %v4144_v35  ;;  %v4233_v50 = vmul.f32 %v8695_v53, %v4211_v36  ;;  %v4283_v19 = vmul.f32 %v8707_v58, %v3844_v34  ;;  %v4284_v51 = vmul.f32 %v8707_v58, %v4210_v21  ;;  %v4824_v35 = vld [vmem:[#allocation2 + $0x50] sm:$0xff] }
 0x373   :  { %v4148_v26 = vsel %vm2309_vm6, %v4146_v29, %v4147_v61  ;;  %v4179_v25 = vadd.f32 %v4145_v52, %v4030_v9  ;;  %v4285_v30 = vmul.f32 %v8707_v58, %v4211_v36  ;;  %v4286_v11 = vmul.f32 %v8707_v58, %v4212_v7 }
 0x374   :  { %v4180_v45 = vadd.f32 %v4148_v26, %v4031_v6  ;;  %v4361_v18 = vrot.slane %v4283_v19, 1  ;;  %v4362_v39 = vrot.slane %v4284_v51, 1  ;;  %v4432_v12 = vmul.f32 %v8632_v17, %v3844_v34  ;;  %v4825_v51 = vld [vmem:[#allocation2 + $0x68] sm:$0xff] }
 0x375   :  { %v4248_v40 = vadd.f32 %v4232_v33, %v4179_v25  ;;  %v4364_v59 = vrot.slane %v4285_v30, 1  ;;  %v4365_v15 = vrot.slane %v4286_v11, 1  ;;  %v4433_v53 = vmul.f32 %v8632_v17, %v4210_v21  ;;  %v4822_v33 = vld [vmem:[#allocation2 + $0x20] sm:$0xff]  ;;  %v4823_v30 = vld [vmem:[#allocation2 + $0x38] sm:$0xff] }
 0x376   :  { %v4249_v8 = vadd.f32 %v4233_v50, %v4180_v45  ;;  %v4363_v54 = vsel %vm2159_vm5, %v4361_v18, %v4362_v39  ;;  %v4434_v23 = vmul.f32 %v8632_v17, %v4211_v36  ;;  %v4435_v24 = vmul.f32 %v8632_v17, %v4212_v7 }
 0x377   :  { %v4366_v62 = vsel %vm2159_vm5, %v4364_v59, %v4365_v15  ;;  %v4397_v58 = vadd.f32 %v4363_v54, %v4248_v40  ;;  %v4510_v44 = vrot.slane %v4432_v12, 2  ;;  %v4511_v63 = vrot.slane %v4433_v53, 2 }
 0x378   :  { %v4398_v28 = vadd.f32 %v4366_v62, %v4249_v8  ;;  %v4513_v4 = vrot.slane %v4434_v23, 2  ;;  %v4514_v34 = vrot.slane %v4435_v24, 2 }
 0x379   :  { %v4512_v43 = vsel %vm2309_vm6, %v4510_v44, %v4511_v63 }
 0x37a   :  { %v4515_v22 = vsel %vm2309_vm6, %v4513_v4, %v4514_v34  ;;  %v4546_v3 = vadd.f32 %v4512_v43, %v4397_v58 }
 0x37b   :  { %v4547_v41 = vadd.f32 %v4515_v22, %v4398_v28 }
 0x37d   :  { %v4555_v46 = vpack.c.bf16 %v4547_v41, %v4546_v3  ;;  %v6113_v3 = vld [vmem:[%s9241_s5 + $0x70] ss:$8 sps:$4 sm:$0xff]  }
 0x37f   :  { %6000 = vmatmul.mubr.msk.bf16.gmra.mxu0 %vm27_vm3, %v4555_v46  ;;  %v6115_v46 = vld [vmem:[%s9241_s5 + $0x74] ss:$8 sps:$4 sm:$0xff]  }
 0x380   :  { %5298 = vmatprep.subr.bf16.mxu1 %v6115_v46  ;;  %v6145_v46 = vld [vmem:[%s9241_s5 + $0xd4] ss:$8 sps:$4 sm:$0xff]  }
 0x381   :  { %5299 = vmatpush1.bf16.msra.mxu1 %v6113_v3 }
 0x3bb   :  { %v5989_v0 = vpop.f32.mrf.mxu0 }
 0x3bc   :  { %v4712_v60 = vsub.f32 0.0, %v5989_v0 }
 0x3bd   :  { %v4647_v17 = vpop.f32.mrf.mxu0 }
 0x3be   :  { %v4730_v14 = vmul.f32 1.442695, %v4712_v60  ;;  %v4710_v16 = vsub.f32 0.0, %v4647_v17  ;;  %v6118_v60 = vld [vmem:[%s9241_s5 + $0x64] ss:$8 sps:$4 sm:$0xff]  }
 0x3bf   :  { %v5990_v37 = vpop.f32.mrf.mxu0  ;;  %5300 = vmatprep.subr.bf16.mxu1 %v6118_v60 }
 0x3c0   :  { %6225 = vpow2.f32 %v4730_v14  ;;  %v4726_v5 = vmul.f32 1.442695, %v4710_v16  ;;  %v4713_v31 = vsub.f32 0.0, %v5990_v37  ;;  %v6116_v16 = vld [vmem:[%s9241_s5 + $0x60] ss:$8 sps:$4 sm:$0xff]  }
 0x3c1   :  { %v4650_v13 = vpop.f32.mrf.mxu0  ;;  %5301 = vmatpush1.bf16.msra.mxu1 %v6116_v16 }
 0x3c2   :  { %6227 = vpow2.f32 %v4726_v5  ;;  %v4732_v1 = vmul.f32 1.442695, %v4713_v31  ;;  %v4711_v10 = vsub.f32 0.0, %v4650_v13  ;;  %v6121_v5 = vld [vmem:[%s9241_s5 + $0x54] ss:$8 sps:$4 sm:$0xff]  }
 0x3c3   :  { %5302 = vmatprep.subr.bf16.mxu1 %v6121_v5  ;;  %v6146_v5 = vld [vmem:[%s9241_s5 + $0xc0] ss:$8 sps:$4 sm:$0xff]  }
 0x3c4   :  { %6229 = vpow2.f32 %v4732_v1  ;;  %v4728_v48 = vmul.f32 1.442695, %v4711_v10  ;;  %v6124_v1 = vld [vmem:[%s9241_s5 + $0x44] ss:$8 sps:$4 sm:$0xff]   ;;  %v6122_v10 = vld [vmem:[%s9241_s5 + $0x40] ss:$8 sps:$4 sm:$0xff]  }
 0x3c6   :  { %6231 = vpow2.f32 %v4728_v48  ;;  %v6127_v48 = vld [vmem:[%s9241_s5 + $0x34] ss:$8 sps:$4 sm:$0xff]  }
 0x3cd   :  { %v6226_v27 = vpop.eup %6225 }
 0x3ce   :  { %v4760_v32 = vadd.f32 1.0, %v6226_v27 }
 0x3cf   :  { %v6228_v38 = vpop.eup %6227 }
 0x3d0   :  { %6233 = vrcp.f32 %v4760_v32  ;;  %v4758_v55 = vadd.f32 1.0, %v6228_v38  ;;  %v6125_v38 = vld [vmem:[%s9241_s5 + $0x30] ss:$8 sps:$4 sm:$0xff]  }
 0x3d1   :  { %v6230_v47 = vpop.eup %6229 }
 0x3d2   :  { %6235 = vrcp.f32 %v4758_v55  ;;  %v4761_v57 = vadd.f32 1.0, %v6230_v47  ;;  %v6130_v47 = vld [vmem:[%s9241_s5 + $0x24] ss:$8 sps:$4 sm:$0xff]  }
 0x3d3   :  { %v6232_v56 = vpop.eup %6231 }
 0x3d4   :  { %6237 = vrcp.f32 %v4761_v57  ;;  %v4759_v2 = vadd.f32 1.0, %v6232_v56 }
 0x3d6   :  { %6239 = vrcp.f32 %v4759_v2 }
 0x3dd   :  { %v6234_v49 = vpop.eup %6233 }
 0x3de   :  { %v4808_v21 = vmul.f32 %v6234_v49, %v5989_v0  ;;  %v4828_v49 = vld [vmem:[#allocation2 + $0xb0] sm:$0xff] }
 0x3df   :  { %v6236_v36 = vpop.eup %6235 }
 0x3e0   :  { %v4840_v20 = vmul.f32 0.1, %v4808_v21  ;;  %v4806_v9 = vmul.f32 %v6236_v36, %v4647_v17 }
 0x3e1   :  { %v6238_v42 = vpop.eup %6237 }
 0x3e2   :  { %v4856_v7 = vadd.f32 %v4840_v20, %v4824_v35  ;;  %v4838_v6 = vmul.f32 0.1, %v4806_v9  ;;  %v4809_v29 = vmul.f32 %v6238_v42, %v5990_v37  ;;  %v6128_v9 = vld [vmem:[%s9241_s5 + $0x20] ss:$8 sps:$4 sm:$0xff]  }
 0x3e3   :  { %v6240_v61 = vpop.eup %6239  ;;  %v4826_v35 = vld [vmem:[#allocation2 + $0x80] sm:$0xff] }
 0x3e4   :  { %4872 = vst.msk [vmem:[#allocation2 + $0x50] sm:$0xff] %vm27_vm3, %v4856_v7  ;;  %v4854_v52 = vadd.f32 %v4838_v6, %v4822_v33  ;;  %v4841_v50 = vmul.f32 0.1, %v4809_v29  ;;  %v4807_v19 = vmul.f32 %v6240_v61, %v4650_v13  ;;  %v6119_v13 = vld [vmem:[%s9241_s5 + $0x50] ss:$8 sps:$4 sm:$0xff]   ;;  %v4829_v33 = vld [vmem:[#allocation2 + $0xc8] sm:$0xff] }
 0x3e5   :  { %5303 = vmatpush1.bf16.msra.mxu1 %v6119_v13  ;;  %v6133_v7 = vld [vmem:[%s9241_s5 + $0x14] ss:$8 sps:$4 sm:$0xff]  }
 0x3e6   :  { %4870 = vst.msk [vmem:[#allocation2 + $0x20] sm:$0xff] %vm27_vm3, %v4854_v52  ;;  %v4857_v26 = vadd.f32 %v4841_v50, %v4825_v51  ;;  %v4839_v25 = vmul.f32 0.1, %v4807_v19  ;;  %5304 = vmatprep.subr.bf16.mxu1 %v6124_v1  ;;  %v6131_v19 = vld [vmem:[%s9241_s5 + $0x10] ss:$8 sps:$4 sm:$0xff]  }
 0x3e7   :  { %v4827_v51 = vld [vmem:[#allocation2 + $0x98] sm:$0xff] }
 0x3e8   :  { %4873 = vst.msk [vmem:[#allocation2 + $0x68] sm:$0xff] %vm27_vm3, %v4857_v26  ;;  %v4855_v11 = vadd.f32 %v4839_v25, %v4823_v30  ;;  %v6136_v25 = vld [vmem:[%s9241_s5 + $0x4] ss:$8 sps:$4 sm:$0xff]   ;;  %v6151_v13 = vld [vmem:[%s9241_s5 + $0xb4] ss:$8 sps:$4 sm:$0xff]  }
 0x3e9   :  { %5305 = vmatpush1.bf16.msra.mxu1 %v6122_v10 }
 0x3ea   :  { %4871 = vst.msk [vmem:[#allocation2 + $0x38] sm:$0xff] %vm27_vm3, %v4855_v11  ;;  %v5993_v45 = vpop.f32.mrf.mxu0  ;;  %5306 = vmatprep.subr.bf16.mxu1 %v6127_v48 }
 0x3eb   :  { %v4716_v18 = vsub.f32 0.0, %v5993_v45  ;;  %v4935_v62 = vld [vmem:[#allocation2 + $0x50] sm:$0xff] }
 0x3ec   :  { %v4663_v39 = vpop.f32.mrf.mxu0 }
 0x3ed   :  { %v4738_v12 = vmul.f32 1.442695, %v4716_v18  ;;  %v4714_v40 = vsub.f32 0.0, %v4663_v39  ;;  %v4886_v58 = vld [vmem:[#allocation2 + $0x20] sm:$0xff]  ;;  %5307 = vmatpush1.bf16.msra.mxu1 %v6125_v38 }
 0x3ee   :  { %v8933_v59 = vpop.f32.mrf.mxu0  ;;  %5308 = vmatprep.subr.bf16.mxu1 %v6130_v47  ;;  %v6154_v38 = vld [vmem:[%s9241_s5 + $0xa4] ss:$8 sps:$4 sm:$0xff]   ;;  %v6152_v47 = vld [vmem:[%s9241_s5 + $0xa0] ss:$8 sps:$4 sm:$0xff]  }
 0x3ef   :  { %6241 = vpow2.f32 %v4738_v12  ;;  %v4734_v15 = vmul.f32 1.442695, %v4714_v40  ;;  %v4717_v53 = vsub.f32 0.0, %v8933_v59  ;;  %v8939_v4 = vld [vmem:[#allocation2 + $0x68] sm:$0xff] }
 0x3f0   :  { %v8936_v8 = vpop.f32.mrf.mxu0  ;;  %v4903_v34 = vpack.c.bf16 %v8939_v4, %v4935_v62  ;;  %v6134_v12 = vld [vmem:[%s9241_s5] ss:$8 sps:$4 sm:$0xff]  }
 0x3f1   :  { %6243 = vpow2.f32 %v4734_v15  ;;  %v4740_v54 = vmul.f32 1.442695, %v4717_v53  ;;  %v4715_v23 = vsub.f32 0.0, %v8936_v8  ;;  %v4934_v24 = vld [vmem:[#allocation2 + $0x38] sm:$0xff]  ;;  %5309 = vmatpush1.bf16.msra.mxu1 %v6128_v9 }
 0x3f2   :  { %v4950_v44 = vpack.c.bf16 %v4935_v62, %v4934_v24  ;;  %v4902_v63 = vpack.c.bf16 %v4934_v24, %v4886_v58  ;;  %5310 = vmatprep.subr.bf16.mxu1 %v6133_v7  ;;  %v6137_v58 = vld [vmem:[%s9241_s5 + $0xf0] ss:$8 sps:$4 sm:$0xff]   ;;  %v4832_v7 = vld [vmem:[#allocation2 + $0x140] sm:$0xff] }
 0x3f3   :  { %6245 = vpow2.f32 %v4740_v54  ;;  %v4736_v28 = vmul.f32 1.442695, %v4715_v23 }
 0x3f4   :  { %4990 = vrot.lane.b32.xlu1 %v4950_v44, %s6307_s13  ;;  %5014 = vrot.lane.b32.xlu0 %v4902_v63, %s6307_s13  ;;  %v6142_v44 = vld [vmem:[%s9241_s5 + $0xe4] ss:$8 sps:$4 sm:$0xff]  }
 0x3f5   :  { %6247 = vpow2.f32 %v4736_v28  ;;  %5311 = vmatpush1.bf16.msra.mxu1 %v6131_v19 }
 0x3f6   :  { %5312 = vmatprep.subr.bf16.mxu1 %v6136_v25  ;;  %v4833_v25 = vld [vmem:[#allocation2 + $0x158] sm:$0xff] }
 0x3f8   :  { %5016 = vrot.lane.b32.xlu0 %v4903_v34, %s6307_s13 }
 0x3f9   :  { %5313 = vmatpush1.bf16.msra.mxu1 %v6134_v12 }
 0x3fc   :  { %v6242_v43 = vpop.eup %6241 }
 0x3fd   :  { %v4764_v22 = vadd.f32 1.0, %v6242_v43 }
 0x3fe   :  { %v6244_v41 = vpop.eup %6243 }
 0x3ff   :  { %6249 = vrcp.f32 %v4764_v22  ;;  %v4762_v0 = vadd.f32 1.0, %v6244_v41  ;;  %v4941_v41 = vld [vmem:[#allocation2 + $0xe0] sm:$0xff] }
 0x400   :  { %v6246_v17 = vpop.eup %6245 }
 0x401   :  { %6251 = vrcp.f32 %v4762_v0  ;;  %v4765_v14 = vadd.f32 1.0, %v6246_v17  ;;  %v6143_v17 = vld [vmem:[%s9241_s5 + $0xd0] ss:$8 sps:$4 sm:$0xff]  }
 0x402   :  { %v6248_v37 = vpop.eup %6247 }
 0x403   :  { %6253 = vrcp.f32 %v4765_v14  ;;  %v4763_v31 = vadd.f32 1.0, %v6248_v37  ;;  %v6148_v14 = vld [vmem:[%s9241_s5 + $0xc4] ss:$8 sps:$4 sm:$0xff]  }
 0x405   :  { %6255 = vrcp.f32 %v4763_v31 }
 0x40c   :  { %v6250_v27 = vpop.eup %6249 }
 0x40d   :  { %v4812_v32 = vmul.f32 %v6250_v27, %v5993_v45  ;;  %v6149_v27 = vld [vmem:[%s9241_s5 + $0xb0] ss:$8 sps:$4 sm:$0xff]  }
 0x40e   :  { %v6252_v55 = vpop.eup %6251 }
 0x40f   :  { %v4844_v57 = vmul.f32 0.1, %v4812_v32  ;;  %v4810_v56 = vmul.f32 %v6252_v55, %v4663_v39 }
 0x410   :  { %v6254_v2 = vpop.eup %6253 }
 0x411   :  { %v4860_v21 = vadd.f32 %v4844_v57, %v4828_v49  ;;  %v4842_v36 = vmul.f32 0.1, %v4810_v56  ;;  %v4813_v20 = vmul.f32 %v6254_v2, %v8933_v59  ;;  %v6139_v59 = vld [vmem:[%s9241_s5 + $0xf4] ss:$8 sps:$4 sm:$0xff]   ;;  %v6155_v56 = vld [vmem:[%s9241_s5 + $0x90] ss:$8 sps:$4 sm:$0xff]  }
 0x412   :  { %v6256_v42 = vpop.eup %6255  ;;  %5314 = vmatprep.subr.bf16.mxu1 %v6139_v59  ;;  %v6157_v57 = vld [vmem:[%s9241_s5 + $0x94] ss:$8 sps:$4 sm:$0xff]   ;;  %v6160_v2 = vld [vmem:[%s9241_s5 + $0x84] ss:$8 sps:$4 sm:$0xff]  }
 0x413   :  { %4876 = vst.msk [vmem:[#allocation2 + $0xb0] sm:$0xff] %vm27_vm3, %v4860_v21  ;;  %v4858_v6 = vadd.f32 %v4842_v36, %v4826_v35  ;;  %v4845_v29 = vmul.f32 0.1, %v4813_v20  ;;  %v4811_v61 = vmul.f32 %v6256_v42, %v8936_v8  ;;  %5315 = vmatpush2.bf16.msra.mxu1 %v6137_v58  ;;  %v6158_v36 = vld [vmem:[%s9241_s5 + $0x80] ss:$8 sps:$4 sm:$0xff]  }
 0x414   :  { %5316 = vmatprep.subr.bf16.mxu1 %v6142_v44 }
 0x415   :  { %4874 = vst.msk [vmem:[#allocation2 + $0x80] sm:$0xff] %vm27_vm3, %v4858_v6  ;;  %v4861_v52 = vadd.f32 %v4845_v29, %v4829_v33  ;;  %v4843_v50 = vmul.f32 0.1, %v4811_v61 }
 0x416   :  { %v8991_v26 = vpop.f32.mrf.mxu0 }
 0x417   :  { %4877 = vst.msk [vmem:[#allocation2 + $0xc8] sm:$0xff] %vm27_vm3, %v4861_v52  ;;  %v4859_v30 = vadd.f32 %v4843_v50, %v4827_v51  ;;  %v4720_v11 = vsub.f32 0.0, %v8991_v26  ;;  %v4830_v52 = vld [vmem:[#allocation2 + $0x110] sm:$0xff] }
 0x418   :  { %v8998_v45 = vpop.f32.mrf.mxu0 }
 0x419   :  { %4875 = vst.msk [vmem:[#allocation2 + $0x98] sm:$0xff] %vm27_vm3, %v4859_v30  ;;  %v4746_v18 = vmul.f32 1.442695, %v4720_v11  ;;  %v4718_v39 = vsub.f32 0.0, %v8998_v45 }
 0x41a   :  { %v9005_v40 = vpop.f32.mrf.mxu0  ;;  %v4939_v34 = vld [vmem:[#allocation2 + $0xb0] sm:$0xff] }
 0x41b   :  { %6257 = vpow2.f32 %v4746_v18  ;;  %v4742_v15 = vmul.f32 1.442695, %v4718_v39  ;;  %v4721_v53 = vsub.f32 0.0, %v9005_v40  ;;  %v4831_v39 = vld [vmem:[#allocation2 + $0x128] sm:$0xff] }
 0x41c   :  { %v9011_v8 = vpop.f32.mrf.mxu0  ;;  %v4937_v54 = vld [vmem:[#allocation2 + $0x80] sm:$0xff] }
 0x41d   :  { %6259 = vpow2.f32 %v4742_v15  ;;  %v4748_v23 = vmul.f32 1.442695, %v4721_v53  ;;  %v4719_v24 = vsub.f32 0.0, %v9011_v8  ;;  %v4951_v62 = vpack.c.bf16 %v4937_v54, %v8939_v4  ;;  %v6140_v4 = vld [vmem:[%s9241_s5 + $0xe0] ss:$8 sps:$4 sm:$0xff]  }
 0x41e   :  { %v4940_v3 = vld [vmem:[#allocation2 + $0xc8] sm:$0xff]  ;;  %5317 = vmatpush2.bf16.msra.mxu1 %v6140_v4 }
 0x41f   :  { %6261 = vpow2.f32 %v4748_v23  ;;  %v4744_v63 = vmul.f32 1.442695, %v4719_v24  ;;  %4992 = vrot.lane.b32.xlu1 %v4951_v62, %s6307_s13  ;;  %v4953_v0 = vpack.c.bf16 %v4941_v41, %v4940_v3  ;;  %v4905_v60 = vpack.c.bf16 %v4940_v3, %v4939_v34  ;;  %5318 = vmatprep.subr.bf16.mxu1 %v6145_v46 }
 0x420   :  { %v4938_v28 = vld [vmem:[#allocation2 + $0x98] sm:$0xff] }
 0x421   :  { %6263 = vpow2.f32 %v4744_v63  ;;  %v4952_v43 = vpack.c.bf16 %v4939_v34, %v4938_v28  ;;  %v4904_v22 = vpack.c.bf16 %v4938_v28, %v4937_v54 }
 0x422   :  { %5319 = vmatpush2.bf16.msra.mxu1 %v6143_v17 }
 0x423   :  { %4994 = vrot.lane.b32.xlu1 %v4952_v43, %s6307_s13  ;;  %5018 = vrot.lane.b32.xlu0 %v4904_v22, %s6307_s13 }
 0x424   :  { %5320 = vmatprep.subr.bf16.mxu1 %v6148_v14 }
 0x426   :  { %5321 = vmatpush2.bf16.msra.mxu1 %v6146_v5  ;;  %v4958_v5 = vld [vmem:[#allocation2 + $0x39] sm:$0xff] }
 0x427   :  { %4996 = vrot.lane.b32.xlu1 %v4953_v0, %s6307_s13  ;;  %5020 = vrot.lane.b32.xlu0 %v4905_v60, %s6307_s13 }
 0x428   :  { %v6258_v16 = vpop.eup %6257  ;;  %5322 = vmatprep.subr.bf16.mxu1 %v6151_v13 }
 0x429   :  { %v4768_v37 = vadd.f32 1.0, %v6258_v16 }
 0x42a   :  { %v6260_v31 = vpop.eup %6259  ;;  %5323 = vmatpush2.bf16.msra.mxu1 %v6149_v27 }
 0x42b   :  { %6265 = vrcp.f32 %v4768_v37  ;;  %v4766_v1 = vadd.f32 1.0, %v6260_v31  ;;  %5324 = vmatprep.subr.bf16.mxu1 %v6154_v38 }
 0x42c   :  { %v6262_v10 = vpop.eup %6261 }
 0x42d   :  { %6267 = vrcp.f32 %v4766_v1  ;;  %v4769_v48 = vadd.f32 1.0, %v6262_v10  ;;  %v4959_v10 = vld [vmem:[#allocation2 + $0x51] sm:$0xff] }
 0x42e   :  { %v6264_v32 = vpop.eup %6263  ;;  %5325 = vmatpush2.bf16.msra.mxu1 %v6152_v47  ;;  %v4974_v38 = vpack.c.bf16 %v4959_v10, %v4958_v5 }
 0x42f   :  { %6269 = vrcp.f32 %v4769_v48  ;;  %v4767_v55 = vadd.f32 1.0, %v6264_v32  ;;  %5326 = vmatprep.subr.bf16.mxu1 %v6157_v57  ;;  %v4910_v48 = vld [vmem:[#allocation2 + $0x21] sm:$0xff] }
 0x430   :  { %v4836_v32 = vld [vmem:[#allocation2 + $0x1a0] sm:$0xff] }
 0x431   :  { %6271 = vrcp.f32 %v4767_v55  ;;  %v4926_v55 = vpack.c.bf16 %v4958_v5, %v4910_v48 }
 0x432   :  { %5327 = vmatpush2.bf16.msra.mxu1 %v6155_v56 }
 0x433   :  { %5328 = vmatprep.subr.bf16.mxu1 %v6160_v2 }
 0x436   :  { %5329 = vmatpush2.bf16.msra.mxu1 %v6158_v36 }
 0x438   :  { %v6266_v49 = vpop.eup %6265 }
 0x439   :  { %v4816_v21 = vmul.f32 %v6266_v49, %v8991_v26 }
 0x43a   :  { %v6268_v20 = vpop.eup %6267 }
 0x43b   :  { %v4848_v9 = vmul.f32 0.1, %v4816_v21  ;;  %v4814_v42 = vmul.f32 %v6268_v20, %v8998_v45  ;;  %v4913_v21 = vld [vmem:[#allocation2 + $0x69] sm:$0xff] }
 0x43c   :  { %v6270_v35 = vpop.eup %6269  ;;  %v4834_v20 = vld [vmem:[#allocation2 + $0x170] sm:$0xff] }
 0x43d   :  { %v4864_v6 = vadd.f32 %v4848_v9, %v4832_v7  ;;  %v4846_v29 = vmul.f32 0.1, %v4814_v42  ;;  %v4817_v61 = vmul.f32 %v6270_v35, %v9005_v40 }
 0x43e   :  { %v6272_v33 = vpop.eup %6271 }
 0x43f   :  { %4880 = vst.msk [vmem:[#allocation2 + $0x140] sm:$0xff] %vm27_vm3, %v4864_v6  ;;  %v4862_v50 = vadd.f32 %v4846_v29, %v4830_v52  ;;  %v4849_v19 = vmul.f32 0.1, %v4817_v61  ;;  %v4815_v51 = vmul.f32 %v6272_v33, %v9011_v8  ;;  %v6001_v26 = vpop.f32.mrf.mxu0  ;;  %v4837_v29 = vld [vmem:[#allocation2 + $0x1b8] sm:$0xff]  ;;  %v4927_v61 = vpack.c.bf16 %v4913_v21, %v4959_v10 }
 0x440   :  { %v4724_v30 = vsub.f32 0.0, %v6001_v26 }
 0x441   :  { %4878 = vst.msk [vmem:[#allocation2 + $0x110] sm:$0xff] %vm27_vm3, %v4862_v50  ;;  %v4865_v11 = vadd.f32 %v4849_v19, %v4833_v25  ;;  %v4847_v45 = vmul.f32 0.1, %v4815_v51  ;;  %v4695_v18 = vpop.f32.mrf.mxu0  ;;  %v4835_v19 = vld [vmem:[#allocation2 + $0x188] sm:$0xff] }
 0x442   :  { %v4754_v12 = vmul.f32 1.442695, %v4724_v30  ;;  %v4722_v40 = vsub.f32 0.0, %v4695_v18 }
 0x443   :  { %4881 = vst.msk [vmem:[#allocation2 + $0x158] sm:$0xff] %vm27_vm3, %v4865_v11  ;;  %v4863_v59 = vadd.f32 %v4847_v45, %v4831_v39  ;;  %v6002_v15 = vpop.f32.mrf.mxu0 }
 0x444   :  { %6273 = vpow2.f32 %v4754_v12  ;;  %v4750_v53 = vmul.f32 1.442695, %v4722_v40  ;;  %v4725_v54 = vsub.f32 0.0, %v6002_v15  ;;  %v4949_v40 = vld [vmem:[#allocation2 + $0x1d0] sm:$0xff] }
 0x445   :  { %4879 = vst.msk [vmem:[#allocation2 + $0x128] sm:$0xff] %vm27_vm3, %v4863_v59  ;;  %v4698_v8 = vpop.f32.mrf.mxu0 }
 0x446   :  { %6275 = vpow2.f32 %v4750_v53  ;;  %v4756_v23 = vmul.f32 1.442695, %v4725_v54  ;;  %v4723_v24 = vsub.f32 0.0, %v4698_v8  ;;  %v4943_v44 = vld [vmem:[#allocation2 + $0x140] sm:$0xff] }
 0x447   :  { %v4961_v53 = vld [vmem:[#allocation2 + $0x81] sm:$0xff] }
 0x448   :  { %6277 = vpow2.f32 %v4756_v23  ;;  %v4752_v62 = vmul.f32 1.442695, %v4723_v24  ;;  %v4894_v63 = vld [vmem:[#allocation2 + $0x110] sm:$0xff]  ;;  %v4975_v54 = vpack.c.bf16 %v4961_v53, %v4913_v21  ;;  %v4915_v23 = vld [vmem:[#allocation2 + $0x99] sm:$0xff]  ;;  %v4967_v5 = vld [vmem:[#allocation2 + $0x141] sm:$0xff] }
 0x44a   :  { %6279 = vpow2.f32 %v4752_v62  ;;  %v4897_v43 = vld [vmem:[#allocation2 + $0x158] sm:$0xff]  ;;  %v4928_v62 = vpack.c.bf16 %v4915_v23, %v4961_v53 }
 0x44b   :  { %v4907_v4 = vpack.c.bf16 %v4897_v43, %v4943_v44  ;;  %v4921_v10 = vld [vmem:[#allocation2 + $0x159] sm:$0xff] }
 0x44c   :  { %v4942_v58 = vld [vmem:[#allocation2 + $0x128] sm:$0xff] }
 0x44d   :  { %v4954_v28 = vpack.c.bf16 %v4943_v44, %v4942_v58  ;;  %v4906_v34 = vpack.c.bf16 %v4942_v58, %v4894_v63  ;;  %v4917_v63 = vld [vmem:[#allocation2 + $0xc9] sm:$0xff] }
 0x44f   :  { %4998 = vrot.lane.b32.xlu1 %v4954_v28, %s6307_s13  ;;  %5022 = vrot.lane.b32.xlu0 %v4906_v34, %s6307_s13  ;;  %v4963_v34 = vld [vmem:[#allocation2 + $0xb1] sm:$0xff] }
 0x451   :  { %v6274_v22 = vpop.eup %6273 }
 0x452   :  { %v4772_v3 = vadd.f32 1.0, %v6274_v22 }
 0x453   :  { %v6276_v41 = vpop.eup %6275  ;;  %5024 = vrot.lane.b32.xlu0 %v4907_v4, %s6307_s13  ;;  %v4929_v4 = vpack.c.bf16 %v4917_v63, %v4963_v34 }
 0x454   :  { %6281 = vrcp.f32 %v4772_v3  ;;  %v4770_v46 = vadd.f32 1.0, %v6276_v41 }
 0x455   :  { %v6278_v0 = vpop.eup %6277 }
 0x456   :  { %6283 = vrcp.f32 %v4770_v46  ;;  %v4773_v60 = vadd.f32 1.0, %v6278_v0  ;;  %v4965_v46 = vld [vmem:[#allocation2 + $0xe1] sm:$0xff] }
 0x457   :  { %v6280_v17 = vpop.eup %6279 }
 0x458   :  { %6285 = vrcp.f32 %v4773_v60  ;;  %v4771_v14 = vadd.f32 1.0, %v6280_v17  ;;  %v4977_v60 = vpack.c.bf16 %v4965_v46, %v4917_v63 }
 0x45a   :  { %6287 = vrcp.f32 %v4771_v14  ;;  %v4919_v14 = vld [vmem:[#allocation2 + $0x129] sm:$0xff] }
 0x461   :  { %v6282_v16 = vpop.eup %6281 }
 0x462   :  { %v4820_v37 = vmul.f32 %v6282_v16, %v6001_v26  ;;  %v4918_v16 = vld [vmem:[#allocation2 + $0x111] sm:$0xff] }
 0x463   :  { %v6284_v31 = vpop.eup %6283 }
 0x464   :  { %v4852_v13 = vmul.f32 0.1, %v4820_v37  ;;  %v4818_v1 = vmul.f32 %v6284_v31, %v4695_v18  ;;  %v4930_v37 = vpack.c.bf16 %v4919_v14, %v4918_v16 }
 0x465   :  { %v6286_v27 = vpop.eup %6285 }
 0x466   :  { %v4868_v47 = vadd.f32 %v4852_v13, %v4836_v32  ;;  %v4850_v57 = vmul.f32 0.1, %v4818_v1  ;;  %v4821_v56 = vmul.f32 %v6286_v27, %v6002_v15  ;;  %v4991_v2 = vpop.permute.xlu1 %4990  ;;  %v5015_v49 = vpop.permute.xlu0 %5014  ;;  %v4978_v1 = vpack.c.bf16 %v4967_v5, %v4919_v14 }
 0x467   :  { %v6288_v36 = vpop.eup %6287  ;;  %v5032_v9 = vsel %vm27_vm3, %v4974_v38, %v4991_v2  ;;  %v5064_v42 = vsel %vm27_vm3, %v4926_v55, %v5015_v49  ;;  %v4931_v32 = vpack.c.bf16 %v4921_v10, %v4967_v5 }
 0x468   :  { %4884 = vst.msk [vmem:[#allocation2 + $0x1a0] sm:$0xff] %vm27_vm3, %v4868_v47  ;;  %v4866_v35 = vadd.f32 %v4850_v57, %v4834_v20  ;;  %v4853_v7 = vmul.f32 0.1, %v4821_v56  ;;  %v4819_v6 = vmul.f32 %v6288_v36, %v4698_v8  ;;  %5330 = vmatprep.mubr.bf16.mxu1 %v5064_v42 }
 0x469   :  { %5331 = vmatmul.mubr.bf16.vlgmr.msra.gmra.mxu1 %v5032_v9 }
 0x46a   :  { %4882 = vst.msk [vmem:[#allocation2 + $0x170] sm:$0xff] %vm27_vm3, %v4866_v35  ;;  %v4869_v33 = vadd.f32 %v4853_v7, %v4837_v29  ;;  %v4851_v52 = vmul.f32 0.1, %v4819_v6  ;;  %v5017_v50 = vpop.permute.xlu0 %5016 }
 0x46b   :  { %v5068_v51 = vsel %vm27_vm3, %v4927_v61, %v5017_v50 }
 0x46c   :  { %4885 = vst.msk [vmem:[#allocation2 + $0x1b8] sm:$0xff] %vm27_vm3, %v4869_v33  ;;  %v4867_v26 = vadd.f32 %v4851_v52, %v4835_v19  ;;  %5340 = vmatprep.mubr.bf16.mxu1 %v5068_v51  ;;  %v4973_v52 = vld [vmem:[#allocation2 + $0x1d1] sm:$0xff] }
 0x46e   :  { %4883 = vst.msk [vmem:[#allocation2 + $0x188] sm:$0xff] %vm27_vm3, %v4867_v26  ;;  %v5128_v26 = vlaneseq }
 0x46f   :  { %v4947_v45 = vld [vmem:[#allocation2 + $0x1a0] sm:$0xff] }
 0x470   :  { %v4971_v35 = vld [vmem:[#allocation2 + $0x1a1] sm:$0xff] }
 0x471   :  { %v4945_v25 = vld [vmem:[#allocation2 + $0x170] sm:$0xff] }
 0x472   :  { %v4955_v30 = vpack.c.bf16 %v4945_v25, %v4897_v43  ;;  %v4976_v43 = vpack.c.bf16 %v4963_v34, %v4915_v23  ;;  %v4969_v47 = vld [vmem:[#allocation2 + $0x171] sm:$0xff] }
 0x473   :  { %v4948_v12 = vld [vmem:[#allocation2 + $0x1b8] sm:$0xff]  ;;  %v4979_v57 = vpack.c.bf16 %v4969_v47, %v4921_v10 }
 0x474   :  { %5000 = vrot.lane.b32.xlu1 %v4955_v30, %s6307_s13  ;;  %v4957_v59 = vpack.c.bf16 %v4949_v40, %v4948_v12  ;;  %v4909_v15 = vpack.c.bf16 %v4948_v12, %v4947_v45  ;;  %v4925_v9 = vld [vmem:[#allocation2 + $0x1b9] sm:$0xff] }
 0x475   :  { %v4946_v11 = vld [vmem:[#allocation2 + $0x188] sm:$0xff]  ;;  %v4933_v29 = vpack.c.bf16 %v4925_v9, %v4971_v35  ;;  %v4981_v19 = vpack.c.bf16 %v4973_v52, %v4925_v9 }
 0x476   :  { %v4956_v18 = vpack.c.bf16 %v4947_v45, %v4946_v11  ;;  %v4908_v39 = vpack.c.bf16 %v4946_v11, %v4945_v25  ;;  %v4923_v2 = vld [vmem:[#allocation2 + $0x189] sm:$0xff]  ;;  %v5129_v25 = vshrl.u32 %v5128_v26, 7  ;;  %v5126_v11 = vld [vmem:[%s9242_s6] sm:$0x3] }
 0x477   :  { %v4932_v21 = vpack.c.bf16 %v4923_v2, %v4969_v47  ;;  %v4980_v7 = vpack.c.bf16 %v4971_v35, %v4923_v2 }
 0x478   :  { %5002 = vrot.lane.b32.xlu1 %v4956_v18, %s6307_s13  ;;  %5026 = vrot.lane.b32.xlu0 %v4908_v39, %s6307_s13  ;;  %v5130_v30 = vsub.s32 0, %v5129_v25  ;;  %v5134_v45 = vsub.s32 1, %v5129_v25 }
 0x47a   :  { %v9104_v18 = vrot.slane %v5126_v11, %v5130_v30  ;;  %v9106_v39 = vrot.slane %v5126_v11, %v5134_v45 }
 0x47c   :  { %5004 = vrot.lane.b32.xlu1 %v4957_v59, %s6307_s13  ;;  %5028 = vrot.lane.b32.xlu0 %v4909_v15, %s6307_s13 }
 0x491   :  { %v4993_v8 = vpop.permute.xlu1 %4992 }
 0x492   :  { %v5036_v24 = vsel %vm27_vm3, %v4975_v54, %v4993_v8 }
 0x493   :  { %5341 = vmatmul.mubr.bf16.gmra.mxu1 %v5036_v24 }
 0x495   :  { %v5019_v58 = vpop.permute.xlu0 %5018  ;;  %v4995_v28 = vpop.permute.xlu1 %4994 }
 0x496   :  { %v5072_v44 = vsel %vm27_vm3, %v4928_v62, %v5019_v58  ;;  %v5040_v3 = vsel %vm27_vm3, %v4976_v43, %v4995_v28 }
 0x497   :  { %5350 = vmatprep.mubr.bf16.mxu1 %v5072_v44 }
 0x499   :  { %v5021_v22 = vpop.permute.xlu0 %5020  ;;  %v4997_v0 = vpop.permute.xlu1 %4996 }
 0x49a   :  { %v5076_v41 = vsel %vm27_vm3, %v4929_v4, %v5021_v22  ;;  %v5044_v17 = vsel %vm27_vm3, %v4977_v60, %v4997_v0 }
 0x49b   :  { %5351 = vmatmul.mubr.bf16.gmra.mxu1 %v5040_v3 }
 0x49c   :  { %5360 = vmatprep.mubr.bf16.mxu1 %v5076_v41 }
 0x4a3   :  { %5361 = vmatmul.mubr.bf16.gmra.mxu1 %v5044_v17 }
 0x4c1   :  { %v4999_v31 = vpop.permute.xlu1 %4998  ;;  %v5023_v13 = vpop.permute.xlu0 %5022 }
 0x4c2   :  { %v5080_v48 = vsel %vm27_vm3, %v4930_v37, %v5023_v13  ;;  %v5048_v27 = vsel %vm27_vm3, %v4978_v1, %v4999_v31 }
 0x4c3   :  { %5370 = vmatprep.mubr.bf16.mxu1 %v5080_v48 }
 0x4c4   :  { %5371 = vmatmul.mubr.bf16.gmra.mxu1 %v5048_v27 }
 0x4c5   :  { %v5025_v38 = vpop.permute.xlu0 %5024 }
 0x4c6   :  { %v5084_v55 = vsel %vm27_vm3, %v4931_v32, %v5025_v38 }
 0x4c7   :  { %5380 = vmatprep.mubr.bf16.mxu1 %v5084_v55 }
 0x4e6   :  { %v5001_v56 = vpop.permute.xlu1 %5000 }
 0x4e7   :  { %v5052_v49 = vsel %vm27_vm3, %v4979_v57, %v5001_v56 }
 0x4e8   :  { %5381 = vmatmul.mubr.bf16.gmra.mxu1 %v5052_v49 }
 0x4ea   :  { %v5027_v36 = vpop.permute.xlu0 %5026  ;;  %v5003_v42 = vpop.permute.xlu1 %5002 }
 0x4eb   :  { %v5088_v20 = vsel %vm27_vm3, %v4932_v21, %v5027_v36  ;;  %v5056_v61 = vsel %vm27_vm3, %v4980_v7, %v5003_v42 }
 0x4ec   :  { %5390 = vmatprep.mubr.bf16.mxu1 %v5088_v20 }
 0x4ee   :  { %v5029_v6 = vpop.permute.xlu0 %5028  ;;  %v5005_v50 = vpop.permute.xlu1 %5004 }
 0x4ef   :  { %v5092_v33 = vsel %vm27_vm3, %v4933_v29, %v5029_v6  ;;  %v5060_v51 = vsel %vm27_vm3, %v4981_v19, %v5005_v50 }
 0x4f0   :  { %5391 = vmatmul.mubr.bf16.gmra.mxu1 %v5056_v61 }
 0x4f1   :  { %5400 = vmatprep.mubr.bf16.mxu1 %v5092_v33 }
 0x4f8   :  { %5401 = vmatmul.mubr.bf16.gmra.mxu1 %v5060_v51 }
 0x529   :  { %v5332_v12 = vpop.f32.mrf.mxu1 }
 0x52a   :  { %v5333_v40 = vadd.f32 %v5332_v12, %v9104_v18 }
 0x52b   :  { %v5334_v59 = vpop.f32.mrf.mxu1 }
 0x52c   :  { %5411 = vst [vmem:[%s9243_s7] sm:$0xff] %v5333_v40  ;;  %v5335_v15 = vadd.f32 %v5334_v59, %v9106_v39 }
 0x52d   :  { %v5336_v53 = vpop.f32.mrf.mxu1 }
 0x52e   :  { %5412 = vst [vmem:[%s9243_s7 + $0x8] sm:$0xff] %v5335_v15  ;;  %v5337_v54 = vadd.f32 %v5336_v53, %v9104_v18 }
 0x52f   :  { %v5338_v8 = vpop.f32.mrf.mxu1 }
 0x530   :  { %5413 = vst [vmem:[%s9243_s7 + $0x10] sm:$0xff] %v5337_v54  ;;  %v5339_v23 = vadd.f32 %v5338_v8, %v9106_v39 }
 0x532   :  { %5414 = vst [vmem:[%s9243_s7 + $0x18] sm:$0xff] %v5339_v23 }
 0x553   :  { %v5342_v24 = vpop.f32.mrf.mxu1 }
 0x554   :  { %v5343_v62 = vadd.f32 %v5342_v24, %v9104_v18 }
 0x555   :  { %v5344_v58 = vpop.f32.mrf.mxu1 }
 0x556   :  { %5415 = vst [vmem:[%s9243_s7 + $0x20] sm:$0xff] %v5343_v62  ;;  %v5345_v44 = vadd.f32 %v5344_v58, %v9106_v39 }
 0x557   :  { %v5346_v63 = vpop.f32.mrf.mxu1 }
 0x558   :  { %5416 = vst [vmem:[%s9243_s7 + $0x28] sm:$0xff] %v5345_v44  ;;  %v5347_v28 = vadd.f32 %v5346_v63, %v9104_v18 }
 0x559   :  { %v5348_v34 = vpop.f32.mrf.mxu1 }
 0x55a   :  { %5417 = vst [vmem:[%s9243_s7 + $0x30] sm:$0xff] %v5347_v28  ;;  %v5349_v43 = vadd.f32 %v5348_v34, %v9106_v39 }
 0x55b   :  { %v5352_v22 = vpop.f32.mrf.mxu1 }
 0x55c   :  { %5418 = vst [vmem:[%s9243_s7 + $0x38] sm:$0xff] %v5349_v43  ;;  %v5353_v4 = vadd.f32 %v5352_v22, %v9104_v18 }
 0x55d   :  { %v5354_v3 = vpop.f32.mrf.mxu1 }
 0x55e   :  { %5419 = vst [vmem:[%s9243_s7 + $0x40] sm:$0xff] %v5353_v4  ;;  %v5355_v41 = vadd.f32 %v5354_v3, %v9106_v39 }
 0x55f   :  { %v5356_v46 = vpop.f32.mrf.mxu1 }
 0x560   :  { %5420 = vst [vmem:[%s9243_s7 + $0x48] sm:$0xff] %v5355_v41  ;;  %v5357_v0 = vadd.f32 %v5356_v46, %v9104_v18 }
 0x561   :  { %v5358_v60 = vpop.f32.mrf.mxu1 }
 0x562   :  { %5421 = vst [vmem:[%s9243_s7 + $0x50] sm:$0xff] %v5357_v0  ;;  %v5359_v17 = vadd.f32 %v5358_v60, %v9106_v39 }
 0x563   :  { %v5362_v14 = vpop.f32.mrf.mxu1 }
 0x564   :  { %5422 = vst [vmem:[%s9243_s7 + $0x58] sm:$0xff] %v5359_v17  ;;  %v5363_v16 = vadd.f32 %v5362_v14, %v9104_v18 }
 0x565   :  { %v5364_v37 = vpop.f32.mrf.mxu1 }
 0x566   :  { %5423 = vst [vmem:[%s9243_s7 + $0x60] sm:$0xff] %v5363_v16  ;;  %v5365_v5 = vadd.f32 %v5364_v37, %v9106_v39 }
 0x567   :  { %v5366_v31 = vpop.f32.mrf.mxu1 }
 0x568   :  { %5424 = vst [vmem:[%s9243_s7 + $0x68] sm:$0xff] %v5365_v5  ;;  %v5367_v13 = vadd.f32 %v5366_v31, %v9104_v18 }
 0x569   :  { %v5368_v1 = vpop.f32.mrf.mxu1 }
 0x56a   :  { %5425 = vst [vmem:[%s9243_s7 + $0x70] sm:$0xff] %v5367_v13  ;;  %v5369_v10 = vadd.f32 %v5368_v1, %v9106_v39 }
 0x56c   :  { %5426 = vst [vmem:[%s9243_s7 + $0x78] sm:$0xff] %v5369_v10 }
 0x584   :  { %v5372_v48 = vpop.f32.mrf.mxu1 }
 0x585   :  { %v5373_v27 = vadd.f32 %v5372_v48, %v9104_v18 }
 0x586   :  { %v5374_v32 = vpop.f32.mrf.mxu1 }
 0x587   :  { %5427 = vst [vmem:[%s9243_s7 + $0x80] sm:$0xff] %v5373_v27  ;;  %v5375_v38 = vadd.f32 %v5374_v32, %v9106_v39 }
 0x588   :  { %v5376_v55 = vpop.f32.mrf.mxu1 }
 0x589   :  { %5428 = vst [vmem:[%s9243_s7 + $0x88] sm:$0xff] %v5375_v38  ;;  %v5377_v47 = vadd.f32 %v5376_v55, %v9104_v18 }
 0x58a   :  { %v5378_v57 = vpop.f32.mrf.mxu1 }
 0x58b   :  { %5429 = vst [vmem:[%s9243_s7 + $0x90] sm:$0xff] %v5377_v47  ;;  %v5379_v56 = vadd.f32 %v5378_v57, %v9106_v39 }
 0x58d   :  { %5430 = vst [vmem:[%s9243_s7 + $0x98] sm:$0xff] %v5379_v56 }
 0x5a8   :  { %v5382_v2 = vpop.f32.mrf.mxu1 }
 0x5a9   :  { %v5383_v49 = vadd.f32 %v5382_v2, %v9104_v18 }
 0x5aa   :  { %v5384_v21 = vpop.f32.mrf.mxu1 }
 0x5ab   :  { %5431 = vst [vmem:[%s9243_s7 + $0xa0] sm:$0xff] %v5383_v49  ;;  %v5385_v36 = vadd.f32 %v5384_v21, %v9106_v39 }
 0x5ac   :  { %v5386_v20 = vpop.f32.mrf.mxu1 }
 0x5ad   :  { %5432 = vst [vmem:[%s9243_s7 + $0xa8] sm:$0xff] %v5385_v36  ;;  %v5387_v9 = vadd.f32 %v5386_v20, %v9104_v18 }
 0x5ae   :  { %v5388_v42 = vpop.f32.mrf.mxu1 }
 0x5af   :  { %5433 = vst [vmem:[%s9243_s7 + $0xb0] sm:$0xff] %v5387_v9  ;;  %v5389_v35 = vadd.f32 %v5388_v42, %v9106_v39 }
 0x5b0   :  { %v5392_v7 = vpop.f32.mrf.mxu1 }
 0x5b1   :  { %5434 = vst [vmem:[%s9243_s7 + $0xb8] sm:$0xff] %v5389_v35  ;;  %v5393_v6 = vadd.f32 %v5392_v7, %v9104_v18 }
 0x5b2   :  { %v5394_v29 = vpop.f32.mrf.mxu1 }
 0x5b3   :  { %5435 = vst [vmem:[%s9243_s7 + $0xc0] sm:$0xff] %v5393_v6  ;;  %v5395_v61 = vadd.f32 %v5394_v29, %v9106_v39 }
 0x5b4   :  { %v5396_v33 = vpop.f32.mrf.mxu1 }
 0x5b5   :  { %5436 = vst [vmem:[%s9243_s7 + $0xc8] sm:$0xff] %v5395_v61  ;;  %v5397_v52 = vadd.f32 %v5396_v33, %v9104_v18 }
 0x5b6   :  { %v5398_v50 = vpop.f32.mrf.mxu1 }
 0x5b7   :  { %5437 = vst [vmem:[%s9243_s7 + $0xd0] sm:$0xff] %v5397_v52  ;;  %v5399_v19 = vadd.f32 %v5398_v50, %v9106_v39 }
 0x5b8   :  { %v5402_v51 = vpop.f32.mrf.mxu1 }
 0x5b9   :  { %5438 = vst [vmem:[%s9243_s7 + $0xd8] sm:$0xff] %v5399_v19  ;;  %v5403_v26 = vadd.f32 %v5402_v51, %v9104_v18 }
 0x5ba   :  { %v5404_v25 = vpop.f32.mrf.mxu1 }
 0x5bb   :  { %5439 = vst [vmem:[%s9243_s7 + $0xe0] sm:$0xff] %v5403_v26  ;;  %v5405_v30 = vadd.f32 %v5404_v25, %v9106_v39 }
 0x5bc   :  { %v5406_v11 = vpop.f32.mrf.mxu1 }
 0x5bd   :  { %5440 = vst [vmem:[%s9243_s7 + $0xe8] sm:$0xff] %v5405_v30  ;;  %v5407_v45 = vadd.f32 %v5406_v11, %v9104_v18 }
 0x5be   :  { %v5408_v12 = vpop.f32.mrf.mxu1 }
 0x5bf   :  { %5441 = vst [vmem:[%s9243_s7 + $0xf0] sm:$0xff] %v5407_v45  ;;  %v5409_v40 = vadd.f32 %v5408_v12, %v9106_v39 }
 0x5c1   :  { %5442 = vst [vmem:[%s9243_s7 + $0xf8] sm:$0xff] %v5409_v40 }

</bundles_post_ra>
